<compile_context>
chip_gen: v7x
topology: tpu7x:2x2x1
jax: 0.10.0
libtpu: 0.0.40
codegen_flags: <defaults>
</compile_context>

<pallas_src>
import functools

import jax
import jax.numpy as jnp
from jax.experimental import pallas as pl
from jax.experimental.pallas import tpu as pltpu


# Order in which per-layer parameter stacks are passed to the kernel.
ENC_KEYS = ('ln1_g', 'ln1_b', 'wq', 'bq', 'wk', 'bk', 'wv', 'bv', 'wo', 'bo',
            'ln2_g', 'ln2_b', 'w1', 'b1', 'w2', 'b2')
DEC_KEYS = ('ln1_g', 'ln1_b', 'sa_wq', 'sa_bq', 'sa_wk', 'sa_bk', 'sa_wv', 'sa_bv',
            'sa_wo', 'sa_bo',
            'ln2_g', 'ln2_b', 'ca_wq', 'ca_bq', 'ca_wk', 'ca_bk', 'ca_wv', 'ca_bv',
            'ca_wo', 'ca_bo',
            'ln3_g', 'ln3_b', 'w1', 'b1', 'w2', 'b2')


# ----------------------------- in-kernel helpers -----------------------------

def _layernorm(x, g, b):
    mean = jnp.mean(x, axis=-1, keepdims=True)
    var = jnp.mean((x - mean) ** 2, axis=-1, keepdims=True)
    return (x - mean) * jax.lax.rsqrt(var + 1e-5) * g + b


def _dot(a, b):
    return jnp.dot(a, b, preferred_element_type=jnp.float32)


def _mha(q, k, v, batch, t_q, t_k, num_heads, head_dim, mask):
    """q: (batch*t_q, H*d), k/v: (batch*t_k, H*d) -> (batch*t_q, H*d).

    One heads-leading batched contraction per batch element (no per-head
    lane slices, no lane-axis concatenate).  The 1/sqrt(d) scale is already
    folded into the Q projection at pack time.
    """
    hd = num_heads * head_dim
    outs = []
    for b in range(batch):
        qb = q[b * t_q:(b + 1) * t_q].reshape(t_q, num_heads, head_dim)
        kb = k[b * t_k:(b + 1) * t_k].reshape(t_k, num_heads, head_dim)
        vb = v[b * t_k:(b + 1) * t_k].reshape(t_k, num_heads, head_dim)
        qb = qb.transpose(1, 0, 2)   # (H, Tq, d)
        kb = kb.transpose(1, 0, 2)   # (H, Tk, d)
        vb = vb.transpose(1, 0, 2)   # (H, Tk, d)
        att = jnp.einsum('hqd,hkd->hqk', qb, kb,
                         preferred_element_type=jnp.float32)
        if mask is not None:
            att = jnp.where(mask[None, :, :], -jnp.inf, att)
        att = att - jnp.max(att, axis=-1, keepdims=True)
        p = jnp.exp(att)
        p = p / jnp.sum(p, axis=-1, keepdims=True)   # exact softmax
        ob = jnp.einsum('hqk,hkd->hqd', p, vb,
                        preferred_element_type=jnp.float32)
        outs.append(ob.transpose(1, 0, 2).reshape(t_q, hd))
    return jnp.concatenate(outs, axis=0)


# ----------------------------- fused forward kernel -----------------------------

def _transformer_kernel(*refs, num_heads, qk_dim, batch, t_enc, t_dec):
    it = iter(refs)
    x_enc_ref = next(it)                       # (B*T_enc, D_enc)
    x_dec_ref = next(it)                       # (B*T_dec, D_dec)
    enc = {k: next(it) for k in ENC_KEYS}      # per-layer blocks (1, ...)
    dec = {k: next(it) for k in DEC_KEYS}
    out_w_ref = next(it)
    out_b_ref = next(it)
    o_ref = next(it)                           # (B*T_dec, V_pad)
    xe = next(it)                              # VMEM scratch: encoder activations
    xd = next(it)                              # VMEM scratch: decoder activations

    phase = pl.program_id(0)                   # 0 = encoder stack, 1 = decoder stack
    layer = pl.program_id(1)
    last_layer = pl.num_programs(1) - 1

    # Causal mask hoisted out of the attention helper: built once, shared by
    # all decoder layers / heads / batch elements.
    row = jax.lax.broadcasted_iota(jnp.int32, (t_dec, t_dec), 0)
    col = jax.lax.broadcasted_iota(jnp.int32, (t_dec, t_dec), 1)
    causal = col > row

    @pl.when((phase == 0) & (layer == 0))
    def _init():
        xe[...] = x_enc_ref[...]
        xd[...] = x_dec_ref[...]

    @pl.when(phase == 0)
    def _encoder_layer():
        p = {k: enc[k][0] for k in ENC_KEYS}
        x = xe[...]
        h = _layernorm(x, p['ln1_g'], p['ln1_b'])
        q = _dot(h, p['wq']) + p['bq']
        kk = _dot(h, p['wk']) + p['bk']
        vv = _dot(h, p['wv']) + p['bv']
        o = _mha(q, kk, vv, batch, t_enc, t_enc, num_heads, qk_dim, None)
        x = x + _dot(o, p['wo']) + p['bo']
        h = _layernorm(x, p['ln2_g'], p['ln2_b'])
        h1 = jnp.maximum(_dot(h, p['w1']) + p['b1'], 0.0)
        x = x + _dot(h1, p['w2']) + p['b2']
        xe[...] = x

    @pl.when(phase == 1)
    def _decoder_layer():
        p = {k: dec[k][0] for k in DEC_KEYS}
        y = xd[...]
        x_enc_out = xe[...]                    # final encoder output
        # masked self-attention
        h = _layernorm(y, p['ln1_g'], p['ln1_b'])
        q = _dot(h, p['sa_wq']) + p['sa_bq']
        kk = _dot(h, p['sa_wk']) + p['sa_bk']
        vv = _dot(h, p['sa_wv']) + p['sa_bv']
        o = _mha(q, kk, vv, batch, t_dec, t_dec, num_heads, qk_dim, causal)
        y = y + _dot(o, p['sa_wo']) + p['sa_bo']
        # cross-attention to the final encoder output
        h = _layernorm(y, p['ln2_g'], p['ln2_b'])
        q = _dot(h, p['ca_wq']) + p['ca_bq']
        kk = _dot(x_enc_out, p['ca_wk']) + p['ca_bk']
        vv = _dot(x_enc_out, p['ca_wv']) + p['ca_bv']
        o = _mha(q, kk, vv, batch, t_dec, t_enc, num_heads, qk_dim, None)
        y = y + _dot(o, p['ca_wo']) + p['ca_bo']
        # feed-forward
        h = _layernorm(y, p['ln3_g'], p['ln3_b'])
        h1 = jnp.maximum(_dot(h, p['w1']) + p['b1'], 0.0)
        y = y + _dot(h1, p['w2']) + p['b2']
        xd[...] = y

    @pl.when((phase == 1) & (layer == last_layer))
    def _final_projection():
        o_ref[...] = (_dot(xd[...], out_w_ref[...])
                      + out_b_ref[...]).astype(o_ref.dtype)


# ----------------------------- wrapper -----------------------------

def transformer_forward(packed, x_enc_ids, x_dec_ids, *,
                        num_layers, num_heads, qk_dim, vocab_dec):
    # TODO(synk): embedding gather + positional add stay in plain JAX; a
    # DMA-gather Pallas kernel is overkill at these sizes.
    x_enc = jnp.take(packed['emb_enc'], x_enc_ids, axis=0) \
        + packed['pos_enc'][:x_enc_ids.shape[1]]
    x_dec = jnp.take(packed['emb_dec'], x_dec_ids, axis=0) \
        + packed['pos_dec'][:x_dec_ids.shape[1]]
    x_enc = x_enc.astype(jnp.float32)
    x_dec = x_dec.astype(jnp.float32)

    B, T_enc, D_enc = x_enc.shape
    _, T_dec, D_dec = x_dec.shape
    V_pad = packed['out_w'].shape[1]

    # Sublane-pad the decoder sequence to a multiple of 8; padded rows are
    # blocked by the causal mask and sliced away below.
    T_enc_p = ((T_enc + 7) // 8) * 8
    T_dec_p = ((T_dec + 7) // 8) * 8
    # TODO(synk): padding T_enc would need key-padding masks in the unmasked
    # encoder self-attention and cross-attention; demo T_enc is already 8.
    assert T_enc_p == T_enc, "encoder sequence length must be a multiple of 8"
    if T_dec_p != T_dec:
        x_dec = jnp.pad(x_dec, ((0, 0), (0, T_dec_p - T_dec), (0, 0)))

    # Fold batch into the matmul M dimension (single-TC friendly).
    x_enc_f = x_enc.reshape(B * T_enc, D_enc)
    x_dec_f = x_dec.reshape(B * T_dec_p, D_dec)

    def const_spec(arr):
        ndim = arr.ndim
        return pl.BlockSpec(arr.shape, lambda p, l, _n=ndim: (0,) * _n)

    def enc_layer_spec(arr):
        rest = arr.shape[1:]
        nrest = len(rest)
        # Fetch encoder layer l during phase 0; pin to block 0 during phase 1
        # so the (unused) block is not re-DMA'd every decoder step.
        return pl.BlockSpec((1,) + rest,
                            lambda p, l, _n=nrest: ((1 - p) * l,) + (0,) * _n)

    def dec_layer_spec(arr):
        rest = arr.shape[1:]
        nrest = len(rest)
        return pl.BlockSpec((1,) + rest,
                            lambda p, l, _n=nrest: (p * l,) + (0,) * _n)

    inputs = [x_enc_f, x_dec_f]
    in_specs = [const_spec(x_enc_f), const_spec(x_dec_f)]
    for k in ENC_KEYS:
        arr = packed['enc'][k]
        inputs.append(arr)
        in_specs.append(enc_layer_spec(arr))
    for k in DEC_KEYS:
        arr = packed['dec'][k]
        inputs.append(arr)
        in_specs.append(dec_layer_spec(arr))
    inputs += [packed['out_w'], packed['out_b']]
    in_specs += [const_spec(packed['out_w']), const_spec(packed['out_b'])]

    out = pl.pallas_call(
        functools.partial(_transformer_kernel, num_heads=num_heads,
                          qk_dim=qk_dim, batch=B, t_enc=T_enc, t_dec=T_dec_p),
        out_shape=jax.ShapeDtypeStruct((B * T_dec_p, V_pad), jnp.float32),
        grid=(2, num_layers),
        in_specs=in_specs,
        out_specs=pl.BlockSpec((B * T_dec_p, V_pad), lambda p, l: (0, 0)),
        scratch_shapes=[pltpu.VMEM((B * T_enc, D_enc), jnp.float32),
                        pltpu.VMEM((B * T_dec_p, D_dec), jnp.float32)],
        compiler_params=pltpu.CompilerParams(
            dimension_semantics=("arbitrary", "arbitrary"),
            vmem_limit_bytes=32 * 1024 * 1024),
    )(*inputs)

    out = out.reshape(B, T_dec_p, V_pad)
    return out[:, :T_dec, :vocab_dec]


# ----------------------------- deterministic param init -----------------------------

def positional_encoding(in_dim, length):
    pos = jnp.arange(length, dtype=jnp.float32)[:, None]
    i = jnp.arange(in_dim, dtype=jnp.float32)[None, :]
    angle_rates = 1.0 / jnp.power(10000.0, 2.0 * jnp.floor(i / 2.0) / in_dim)
    pe = pos * angle_rates
    pe = pe.at[:, ::2].set(jnp.sin(pe[:, ::2]))
    pe = pe.at[:, 1::2].set(jnp.cos(pe[:, 1::2]))
    return pe


def _init_linear(key, in_dim, out_dim):
    k1, k2 = jax.random.split(key)
    bound = 1.0 / jnp.sqrt(in_dim)
    w = jax.random.uniform(k1, (in_dim, out_dim), jnp.float32, -bound, bound)
    b = jax.random.uniform(k2, (out_dim,), jnp.float32, -bound, bound)
    return w, b


def _init_attn(key, q_in, kv_in, qk_dim, num_heads):
    ks = jax.random.split(key, 4)
    hd = qk_dim * num_heads
    wq, bq = _init_linear(ks[0], q_in, hd)
    wk, bk = _init_linear(ks[1], kv_in, hd)
    wv, bv = _init_linear(ks[2], kv_in, hd)
    wp, bp = _init_linear(ks[3], hd, q_in)
    return dict(wq=wq, bq=bq, wk=wk, bk=bk, wv=wv, bv=bv, wp=wp, bp=bp)


def _init_ln(dim):
    return dict(g=jnp.ones((dim,), jnp.float32), b=jnp.zeros((dim,), jnp.float32))


def _init_ffn(key, dim):
    k1, k2 = jax.random.split(key)
    w1, b1 = _init_linear(k1, dim, 4 * dim)
    w2, b2 = _init_linear(k2, 4 * dim, dim)
    return dict(w1=w1, b1=b1, w2=w2, b2=b2)


def init_transformer(key, vocab_enc, emb_enc_dim, ctx_enc, vocab_dec, emb_dec_dim,
                     ctx_dec, qk_dim, num_heads, num_layers):
    keys = jax.random.split(key, 3 + 2 * num_layers)
    params = {}
    params['emb_enc'] = jax.random.normal(keys[0], (vocab_enc, emb_enc_dim), jnp.float32)
    params['emb_dec'] = jax.random.normal(keys[1], (vocab_dec, emb_dec_dim), jnp.float32)
    params['pos_enc'] = positional_encoding(emb_enc_dim, ctx_enc)
    params['pos_dec'] = positional_encoding(emb_dec_dim, ctx_dec)
    encoders = []
    for l in range(num_layers):
        ka, kf = jax.random.split(keys[2 + l])
        encoders.append(dict(
            sa=_init_attn(ka, emb_enc_dim, emb_enc_dim, qk_dim, num_heads),
            ln1=_init_ln(emb_enc_dim),
            ffn=_init_ffn(kf, emb_enc_dim),
            ln2=_init_ln(emb_enc_dim)))
    params['encoders'] = encoders
    decoders = []
    for l in range(num_layers):
        ka, kc, kf = jax.random.split(keys[2 + num_layers + l], 3)
        decoders.append(dict(
            sa=_init_attn(ka, emb_dec_dim, emb_dec_dim, qk_dim, num_heads),
            ln1=_init_ln(emb_dec_dim),
            ca=_init_attn(kc, emb_dec_dim, emb_enc_dim, qk_dim, num_heads),
            ln2=_init_ln(emb_dec_dim),
            ffn=_init_ffn(kf, emb_dec_dim),
            ln3=_init_ln(emb_dec_dim)))
    params['decoders'] = decoders
    params['out_w'], params['out_b'] = _init_linear(keys[-1], emb_dec_dim, vocab_dec)
    return params


# ----------------------------- packing for the fused kernel -----------------------------

def pack_params(params, qk_dim):
    """Stack per-layer params on a leading L axis, fold the 1/sqrt(d) attention
    scale into the Q projections, and pad the vocab projection to 128 lanes."""
    scale = qk_dim ** -0.5

    def row(v):      # 1D (dim,) -> (1, dim) so the stacked array is (L, 1, dim)
        return v[None, :]

    enc = {k: [] for k in ENC_KEYS}
    for p in params['encoders']:
        sa, ffn = p['sa'], p['ffn']
        enc['ln1_g'].append(row(p['ln1']['g']))
        enc['ln1_b'].append(row(p['ln1']['b']))
        enc['wq'].append(sa['wq'] * scale)
        enc['bq'].append(row(sa['bq'] * scale))
        enc['wk'].append(sa['wk'])
        enc['bk'].append(row(sa['bk']))
        enc['wv'].append(sa['wv'])
        enc['bv'].append(row(sa['bv']))
        enc['wo'].append(sa['wp'])
        enc['bo'].append(row(sa['bp']))
        enc['ln2_g'].append(row(p['ln2']['g']))
        enc['ln2_b'].append(row(p['ln2']['b']))
        enc['w1'].append(ffn['w1'])
        enc['b1'].append(row(ffn['b1']))
        enc['w2'].append(ffn['w2'])
        enc['b2'].append(row(ffn['b2']))
    enc = {k: jnp.stack(v, axis=0) for k, v in enc.items()}

    dec = {k: [] for k in DEC_KEYS}
    for p in params['decoders']:
        sa, ca, ffn = p['sa'], p['ca'], p['ffn']
        dec['ln1_g'].append(row(p['ln1']['g']))
        dec['ln1_b'].append(row(p['ln1']['b']))
        dec['sa_wq'].append(sa['wq'] * scale)
        dec['sa_bq'].append(row(sa['bq'] * scale))
        dec['sa_wk'].append(sa['wk'])
        dec['sa_bk'].append(row(sa['bk']))
        dec['sa_wv'].append(sa['wv'])
        dec['sa_bv'].append(row(sa['bv']))
        dec['sa_wo'].append(sa['wp'])
        dec['sa_bo'].append(row(sa['bp']))
        dec['ln2_g'].append(row(p['ln2']['g']))
        dec['ln2_b'].append(row(p['ln2']['b']))
        dec['ca_wq'].append(ca['wq'] * scale)
        dec['ca_bq'].append(row(ca['bq'] * scale))
        dec['ca_wk'].append(ca['wk'])
        dec['ca_bk'].append(row(ca['bk']))
        dec['ca_wv'].append(ca['wv'])
        dec['ca_bv'].append(row(ca['bv']))
        dec['ca_wo'].append(ca['wp'])
        dec['ca_bo'].append(row(ca['bp']))
        dec['ln3_g'].append(row(p['ln3']['g']))
        dec['ln3_b'].append(row(p['ln3']['b']))
        dec['w1'].append(ffn['w1'])
        dec['b1'].append(row(ffn['b1']))
        dec['w2'].append(ffn['w2'])
        dec['b2'].append(row(ffn['b2']))
    dec = {k: jnp.stack(v, axis=0) for k, v in dec.items()}

    d_dec, vocab = params['out_w'].shape
    v_pad = max(128, ((vocab + 127) // 128) * 128)
    out_w = jnp.zeros((d_dec, v_pad), jnp.float32).at[:, :vocab].set(params['out_w'])
    out_b = jnp.zeros((1, v_pad), jnp.float32).at[:, :vocab].set(params['out_b'][None, :])

    # TODO(synk): store matmul weights in bf16 (f32 accumulate) to halve
    # VMEM/HBM traffic on v6e/v7x; kept f32 here for numerical exactness.
    return dict(emb_enc=params['emb_enc'], emb_dec=params['emb_dec'],
                pos_enc=params['pos_enc'], pos_dec=params['pos_dec'],
                enc=enc, dec=dec, out_w=out_w, out_b=out_b)


# ----------------------------- main -----------------------------

if __name__ == "__main__":
    vocab_enc, emb_enc_dim, ctx_enc = 11, 16, 12
    vocab_dec, emb_dec_dim, ctx_dec = 13, 32, 10
    qk_dim, num_heads, num_layers = 8, 2, 2
    B, T_enc, T_dec = 2, 8, 6

    key = jax.random.PRNGKey(0)
    k_param, k_enc, k_dec = jax.random.split(key, 3)
    params = init_transformer(k_param, vocab_enc, emb_enc_dim, ctx_enc,
                              vocab_dec, emb_dec_dim, ctx_dec,
                              qk_dim, num_heads, num_layers)
    packed = pack_params(params, qk_dim)

    x_enc_ids = jax.random.randint(k_enc, (B, T_enc), 0, vocab_enc, dtype=jnp.int32)
    x_dec_ids = jax.random.randint(k_dec, (B, T_dec), 0, vocab_dec, dtype=jnp.int32)

    fwd = jax.jit(functools.partial(transformer_forward,
                                    num_layers=num_layers, num_heads=num_heads,
                                    qk_dim=qk_dim, vocab_dec=vocab_dec))
    logits = fwd(packed, x_enc_ids, x_dec_ids)
    jax.block_until_ready(logits)
    assert logits.shape == (B, T_dec, vocab_dec), logits.shape
    assert bool(jnp.all(jnp.isfinite(logits)))
    print("KERNEL_OK")
</pallas_src>

<mosaic_0001>
module attributes {stable_mosaic.version = 11 : i64} {
  func.func @_transformer_kernel(%arg0: i32, %arg1: i32, %arg2: memref<16x16xf32, #tpu.memory_space<vmem>>, %arg3: memref<16x32xf32, #tpu.memory_space<vmem>>, %arg4: memref<1x1x16xf32, #tpu.memory_space<vmem>>, %arg5: memref<1x1x16xf32, #tpu.memory_space<vmem>>, %arg6: memref<1x16x16xf32, #tpu.memory_space<vmem>>, %arg7: memref<1x1x16xf32, #tpu.memory_space<vmem>>, %arg8: memref<1x16x16xf32, #tpu.memory_space<vmem>>, %arg9: memref<1x1x16xf32, #tpu.memory_space<vmem>>, %arg10: memref<1x16x16xf32, #tpu.memory_space<vmem>>, %arg11: memref<1x1x16xf32, #tpu.memory_space<vmem>>, %arg12: memref<1x16x16xf32, #tpu.memory_space<vmem>>, %arg13: memref<1x1x16xf32, #tpu.memory_space<vmem>>, %arg14: memref<1x1x16xf32, #tpu.memory_space<vmem>>, %arg15: memref<1x1x16xf32, #tpu.memory_space<vmem>>, %arg16: memref<1x16x64xf32, #tpu.memory_space<vmem>>, %arg17: memref<1x1x64xf32, #tpu.memory_space<vmem>>, %arg18: memref<1x64x16xf32, #tpu.memory_space<vmem>>, %arg19: memref<1x1x16xf32, #tpu.memory_space<vmem>>, %arg20: memref<1x1x32xf32, #tpu.memory_space<vmem>>, %arg21: memref<1x1x32xf32, #tpu.memory_space<vmem>>, %arg22: memref<1x32x16xf32, #tpu.memory_space<vmem>>, %arg23: memref<1x1x16xf32, #tpu.memory_space<vmem>>, %arg24: memref<1x32x16xf32, #tpu.memory_space<vmem>>, %arg25: memref<1x1x16xf32, #tpu.memory_space<vmem>>, %arg26: memref<1x32x16xf32, #tpu.memory_space<vmem>>, %arg27: memref<1x1x16xf32, #tpu.memory_space<vmem>>, %arg28: memref<1x16x32xf32, #tpu.memory_space<vmem>>, %arg29: memref<1x1x32xf32, #tpu.memory_space<vmem>>, %arg30: memref<1x1x32xf32, #tpu.memory_space<vmem>>, %arg31: memref<1x1x32xf32, #tpu.memory_space<vmem>>, %arg32: memref<1x32x16xf32, #tpu.memory_space<vmem>>, %arg33: memref<1x1x16xf32, #tpu.memory_space<vmem>>, %arg34: memref<1x16x16xf32, #tpu.memory_space<vmem>>, %arg35: memref<1x1x16xf32, #tpu.memory_space<vmem>>, %arg36: memref<1x16x16xf32, #tpu.memory_space<vmem>>, %arg37: memref<1x1x16xf32, #tpu.memory_space<vmem>>, %arg38: memref<1x16x32xf32, #tpu.memory_space<vmem>>, %arg39: memref<1x1x32xf32, #tpu.memory_space<vmem>>, %arg40: memref<1x1x32xf32, #tpu.memory_space<vmem>>, %arg41: memref<1x1x32xf32, #tpu.memory_space<vmem>>, %arg42: memref<1x32x128xf32, #tpu.memory_space<vmem>>, %arg43: memref<1x1x128xf32, #tpu.memory_space<vmem>>, %arg44: memref<1x128x32xf32, #tpu.memory_space<vmem>>, %arg45: memref<1x1x32xf32, #tpu.memory_space<vmem>>, %arg46: memref<32x128xf32, #tpu.memory_space<vmem>>, %arg47: memref<1x128xf32, #tpu.memory_space<vmem>>, %arg48: memref<16x128xf32, #tpu.memory_space<vmem>>, %arg49: memref<16x16xf32, #tpu.memory_space<vmem>>, %arg50: memref<16x32xf32, #tpu.memory_space<vmem>>) attributes {dimension_semantics = [#tpu.dimension_semantics<arbitrary>, #tpu.dimension_semantics<arbitrary>], iteration_bounds = array<i64: 2, 2>, scalar_prefetch = 0 : i64, scratch_operands = 2 : i64, tpu.core_type = #tpu.core_type<tc>, window_params = [{pipeline_mode = #tpu.pipeline_mode<synchronous>, transform_indices = @transform_0, window_bounds = array<i64: 16, 16>}, {pipeline_mode = #tpu.pipeline_mode<synchronous>, transform_indices = @transform_1, window_bounds = array<i64: 16, 32>}, {transform_indices = @transform_2, window_bounds = array<i64: 1, 1, 16>}, {transform_indices = @transform_3, window_bounds = array<i64: 1, 1, 16>}, {transform_indices = @transform_4, window_bounds = array<i64: 1, 16, 16>}, {transform_indices = @transform_5, window_bounds = array<i64: 1, 1, 16>}, {transform_indices = @transform_6, window_bounds = array<i64: 1, 16, 16>}, {transform_indices = @transform_7, window_bounds = array<i64: 1, 1, 16>}, {transform_indices = @transform_8, window_bounds = array<i64: 1, 16, 16>}, {transform_indices = @transform_9, window_bounds = array<i64: 1, 1, 16>}, {transform_indices = @transform_10, window_bounds = array<i64: 1, 16, 16>}, {transform_indices = @transform_11, window_bounds = array<i64: 1, 1, 16>}, {transform_indices = @transform_12, window_bounds = array<i64: 1, 1, 16>}, {transform_indices = @transform_13, window_bounds = array<i64: 1, 1, 16>}, {transform_indices = @transform_14, window_bounds = array<i64: 1, 16, 64>}, {transform_indices = @transform_15, window_bounds = array<i64: 1, 1, 64>}, {transform_indices = @transform_16, window_bounds = array<i64: 1, 64, 16>}, {transform_indices = @transform_17, window_bounds = array<i64: 1, 1, 16>}, {transform_indices = @transform_18, window_bounds = array<i64: 1, 1, 32>}, {transform_indices = @transform_19, window_bounds = array<i64: 1, 1, 32>}, {transform_indices = @transform_20, window_bounds = array<i64: 1, 32, 16>}, {transform_indices = @transform_21, window_bounds = array<i64: 1, 1, 16>}, {transform_indices = @transform_22, window_bounds = array<i64: 1, 32, 16>}, {transform_indices = @transform_23, window_bounds = array<i64: 1, 1, 16>}, {transform_indices = @transform_24, window_bounds = array<i64: 1, 32, 16>}, {transform_indices = @transform_25, window_bounds = array<i64: 1, 1, 16>}, {transform_indices = @transform_26, window_bounds = array<i64: 1, 16, 32>}, {transform_indices = @transform_27, window_bounds = array<i64: 1, 1, 32>}, {transform_indices = @transform_28, window_bounds = array<i64: 1, 1, 32>}, {transform_indices = @transform_29, window_bounds = array<i64: 1, 1, 32>}, {transform_indices = @transform_30, window_bounds = array<i64: 1, 32, 16>}, {transform_indices = @transform_31, window_bounds = array<i64: 1, 1, 16>}, {transform_indices = @transform_32, window_bounds = array<i64: 1, 16, 16>}, {transform_indices = @transform_33, window_bounds = array<i64: 1, 1, 16>}, {transform_indices = @transform_34, window_bounds = array<i64: 1, 16, 16>}, {transform_indices = @transform_35, window_bounds = array<i64: 1, 1, 16>}, {transform_indices = @transform_36, window_bounds = array<i64: 1, 16, 32>}, {transform_indices = @transform_37, window_bounds = array<i64: 1, 1, 32>}, {transform_indices = @transform_38, window_bounds = array<i64: 1, 1, 32>}, {transform_indices = @transform_39, window_bounds = array<i64: 1, 1, 32>}, {transform_indices = @transform_40, window_bounds = array<i64: 1, 32, 128>}, {transform_indices = @transform_41, window_bounds = array<i64: 1, 1, 128>}, {transform_indices = @transform_42, window_bounds = array<i64: 1, 128, 32>}, {transform_indices = @transform_43, window_bounds = array<i64: 1, 1, 32>}, {pipeline_mode = #tpu.pipeline_mode<synchronous>, transform_indices = @transform_44, window_bounds = array<i64: 32, 128>}, {pipeline_mode = #tpu.pipeline_mode<synchronous>, transform_indices = @transform_45, window_bounds = array<i64: 1, 128>}, {pipeline_mode = #tpu.pipeline_mode<synchronous>, transform_indices = @transform_46, window_bounds = array<i64: 16, 128>}]} {
    %0 = tpu.iota {dimensions = array<i32: 0>} : vector<8x8xi32>
    %1 = tpu.iota {dimensions = array<i32: 1>} : vector<8x8xi32>
    %2 = arith.cmpi sgt, %1, %0 : vector<8x8xi32>
    %c0_i32 = arith.constant 0 : i32
    %3 = arith.cmpi eq, %arg0, %c0_i32 : i32
    %c0_i32_0 = arith.constant 0 : i32
    %4 = arith.cmpi eq, %arg1, %c0_i32_0 : i32
    %5 = arith.andi %3, %4 : i1
    %6 = arith.extui %5 : i1 to i32
    %c0_i32_1 = arith.constant 0 : i32
    %7 = arith.cmpi ne, %6, %c0_i32_1 : i32
    scf.if %7 {
      %c0 = arith.constant 0 : index
      %c0_8 = arith.constant 0 : index
      %19 = vector.load %arg2[%c0, %c0_8] : memref<16x16xf32, #tpu.memory_space<vmem>>, vector<16x16xf32>
      %c0_9 = arith.constant 0 : index
      %c0_10 = arith.constant 0 : index
      %20 = vector.load %arg49[%c0_9, %c0_10] : memref<16x16xf32, #tpu.memory_space<vmem>>, vector<16x16xf32>
      tpu.vector_store %arg49[%c0_9, %c0_10], %19 {strides = array<i32>} : memref<16x16xf32, #tpu.memory_space<vmem>>, vector<16x16xf32>,
      %c0_11 = arith.constant 0 : index
      %c0_12 = arith.constant 0 : index
      %21 = vector.load %arg3[%c0_11, %c0_12] : memref<16x32xf32, #tpu.memory_space<vmem>>, vector<16x32xf32>
      %c0_13 = arith.constant 0 : index
      %c0_14 = arith.constant 0 : index
      %22 = vector.load %arg50[%c0_13, %c0_14] : memref<16x32xf32, #tpu.memory_space<vmem>>, vector<16x32xf32>
      tpu.vector_store %arg50[%c0_13, %c0_14], %21 {strides = array<i32>} : memref<16x32xf32, #tpu.memory_space<vmem>>, vector<16x32xf32>,
    } else {
    }
    %c0_i32_2 = arith.constant 0 : i32
    %8 = arith.cmpi eq, %arg0, %c0_i32_2 : i32
    %9 = arith.extui %8 : i1 to i32
    %c0_i32_3 = arith.constant 0 : i32
    %10 = arith.cmpi ne, %9, %c0_i32_3 : i32
    scf.if %10 {
      %c0 = arith.constant 0 : index
      %c0_8 = arith.constant 0 : index
      %c0_9 = arith.constant 0 : index
      %19 = vector.load %arg4[%c0, %c0_8, %c0_9] : memref<1x1x16xf32, #tpu.memory_space<vmem>>, vector<1x1x16xf32>
      %20 = vector.shape_cast %19 : vector<1x1x16xf32> to vector<1x16xf32>
      %c0_10 = arith.constant 0 : index
      %c0_11 = arith.constant 0 : index
      %c0_12 = arith.constant 0 : index
      %21 = vector.load %arg5[%c0_10, %c0_11, %c0_12] : memref<1x1x16xf32, #tpu.memory_space<vmem>>, vector<1x1x16xf32>
      %22 = vector.shape_cast %21 : vector<1x1x16xf32> to vector<1x16xf32>
      %c0_13 = arith.constant 0 : index
      %c0_14 = arith.constant 0 : index
      %c0_15 = arith.constant 0 : index
      %23 = vector.load %arg6[%c0_13, %c0_14, %c0_15] : memref<1x16x16xf32, #tpu.memory_space<vmem>>, vector<1x16x16xf32>
      %24 = vector.shape_cast %23 : vector<1x16x16xf32> to vector<16x16xf32>
      %c0_16 = arith.constant 0 : index
      %c0_17 = arith.constant 0 : index
      %c0_18 = arith.constant 0 : index
      %25 = vector.load %arg7[%c0_16, %c0_17, %c0_18] : memref<1x1x16xf32, #tpu.memory_space<vmem>>, vector<1x1x16xf32>
      %26 = vector.shape_cast %25 : vector<1x1x16xf32> to vector<1x16xf32>
      %c0_19 = arith.constant 0 : index
      %c0_20 = arith.constant 0 : index
      %c0_21 = arith.constant 0 : index
      %27 = vector.load %arg8[%c0_19, %c0_20, %c0_21] : memref<1x16x16xf32, #tpu.memory_space<vmem>>, vector<1x16x16xf32>
      %28 = vector.shape_cast %27 : vector<1x16x16xf32> to vector<16x16xf32>
      %c0_22 = arith.constant 0 : index
      %c0_23 = arith.constant 0 : index
      %c0_24 = arith.constant 0 : index
      %29 = vector.load %arg9[%c0_22, %c0_23, %c0_24] : memref<1x1x16xf32, #tpu.memory_space<vmem>>, vector<1x1x16xf32>
      %30 = vector.shape_cast %29 : vector<1x1x16xf32> to vector<1x16xf32>
      %c0_25 = arith.constant 0 : index
      %c0_26 = arith.constant 0 : index
      %c0_27 = arith.constant 0 : index
      %31 = vector.load %arg10[%c0_25, %c0_26, %c0_27] : memref<1x16x16xf32, #tpu.memory_space<vmem>>, vector<1x16x16xf32>
      %32 = vector.shape_cast %31 : vector<1x16x16xf32> to vector<16x16xf32>
      %c0_28 = arith.constant 0 : index
      %c0_29 = arith.constant 0 : index
      %c0_30 = arith.constant 0 : index
      %33 = vector.load %arg11[%c0_28, %c0_29, %c0_30] : memref<1x1x16xf32, #tpu.memory_space<vmem>>, vector<1x1x16xf32>
      %34 = vector.shape_cast %33 : vector<1x1x16xf32> to vector<1x16xf32>
      %c0_31 = arith.constant 0 : index
      %c0_32 = arith.constant 0 : index
      %c0_33 = arith.constant 0 : index
      %35 = vector.load %arg12[%c0_31, %c0_32, %c0_33] : memref<1x16x16xf32, #tpu.memory_space<vmem>>, vector<1x16x16xf32>
      %36 = vector.shape_cast %35 : vector<1x16x16xf32> to vector<16x16xf32>
      %c0_34 = arith.constant 0 : index
      %c0_35 = arith.constant 0 : index
      %c0_36 = arith.constant 0 : index
      %37 = vector.load %arg13[%c0_34, %c0_35, %c0_36] : memref<1x1x16xf32, #tpu.memory_space<vmem>>, vector<1x1x16xf32>
      %38 = vector.shape_cast %37 : vector<1x1x16xf32> to vector<1x16xf32>
      %c0_37 = arith.constant 0 : index
      %c0_38 = arith.constant 0 : index
      %c0_39 = arith.constant 0 : index
      %39 = vector.load %arg14[%c0_37, %c0_38, %c0_39] : memref<1x1x16xf32, #tpu.memory_space<vmem>>, vector<1x1x16xf32>
      %40 = vector.shape_cast %39 : vector<1x1x16xf32> to vector<1x16xf32>
      %c0_40 = arith.constant 0 : index
      %c0_41 = arith.constant 0 : index
      %c0_42 = arith.constant 0 : index
      %41 = vector.load %arg15[%c0_40, %c0_41, %c0_42] : memref<1x1x16xf32, #tpu.memory_space<vmem>>, vector<1x1x16xf32>
      %42 = vector.shape_cast %41 : vector<1x1x16xf32> to vector<1x16xf32>
      %c0_43 = arith.constant 0 : index
      %c0_44 = arith.constant 0 : index
      %c0_45 = arith.constant 0 : index
      %43 = vector.load %arg16[%c0_43, %c0_44, %c0_45] : memref<1x16x64xf32, #tpu.memory_space<vmem>>, vector<1x16x64xf32>
      %44 = vector.shape_cast %43 : vector<1x16x64xf32> to vector<16x64xf32>
      %c0_46 = arith.constant 0 : index
      %c0_47 = arith.constant 0 : index
      %c0_48 = arith.constant 0 : index
      %45 = vector.load %arg17[%c0_46, %c0_47, %c0_48] : memref<1x1x64xf32, #tpu.memory_space<vmem>>, vector<1x1x64xf32>
      %46 = vector.shape_cast %45 : vector<1x1x64xf32> to vector<1x64xf32>
      %c0_49 = arith.constant 0 : index
      %c0_50 = arith.constant 0 : index
      %c0_51 = arith.constant 0 : index
      %47 = vector.load %arg18[%c0_49, %c0_50, %c0_51] : memref<1x64x16xf32, #tpu.memory_space<vmem>>, vector<1x64x16xf32>
      %48 = vector.shape_cast %47 : vector<1x64x16xf32> to vector<64x16xf32>
      %c0_52 = arith.constant 0 : index
      %c0_53 = arith.constant 0 : index
      %c0_54 = arith.constant 0 : index
      %49 = vector.load %arg19[%c0_52, %c0_53, %c0_54] : memref<1x1x16xf32, #tpu.memory_space<vmem>>, vector<1x1x16xf32>
      %50 = vector.shape_cast %49 : vector<1x1x16xf32> to vector<1x16xf32>
      %c0_55 = arith.constant 0 : index
      %c0_56 = arith.constant 0 : index
      %51 = vector.load %arg49[%c0_55, %c0_56] : memref<16x16xf32, #tpu.memory_space<vmem>>, vector<16x16xf32>
      %cst = arith.constant dense<0.000000e+00> : vector<16xf32>
      %52 = vector.multi_reduction <add>, %51, %cst [1] : vector<16x16xf32> to vector<16xf32>
      %53 = vector.shape_cast %52 : vector<16xf32> to vector<16x1xf32>
      %cst_57 = arith.constant 1.600000e+01 : f32
      %54 = vector.broadcast %cst_57 : f32 to vector<16x1xf32>
      %55 = arith.divf %53, %54 : vector<16x1xf32>
      %56 = vector.broadcast %55 : vector<16x1xf32> to vector<16x16xf32>
      %57 = arith.subf %51, %56 : vector<16x16xf32>
      %58 = arith.mulf %57, %57 : vector<16x16xf32>
      %cst_58 = arith.constant dense<0.000000e+00> : vector<16xf32>
      %59 = vector.multi_reduction <add>, %58, %cst_58 [1] : vector<16x16xf32> to vector<16xf32>
      %60 = vector.shape_cast %59 : vector<16xf32> to vector<16x1xf32>
      %cst_59 = arith.constant 1.600000e+01 : f32
      %61 = vector.broadcast %cst_59 : f32 to vector<16x1xf32>
      %62 = arith.divf %60, %61 : vector<16x1xf32>
      %63 = vector.broadcast %55 : vector<16x1xf32> to vector<16x16xf32>
      %64 = arith.subf %51, %63 : vector<16x16xf32>
      %cst_60 = arith.constant 9.99999974E-6 : f32
      %65 = vector.broadcast %cst_60 : f32 to vector<16x1xf32>
      %66 = arith.addf %62, %65 : vector<16x1xf32>
      %67 = math.rsqrt %66 : vector<16x1xf32>
      %68 = vector.broadcast %67 : vector<16x1xf32> to vector<16x16xf32>
      %69 = arith.mulf %64, %68 : vector<16x16xf32>
      %70 = vector.broadcast %20 : vector<1x16xf32> to vector<16x16xf32>
      %71 = arith.mulf %69, %70 : vector<16x16xf32>
      %72 = vector.broadcast %22 : vector<1x16xf32> to vector<16x16xf32>
      %73 = arith.addf %71, %72 : vector<16x16xf32>
      %cst_61 = arith.constant dense<0.000000e+00> : vector<16x16xf32>
      %74 = tpu.matmul %73, %24, %cst_61 {dimension_numbers = #tpu.dot_dimension_numbers<[1], [0], [0], [1], [0, 0, 1, 1], [], []>} : vector<16x16xf32>, vector<16x16xf32>, vector<16x16xf32> -> vector<16x16xf32>
      %75 = vector.broadcast %26 : vector<1x16xf32> to vector<16x16xf32>
      %76 = arith.addf %74, %75 : vector<16x16xf32>
      %cst_62 = arith.constant dense<0.000000e+00> : vector<16x16xf32>
      %77 = tpu.matmul %73, %28, %cst_62 {dimension_numbers = #tpu.dot_dimension_numbers<[1], [0], [0], [1], [0, 0, 1, 1], [], []>} : vector<16x16xf32>, vector<16x16xf32>, vector<16x16xf32> -> vector<16x16xf32>
      %78 = vector.broadcast %30 : vector<1x16xf32> to vector<16x16xf32>
      %79 = arith.addf %77, %78 : vector<16x16xf32>
      %cst_63 = arith.constant dense<0.000000e+00> : vector<16x16xf32>
      %80 = tpu.matmul %73, %32, %cst_63 {dimension_numbers = #tpu.dot_dimension_numbers<[1], [0], [0], [1], [0, 0, 1, 1], [], []>} : vector<16x16xf32>, vector<16x16xf32>, vector<16x16xf32> -> vector<16x16xf32>
      %81 = vector.broadcast %34 : vector<1x16xf32> to vector<16x16xf32>
      %82 = arith.addf %80, %81 : vector<16x16xf32>
      %83 = vector.extract_strided_slice %76 {offsets = [0, 0], sizes = [8, 16], strides = [1, 1]} : vector<16x16xf32> to vector<8x16xf32>
      %84 = vector.shape_cast %83 : vector<8x16xf32> to vector<8x2x8xf32>
      %85 = vector.extract_strided_slice %79 {offsets = [0, 0], sizes = [8, 16], strides = [1, 1]} : vector<16x16xf32> to vector<8x16xf32>
      %86 = vector.shape_cast %85 : vector<8x16xf32> to vector<8x2x8xf32>
      %87 = vector.extract_strided_slice %82 {offsets = [0, 0], sizes = [8, 16], strides = [1, 1]} : vector<16x16xf32> to vector<8x16xf32>
      %88 = vector.shape_cast %87 : vector<8x16xf32> to vector<8x2x8xf32>
      %89 = tpu.transpose %84, [1, 0, 2] : vector<8x2x8xf32> -> vector<2x8x8xf32>
      %90 = tpu.transpose %86, [1, 0, 2] : vector<8x2x8xf32> -> vector<2x8x8xf32>
      %91 = tpu.transpose %88, [1, 0, 2] : vector<8x2x8xf32> -> vector<2x8x8xf32>
      "tpu.trace_start"() <{level = 10 : i32, message = "hqd,hkd->hqk"}> : () -> ()
      %cst_64 = arith.constant dense<0.000000e+00> : vector<2x8x8xf32>
      %92 = tpu.matmul %89, %90, %cst_64 {dimension_numbers = #tpu.dot_dimension_numbers<[2], [2], [1], [1], [0, 0, 0, 1, 1, 1], [0], [0]>} : vector<2x8x8xf32>, vector<2x8x8xf32>, vector<2x8x8xf32> -> vector<2x8x8xf32>
      "tpu.trace_stop"() : () -> ()
      %cst_65 = arith.constant dense<0xFF800000> : vector<2x8xf32>
      %93 = vector.multi_reduction <maximumf>, %92, %cst_65 [2] : vector<2x8x8xf32> to vector<2x8xf32>
      %94 = vector.shape_cast %93 : vector<2x8xf32> to vector<2x8x1xf32>
      %95 = vector.broadcast %94 : vector<2x8x1xf32> to vector<2x8x8xf32>
      %96 = arith.subf %92, %95 : vector<2x8x8xf32>
      %97 = math.exp %96 : vector<2x8x8xf32>
      %cst_66 = arith.constant dense<0.000000e+00> : vector<2x8xf32>
      %98 = vector.multi_reduction <add>, %97, %cst_66 [2] : vector<2x8x8xf32> to vector<2x8xf32>
      %99 = vector.shape_cast %98 : vector<2x8xf32> to vector<2x8x1xf32>
      %100 = vector.broadcast %99 : vector<2x8x1xf32> to vector<2x8x8xf32>
      %101 = arith.divf %97, %100 : vector<2x8x8xf32>
      "tpu.trace_start"() <{level = 10 : i32, message = "hqk,hkd->hqd"}> : () -> ()
      %cst_67 = arith.constant dense<0.000000e+00> : vector<2x8x8xf32>
      %102 = tpu.matmul %101, %91, %cst_67 {dimension_numbers = #tpu.dot_dimension_numbers<[2], [1], [1], [2], [0, 0, 0, 1, 1, 2], [0], [0]>} : vector<2x8x8xf32>, vector<2x8x8xf32>, vector<2x8x8xf32> -> vector<2x8x8xf32>
      "tpu.trace_stop"() : () -> ()
      %103 = tpu.transpose %102, [1, 0, 2] : vector<2x8x8xf32> -> vector<8x2x8xf32>
      %104 = vector.shape_cast %103 : vector<8x2x8xf32> to vector<8x16xf32>
      %105 = vector.extract_strided_slice %76 {offsets = [8, 0], sizes = [8, 16], strides = [1, 1]} : vector<16x16xf32> to vector<8x16xf32>
      %106 = vector.shape_cast %105 : vector<8x16xf32> to vector<8x2x8xf32>
      %107 = vector.extract_strided_slice %79 {offsets = [8, 0], sizes = [8, 16], strides = [1, 1]} : vector<16x16xf32> to vector<8x16xf32>
      %108 = vector.shape_cast %107 : vector<8x16xf32> to vector<8x2x8xf32>
      %109 = vector.extract_strided_slice %82 {offsets = [8, 0], sizes = [8, 16], strides = [1, 1]} : vector<16x16xf32> to vector<8x16xf32>
      %110 = vector.shape_cast %109 : vector<8x16xf32> to vector<8x2x8xf32>
      %111 = tpu.transpose %106, [1, 0, 2] : vector<8x2x8xf32> -> vector<2x8x8xf32>
      %112 = tpu.transpose %108, [1, 0, 2] : vector<8x2x8xf32> -> vector<2x8x8xf32>
      %113 = tpu.transpose %110, [1, 0, 2] : vector<8x2x8xf32> -> vector<2x8x8xf32>
      "tpu.trace_start"() <{level = 10 : i32, message = "hqd,hkd->hqk"}> : () -> ()
      %cst_68 = arith.constant dense<0.000000e+00> : vector<2x8x8xf32>
      %114 = tpu.matmul %111, %112, %cst_68 {dimension_numbers = #tpu.dot_dimension_numbers<[2], [2], [1], [1], [0, 0, 0, 1, 1, 1], [0], [0]>} : vector<2x8x8xf32>, vector<2x8x8xf32>, vector<2x8x8xf32> -> vector<2x8x8xf32>
      "tpu.trace_stop"() : () -> ()
      %cst_69 = arith.constant dense<0xFF800000> : vector<2x8xf32>
      %115 = vector.multi_reduction <maximumf>, %114, %cst_69 [2] : vector<2x8x8xf32> to vector<2x8xf32>
      %116 = vector.shape_cast %115 : vector<2x8xf32> to vector<2x8x1xf32>
      %117 = vector.broadcast %116 : vector<2x8x1xf32> to vector<2x8x8xf32>
      %118 = arith.subf %114, %117 : vector<2x8x8xf32>
      %119 = math.exp %118 : vector<2x8x8xf32>
      %cst_70 = arith.constant dense<0.000000e+00> : vector<2x8xf32>
      %120 = vector.multi_reduction <add>, %119, %cst_70 [2] : vector<2x8x8xf32> to vector<2x8xf32>
      %121 = vector.shape_cast %120 : vector<2x8xf32> to vector<2x8x1xf32>
      %122 = vector.broadcast %121 : vector<2x8x1xf32> to vector<2x8x8xf32>
      %123 = arith.divf %119, %122 : vector<2x8x8xf32>
      "tpu.trace_start"() <{level = 10 : i32, message = "hqk,hkd->hqd"}> : () -> ()
      %cst_71 = arith.constant dense<0.000000e+00> : vector<2x8x8xf32>
      %124 = tpu.matmul %123, %113, %cst_71 {dimension_numbers = #tpu.dot_dimension_numbers<[2], [1], [1], [2], [0, 0, 0, 1, 1, 2], [0], [0]>} : vector<2x8x8xf32>, vector<2x8x8xf32>, vector<2x8x8xf32> -> vector<2x8x8xf32>
      "tpu.trace_stop"() : () -> ()
      %125 = tpu.transpose %124, [1, 0, 2] : vector<2x8x8xf32> -> vector<8x2x8xf32>
      %126 = vector.shape_cast %125 : vector<8x2x8xf32> to vector<8x16xf32>
      %127 = tpu.concatenate %104, %126 in 0 : vector<8x16xf32>, vector<8x16xf32> -> vector<16x16xf32>
      %cst_72 = arith.constant dense<0.000000e+00> : vector<16x16xf32>
      %128 = tpu.matmul %127, %36, %cst_72 {dimension_numbers = #tpu.dot_dimension_numbers<[1], [0], [0], [1], [0, 0, 1, 1], [], []>} : vector<16x16xf32>, vector<16x16xf32>, vector<16x16xf32> -> vector<16x16xf32>
      %129 = arith.addf %51, %128 : vector<16x16xf32>
      %130 = vector.broadcast %38 : vector<1x16xf32> to vector<16x16xf32>
      %131 = arith.addf %129, %130 : vector<16x16xf32>
      %cst_73 = arith.constant dense<0.000000e+00> : vector<16xf32>
      %132 = vector.multi_reduction <add>, %131, %cst_73 [1] : vector<16x16xf32> to vector<16xf32>
      %133 = vector.shape_cast %132 : vector<16xf32> to vector<16x1xf32>
      %cst_74 = arith.constant 1.600000e+01 : f32
      %134 = vector.broadcast %cst_74 : f32 to vector<16x1xf32>
      %135 = arith.divf %133, %134 : vector<16x1xf32>
      %136 = vector.broadcast %135 : vector<16x1xf32> to vector<16x16xf32>
      %137 = arith.subf %131, %136 : vector<16x16xf32>
      %138 = arith.mulf %137, %137 : vector<16x16xf32>
      %cst_75 = arith.constant dense<0.000000e+00> : vector<16xf32>
      %139 = vector.multi_reduction <add>, %138, %cst_75 [1] : vector<16x16xf32> to vector<16xf32>
      %140 = vector.shape_cast %139 : vector<16xf32> to vector<16x1xf32>
      %cst_76 = arith.constant 1.600000e+01 : f32
      %141 = vector.broadcast %cst_76 : f32 to vector<16x1xf32>
      %142 = arith.divf %140, %141 : vector<16x1xf32>
      %143 = vector.broadcast %135 : vector<16x1xf32> to vector<16x16xf32>
      %144 = arith.subf %131, %143 : vector<16x16xf32>
      %cst_77 = arith.constant 9.99999974E-6 : f32
      %145 = vector.broadcast %cst_77 : f32 to vector<16x1xf32>
      %146 = arith.addf %142, %145 : vector<16x1xf32>
      %147 = math.rsqrt %146 : vector<16x1xf32>
      %148 = vector.broadcast %147 : vector<16x1xf32> to vector<16x16xf32>
      %149 = arith.mulf %144, %148 : vector<16x16xf32>
      %150 = vector.broadcast %40 : vector<1x16xf32> to vector<16x16xf32>
      %151 = arith.mulf %149, %150 : vector<16x16xf32>
      %152 = vector.broadcast %42 : vector<1x16xf32> to vector<16x16xf32>
      %153 = arith.addf %151, %152 : vector<16x16xf32>
      %cst_78 = arith.constant dense<0.000000e+00> : vector<16x64xf32>
      %154 = tpu.matmul %153, %44, %cst_78 {dimension_numbers = #tpu.dot_dimension_numbers<[1], [0], [0], [1], [0, 0, 1, 1], [], []>} : vector<16x16xf32>, vector<16x64xf32>, vector<16x64xf32> -> vector<16x64xf32>
      %155 = vector.broadcast %46 : vector<1x64xf32> to vector<16x64xf32>
      %156 = arith.addf %154, %155 : vector<16x64xf32>
      %cst_79 = arith.constant 0.000000e+00 : f32
      %157 = vector.broadcast %cst_79 : f32 to vector<16x64xf32>
      %158 = arith.maximumf %156, %157 : vector<16x64xf32>
      %cst_80 = arith.constant dense<0.000000e+00> : vector<16x16xf32>
      %159 = tpu.matmul %158, %48, %cst_80 {dimension_numbers = #tpu.dot_dimension_numbers<[1], [0], [0], [1], [0, 0, 1, 1], [], []>} : vector<16x64xf32>, vector<64x16xf32>, vector<16x16xf32> -> vector<16x16xf32>
      %160 = arith.addf %131, %159 : vector<16x16xf32>
      %161 = vector.broadcast %50 : vector<1x16xf32> to vector<16x16xf32>
      %162 = arith.addf %160, %161 : vector<16x16xf32>
      %c0_81 = arith.constant 0 : index
      %c0_82 = arith.constant 0 : index
      %163 = vector.load %arg49[%c0_81, %c0_82] : memref<16x16xf32, #tpu.memory_space<vmem>>, vector<16x16xf32>
      tpu.vector_store %arg49[%c0_81, %c0_82], %162 {strides = array<i32>} : memref<16x16xf32, #tpu.memory_space<vmem>>, vector<16x16xf32>,
    } else {
    }
    %c1_i32 = arith.constant 1 : i32
    %11 = arith.cmpi eq, %arg0, %c1_i32 : i32
    %12 = arith.extui %11 : i1 to i32
    %c0_i32_4 = arith.constant 0 : i32
    %13 = arith.cmpi ne, %12, %c0_i32_4 : i32
    scf.if %13 {
      %c0 = arith.constant 0 : index
      %c0_8 = arith.constant 0 : index
      %c0_9 = arith.constant 0 : index
      %19 = vector.load %arg20[%c0, %c0_8, %c0_9] : memref<1x1x32xf32, #tpu.memory_space<vmem>>, vector<1x1x32xf32>
      %20 = vector.shape_cast %19 : vector<1x1x32xf32> to vector<1x32xf32>
      %c0_10 = arith.constant 0 : index
      %c0_11 = arith.constant 0 : index
      %c0_12 = arith.constant 0 : index
      %21 = vector.load %arg21[%c0_10, %c0_11, %c0_12] : memref<1x1x32xf32, #tpu.memory_space<vmem>>, vector<1x1x32xf32>
      %22 = vector.shape_cast %21 : vector<1x1x32xf32> to vector<1x32xf32>
      %c0_13 = arith.constant 0 : index
      %c0_14 = arith.constant 0 : index
      %c0_15 = arith.constant 0 : index
      %23 = vector.load %arg22[%c0_13, %c0_14, %c0_15] : memref<1x32x16xf32, #tpu.memory_space<vmem>>, vector<1x32x16xf32>
      %24 = vector.shape_cast %23 : vector<1x32x16xf32> to vector<32x16xf32>
      %c0_16 = arith.constant 0 : index
      %c0_17 = arith.constant 0 : index
      %c0_18 = arith.constant 0 : index
      %25 = vector.load %arg23[%c0_16, %c0_17, %c0_18] : memref<1x1x16xf32, #tpu.memory_space<vmem>>, vector<1x1x16xf32>
      %26 = vector.shape_cast %25 : vector<1x1x16xf32> to vector<1x16xf32>
      %c0_19 = arith.constant 0 : index
      %c0_20 = arith.constant 0 : index
      %c0_21 = arith.constant 0 : index
      %27 = vector.load %arg24[%c0_19, %c0_20, %c0_21] : memref<1x32x16xf32, #tpu.memory_space<vmem>>, vector<1x32x16xf32>
      %28 = vector.shape_cast %27 : vector<1x32x16xf32> to vector<32x16xf32>
      %c0_22 = arith.constant 0 : index
      %c0_23 = arith.constant 0 : index
      %c0_24 = arith.constant 0 : index
      %29 = vector.load %arg25[%c0_22, %c0_23, %c0_24] : memref<1x1x16xf32, #tpu.memory_space<vmem>>, vector<1x1x16xf32>
      %30 = vector.shape_cast %29 : vector<1x1x16xf32> to vector<1x16xf32>
      %c0_25 = arith.constant 0 : index
      %c0_26 = arith.constant 0 : index
      %c0_27 = arith.constant 0 : index
      %31 = vector.load %arg26[%c0_25, %c0_26, %c0_27] : memref<1x32x16xf32, #tpu.memory_space<vmem>>, vector<1x32x16xf32>
      %32 = vector.shape_cast %31 : vector<1x32x16xf32> to vector<32x16xf32>
      %c0_28 = arith.constant 0 : index
      %c0_29 = arith.constant 0 : index
      %c0_30 = arith.constant 0 : index
      %33 = vector.load %arg27[%c0_28, %c0_29, %c0_30] : memref<1x1x16xf32, #tpu.memory_space<vmem>>, vector<1x1x16xf32>
      %34 = vector.shape_cast %33 : vector<1x1x16xf32> to vector<1x16xf32>
      %c0_31 = arith.constant 0 : index
      %c0_32 = arith.constant 0 : index
      %c0_33 = arith.constant 0 : index
      %35 = vector.load %arg28[%c0_31, %c0_32, %c0_33] : memref<1x16x32xf32, #tpu.memory_space<vmem>>, vector<1x16x32xf32>
      %36 = vector.shape_cast %35 : vector<1x16x32xf32> to vector<16x32xf32>
      %c0_34 = arith.constant 0 : index
      %c0_35 = arith.constant 0 : index
      %c0_36 = arith.constant 0 : index
      %37 = vector.load %arg29[%c0_34, %c0_35, %c0_36] : memref<1x1x32xf32, #tpu.memory_space<vmem>>, vector<1x1x32xf32>
      %38 = vector.shape_cast %37 : vector<1x1x32xf32> to vector<1x32xf32>
      %c0_37 = arith.constant 0 : index
      %c0_38 = arith.constant 0 : index
      %c0_39 = arith.constant 0 : index
      %39 = vector.load %arg30[%c0_37, %c0_38, %c0_39] : memref<1x1x32xf32, #tpu.memory_space<vmem>>, vector<1x1x32xf32>
      %40 = vector.shape_cast %39 : vector<1x1x32xf32> to vector<1x32xf32>
      %c0_40 = arith.constant 0 : index
      %c0_41 = arith.constant 0 : index
      %c0_42 = arith.constant 0 : index
      %41 = vector.load %arg31[%c0_40, %c0_41, %c0_42] : memref<1x1x32xf32, #tpu.memory_space<vmem>>, vector<1x1x32xf32>
      %42 = vector.shape_cast %41 : vector<1x1x32xf32> to vector<1x32xf32>
      %c0_43 = arith.constant 0 : index
      %c0_44 = arith.constant 0 : index
      %c0_45 = arith.constant 0 : index
      %43 = vector.load %arg32[%c0_43, %c0_44, %c0_45] : memref<1x32x16xf32, #tpu.memory_space<vmem>>, vector<1x32x16xf32>
      %44 = vector.shape_cast %43 : vector<1x32x16xf32> to vector<32x16xf32>
      %c0_46 = arith.constant 0 : index
      %c0_47 = arith.constant 0 : index
      %c0_48 = arith.constant 0 : index
      %45 = vector.load %arg33[%c0_46, %c0_47, %c0_48] : memref<1x1x16xf32, #tpu.memory_space<vmem>>, vector<1x1x16xf32>
      %46 = vector.shape_cast %45 : vector<1x1x16xf32> to vector<1x16xf32>
      %c0_49 = arith.constant 0 : index
      %c0_50 = arith.constant 0 : index
      %c0_51 = arith.constant 0 : index
      %47 = vector.load %arg34[%c0_49, %c0_50, %c0_51] : memref<1x16x16xf32, #tpu.memory_space<vmem>>, vector<1x16x16xf32>
      %48 = vector.shape_cast %47 : vector<1x16x16xf32> to vector<16x16xf32>
      %c0_52 = arith.constant 0 : index
      %c0_53 = arith.constant 0 : index
      %c0_54 = arith.constant 0 : index
      %49 = vector.load %arg35[%c0_52, %c0_53, %c0_54] : memref<1x1x16xf32, #tpu.memory_space<vmem>>, vector<1x1x16xf32>
      %50 = vector.shape_cast %49 : vector<1x1x16xf32> to vector<1x16xf32>
      %c0_55 = arith.constant 0 : index
      %c0_56 = arith.constant 0 : index
      %c0_57 = arith.constant 0 : index
      %51 = vector.load %arg36[%c0_55, %c0_56, %c0_57] : memref<1x16x16xf32, #tpu.memory_space<vmem>>, vector<1x16x16xf32>
      %52 = vector.shape_cast %51 : vector<1x16x16xf32> to vector<16x16xf32>
      %c0_58 = arith.constant 0 : index
      %c0_59 = arith.constant 0 : index
      %c0_60 = arith.constant 0 : index
      %53 = vector.load %arg37[%c0_58, %c0_59, %c0_60] : memref<1x1x16xf32, #tpu.memory_space<vmem>>, vector<1x1x16xf32>
      %54 = vector.shape_cast %53 : vector<1x1x16xf32> to vector<1x16xf32>
      %c0_61 = arith.constant 0 : index
      %c0_62 = arith.constant 0 : index
      %c0_63 = arith.constant 0 : index
      %55 = vector.load %arg38[%c0_61, %c0_62, %c0_63] : memref<1x16x32xf32, #tpu.memory_space<vmem>>, vector<1x16x32xf32>
      %56 = vector.shape_cast %55 : vector<1x16x32xf32> to vector<16x32xf32>
      %c0_64 = arith.constant 0 : index
      %c0_65 = arith.constant 0 : index
      %c0_66 = arith.constant 0 : index
      %57 = vector.load %arg39[%c0_64, %c0_65, %c0_66] : memref<1x1x32xf32, #tpu.memory_space<vmem>>, vector<1x1x32xf32>
      %58 = vector.shape_cast %57 : vector<1x1x32xf32> to vector<1x32xf32>
      %c0_67 = arith.constant 0 : index
      %c0_68 = arith.constant 0 : index
      %c0_69 = arith.constant 0 : index
      %59 = vector.load %arg40[%c0_67, %c0_68, %c0_69] : memref<1x1x32xf32, #tpu.memory_space<vmem>>, vector<1x1x32xf32>
      %60 = vector.shape_cast %59 : vector<1x1x32xf32> to vector<1x32xf32>
      %c0_70 = arith.constant 0 : index
      %c0_71 = arith.constant 0 : index
      %c0_72 = arith.constant 0 : index
      %61 = vector.load %arg41[%c0_70, %c0_71, %c0_72] : memref<1x1x32xf32, #tpu.memory_space<vmem>>, vector<1x1x32xf32>
      %62 = vector.shape_cast %61 : vector<1x1x32xf32> to vector<1x32xf32>
      %c0_73 = arith.constant 0 : index
      %c0_74 = arith.constant 0 : index
      %c0_75 = arith.constant 0 : index
      %63 = vector.load %arg42[%c0_73, %c0_74, %c0_75] : memref<1x32x128xf32, #tpu.memory_space<vmem>>, vector<1x32x128xf32>
      %64 = vector.shape_cast %63 : vector<1x32x128xf32> to vector<32x128xf32>
      %c0_76 = arith.constant 0 : index
      %c0_77 = arith.constant 0 : index
      %c0_78 = arith.constant 0 : index
      %65 = vector.load %arg43[%c0_76, %c0_77, %c0_78] : memref<1x1x128xf32, #tpu.memory_space<vmem>>, vector<1x1x128xf32>
      %66 = vector.shape_cast %65 : vector<1x1x128xf32> to vector<1x128xf32>
      %c0_79 = arith.constant 0 : index
      %c0_80 = arith.constant 0 : index
      %c0_81 = arith.constant 0 : index
      %67 = vector.load %arg44[%c0_79, %c0_80, %c0_81] : memref<1x128x32xf32, #tpu.memory_space<vmem>>, vector<1x128x32xf32>
      %68 = vector.shape_cast %67 : vector<1x128x32xf32> to vector<128x32xf32>
      %c0_82 = arith.constant 0 : index
      %c0_83 = arith.constant 0 : index
      %c0_84 = arith.constant 0 : index
      %69 = vector.load %arg45[%c0_82, %c0_83, %c0_84] : memref<1x1x32xf32, #tpu.memory_space<vmem>>, vector<1x1x32xf32>
      %70 = vector.shape_cast %69 : vector<1x1x32xf32> to vector<1x32xf32>
      %c0_85 = arith.constant 0 : index
      %c0_86 = arith.constant 0 : index
      %71 = vector.load %arg50[%c0_85, %c0_86] : memref<16x32xf32, #tpu.memory_space<vmem>>, vector<16x32xf32>
      %c0_87 = arith.constant 0 : index
      %c0_88 = arith.constant 0 : index
      %72 = vector.load %arg49[%c0_87, %c0_88] : memref<16x16xf32, #tpu.memory_space<vmem>>, vector<16x16xf32>
      %cst = arith.constant dense<0.000000e+00> : vector<16xf32>
      %73 = vector.multi_reduction <add>, %71, %cst [1] : vector<16x32xf32> to vector<16xf32>
      %74 = vector.shape_cast %73 : vector<16xf32> to vector<16x1xf32>
      %cst_89 = arith.constant 3.200000e+01 : f32
      %75 = vector.broadcast %cst_89 : f32 to vector<16x1xf32>
      %76 = arith.divf %74, %75 : vector<16x1xf32>
      %77 = vector.broadcast %76 : vector<16x1xf32> to vector<16x32xf32>
      %78 = arith.subf %71, %77 : vector<16x32xf32>
      %79 = arith.mulf %78, %78 : vector<16x32xf32>
      %cst_90 = arith.constant dense<0.000000e+00> : vector<16xf32>
      %80 = vector.multi_reduction <add>, %79, %cst_90 [1] : vector<16x32xf32> to vector<16xf32>
      %81 = vector.shape_cast %80 : vector<16xf32> to vector<16x1xf32>
      %cst_91 = arith.constant 3.200000e+01 : f32
      %82 = vector.broadcast %cst_91 : f32 to vector<16x1xf32>
      %83 = arith.divf %81, %82 : vector<16x1xf32>
      %84 = vector.broadcast %76 : vector<16x1xf32> to vector<16x32xf32>
      %85 = arith.subf %71, %84 : vector<16x32xf32>
      %cst_92 = arith.constant 9.99999974E-6 : f32
      %86 = vector.broadcast %cst_92 : f32 to vector<16x1xf32>
      %87 = arith.addf %83, %86 : vector<16x1xf32>
      %88 = math.rsqrt %87 : vector<16x1xf32>
      %89 = vector.broadcast %88 : vector<16x1xf32> to vector<16x32xf32>
      %90 = arith.mulf %85, %89 : vector<16x32xf32>
      %91 = vector.broadcast %20 : vector<1x32xf32> to vector<16x32xf32>
      %92 = arith.mulf %90, %91 : vector<16x32xf32>
      %93 = vector.broadcast %22 : vector<1x32xf32> to vector<16x32xf32>
      %94 = arith.addf %92, %93 : vector<16x32xf32>
      %cst_93 = arith.constant dense<0.000000e+00> : vector<16x16xf32>
      %95 = tpu.matmul %94, %24, %cst_93 {dimension_numbers = #tpu.dot_dimension_numbers<[1], [0], [0], [1], [0, 0, 1, 1], [], []>} : vector<16x32xf32>, vector<32x16xf32>, vector<16x16xf32> -> vector<16x16xf32>
      %96 = vector.broadcast %26 : vector<1x16xf32> to vector<16x16xf32>
      %97 = arith.addf %95, %96 : vector<16x16xf32>
      %cst_94 = arith.constant dense<0.000000e+00> : vector<16x16xf32>
      %98 = tpu.matmul %94, %28, %cst_94 {dimension_numbers = #tpu.dot_dimension_numbers<[1], [0], [0], [1], [0, 0, 1, 1], [], []>} : vector<16x32xf32>, vector<32x16xf32>, vector<16x16xf32> -> vector<16x16xf32>
      %99 = vector.broadcast %30 : vector<1x16xf32> to vector<16x16xf32>
      %100 = arith.addf %98, %99 : vector<16x16xf32>
      %cst_95 = arith.constant dense<0.000000e+00> : vector<16x16xf32>
      %101 = tpu.matmul %94, %32, %cst_95 {dimension_numbers = #tpu.dot_dimension_numbers<[1], [0], [0], [1], [0, 0, 1, 1], [], []>} : vector<16x32xf32>, vector<32x16xf32>, vector<16x16xf32> -> vector<16x16xf32>
      %102 = vector.broadcast %34 : vector<1x16xf32> to vector<16x16xf32>
      %103 = arith.addf %101, %102 : vector<16x16xf32>
      %104 = vector.extract_strided_slice %97 {offsets = [0, 0], sizes = [8, 16], strides = [1, 1]} : vector<16x16xf32> to vector<8x16xf32>
      %105 = vector.shape_cast %104 : vector<8x16xf32> to vector<8x2x8xf32>
      %106 = vector.extract_strided_slice %100 {offsets = [0, 0], sizes = [8, 16], strides = [1, 1]} : vector<16x16xf32> to vector<8x16xf32>
      %107 = vector.shape_cast %106 : vector<8x16xf32> to vector<8x2x8xf32>
      %108 = vector.extract_strided_slice %103 {offsets = [0, 0], sizes = [8, 16], strides = [1, 1]} : vector<16x16xf32> to vector<8x16xf32>
      %109 = vector.shape_cast %108 : vector<8x16xf32> to vector<8x2x8xf32>
      %110 = tpu.transpose %105, [1, 0, 2] : vector<8x2x8xf32> -> vector<2x8x8xf32>
      %111 = tpu.transpose %107, [1, 0, 2] : vector<8x2x8xf32> -> vector<2x8x8xf32>
      %112 = tpu.transpose %109, [1, 0, 2] : vector<8x2x8xf32> -> vector<2x8x8xf32>
      "tpu.trace_start"() <{level = 10 : i32, message = "hqd,hkd->hqk"}> : () -> ()
      %cst_96 = arith.constant dense<0.000000e+00> : vector<2x8x8xf32>
      %113 = tpu.matmul %110, %111, %cst_96 {dimension_numbers = #tpu.dot_dimension_numbers<[2], [2], [1], [1], [0, 0, 0, 1, 1, 1], [0], [0]>} : vector<2x8x8xf32>, vector<2x8x8xf32>, vector<2x8x8xf32> -> vector<2x8x8xf32>
      "tpu.trace_stop"() : () -> ()
      %114 = vector.shape_cast %2 : vector<8x8xi1> to vector<1x8x8xi1>
      %cst_97 = arith.constant 0xFF800000 : f32
      %115 = vector.shape_cast %114 : vector<1x8x8xi1> to vector<1x8x8xi1>
      %116 = vector.broadcast %115 : vector<1x8x8xi1> to vector<2x8x8xi1>
      %117 = vector.broadcast %cst_97 : f32 to vector<2x8x8xf32>
      %118 = arith.select %116, %117, %113 : vector<2x8x8xi1>, vector<2x8x8xf32>
      %cst_98 = arith.constant dense<0xFF800000> : vector<2x8xf32>
      %119 = vector.multi_reduction <maximumf>, %118, %cst_98 [2] : vector<2x8x8xf32> to vector<2x8xf32>
      %120 = vector.shape_cast %119 : vector<2x8xf32> to vector<2x8x1xf32>
      %121 = vector.broadcast %120 : vector<2x8x1xf32> to vector<2x8x8xf32>
      %122 = arith.subf %118, %121 : vector<2x8x8xf32>
      %123 = math.exp %122 : vector<2x8x8xf32>
      %cst_99 = arith.constant dense<0.000000e+00> : vector<2x8xf32>
      %124 = vector.multi_reduction <add>, %123, %cst_99 [2] : vector<2x8x8xf32> to vector<2x8xf32>
      %125 = vector.shape_cast %124 : vector<2x8xf32> to vector<2x8x1xf32>
      %126 = vector.broadcast %125 : vector<2x8x1xf32> to vector<2x8x8xf32>
      %127 = arith.divf %123, %126 : vector<2x8x8xf32>
      "tpu.trace_start"() <{level = 10 : i32, message = "hqk,hkd->hqd"}> : () -> ()
      %cst_100 = arith.constant dense<0.000000e+00> : vector<2x8x8xf32>
      %128 = tpu.matmul %127, %112, %cst_100 {dimension_numbers = #tpu.dot_dimension_numbers<[2], [1], [1], [2], [0, 0, 0, 1, 1, 2], [0], [0]>} : vector<2x8x8xf32>, vector<2x8x8xf32>, vector<2x8x8xf32> -> vector<2x8x8xf32>
      "tpu.trace_stop"() : () -> ()
      %129 = tpu.transpose %128, [1, 0, 2] : vector<2x8x8xf32> -> vector<8x2x8xf32>
      %130 = vector.shape_cast %129 : vector<8x2x8xf32> to vector<8x16xf32>
      %131 = vector.extract_strided_slice %97 {offsets = [8, 0], sizes = [8, 16], strides = [1, 1]} : vector<16x16xf32> to vector<8x16xf32>
      %132 = vector.shape_cast %131 : vector<8x16xf32> to vector<8x2x8xf32>
      %133 = vector.extract_strided_slice %100 {offsets = [8, 0], sizes = [8, 16], strides = [1, 1]} : vector<16x16xf32> to vector<8x16xf32>
      %134 = vector.shape_cast %133 : vector<8x16xf32> to vector<8x2x8xf32>
      %135 = vector.extract_strided_slice %103 {offsets = [8, 0], sizes = [8, 16], strides = [1, 1]} : vector<16x16xf32> to vector<8x16xf32>
      %136 = vector.shape_cast %135 : vector<8x16xf32> to vector<8x2x8xf32>
      %137 = tpu.transpose %132, [1, 0, 2] : vector<8x2x8xf32> -> vector<2x8x8xf32>
      %138 = tpu.transpose %134, [1, 0, 2] : vector<8x2x8xf32> -> vector<2x8x8xf32>
      %139 = tpu.transpose %136, [1, 0, 2] : vector<8x2x8xf32> -> vector<2x8x8xf32>
      "tpu.trace_start"() <{level = 10 : i32, message = "hqd,hkd->hqk"}> : () -> ()
      %cst_101 = arith.constant dense<0.000000e+00> : vector<2x8x8xf32>
      %140 = tpu.matmul %137, %138, %cst_101 {dimension_numbers = #tpu.dot_dimension_numbers<[2], [2], [1], [1], [0, 0, 0, 1, 1, 1], [0], [0]>} : vector<2x8x8xf32>, vector<2x8x8xf32>, vector<2x8x8xf32> -> vector<2x8x8xf32>
      "tpu.trace_stop"() : () -> ()
      %141 = vector.shape_cast %2 : vector<8x8xi1> to vector<1x8x8xi1>
      %cst_102 = arith.constant 0xFF800000 : f32
      %142 = vector.shape_cast %141 : vector<1x8x8xi1> to vector<1x8x8xi1>
      %143 = vector.broadcast %142 : vector<1x8x8xi1> to vector<2x8x8xi1>
      %144 = vector.broadcast %cst_102 : f32 to vector<2x8x8xf32>
      %145 = arith.select %143, %144, %140 : vector<2x8x8xi1>, vector<2x8x8xf32>
      %cst_103 = arith.constant dense<0xFF800000> : vector<2x8xf32>
      %146 = vector.multi_reduction <maximumf>, %145, %cst_103 [2] : vector<2x8x8xf32> to vector<2x8xf32>
      %147 = vector.shape_cast %146 : vector<2x8xf32> to vector<2x8x1xf32>
      %148 = vector.broadcast %147 : vector<2x8x1xf32> to vector<2x8x8xf32>
      %149 = arith.subf %145, %148 : vector<2x8x8xf32>
      %150 = math.exp %149 : vector<2x8x8xf32>
      %cst_104 = arith.constant dense<0.000000e+00> : vector<2x8xf32>
      %151 = vector.multi_reduction <add>, %150, %cst_104 [2] : vector<2x8x8xf32> to vector<2x8xf32>
      %152 = vector.shape_cast %151 : vector<2x8xf32> to vector<2x8x1xf32>
      %153 = vector.broadcast %152 : vector<2x8x1xf32> to vector<2x8x8xf32>
      %154 = arith.divf %150, %153 : vector<2x8x8xf32>
      "tpu.trace_start"() <{level = 10 : i32, message = "hqk,hkd->hqd"}> : () -> ()
      %cst_105 = arith.constant dense<0.000000e+00> : vector<2x8x8xf32>
      %155 = tpu.matmul %154, %139, %cst_105 {dimension_numbers = #tpu.dot_dimension_numbers<[2], [1], [1], [2], [0, 0, 0, 1, 1, 2], [0], [0]>} : vector<2x8x8xf32>, vector<2x8x8xf32>, vector<2x8x8xf32> -> vector<2x8x8xf32>
      "tpu.trace_stop"() : () -> ()
      %156 = tpu.transpose %155, [1, 0, 2] : vector<2x8x8xf32> -> vector<8x2x8xf32>
      %157 = vector.shape_cast %156 : vector<8x2x8xf32> to vector<8x16xf32>
      %158 = tpu.concatenate %130, %157 in 0 : vector<8x16xf32>, vector<8x16xf32> -> vector<16x16xf32>
      %cst_106 = arith.constant dense<0.000000e+00> : vector<16x32xf32>
      %159 = tpu.matmul %158, %36, %cst_106 {dimension_numbers = #tpu.dot_dimension_numbers<[1], [0], [0], [1], [0, 0, 1, 1], [], []>} : vector<16x16xf32>, vector<16x32xf32>, vector<16x32xf32> -> vector<16x32xf32>
      %160 = arith.addf %71, %159 : vector<16x32xf32>
      %161 = vector.broadcast %38 : vector<1x32xf32> to vector<16x32xf32>
      %162 = arith.addf %160, %161 : vector<16x32xf32>
      %cst_107 = arith.constant dense<0.000000e+00> : vector<16xf32>
      %163 = vector.multi_reduction <add>, %162, %cst_107 [1] : vector<16x32xf32> to vector<16xf32>
      %164 = vector.shape_cast %163 : vector<16xf32> to vector<16x1xf32>
      %cst_108 = arith.constant 3.200000e+01 : f32
      %165 = vector.broadcast %cst_108 : f32 to vector<16x1xf32>
      %166 = arith.divf %164, %165 : vector<16x1xf32>
      %167 = vector.broadcast %166 : vector<16x1xf32> to vector<16x32xf32>
      %168 = arith.subf %162, %167 : vector<16x32xf32>
      %169 = arith.mulf %168, %168 : vector<16x32xf32>
      %cst_109 = arith.constant dense<0.000000e+00> : vector<16xf32>
      %170 = vector.multi_reduction <add>, %169, %cst_109 [1] : vector<16x32xf32> to vector<16xf32>
      %171 = vector.shape_cast %170 : vector<16xf32> to vector<16x1xf32>
      %cst_110 = arith.constant 3.200000e+01 : f32
      %172 = vector.broadcast %cst_110 : f32 to vector<16x1xf32>
      %173 = arith.divf %171, %172 : vector<16x1xf32>
      %174 = vector.broadcast %166 : vector<16x1xf32> to vector<16x32xf32>
      %175 = arith.subf %162, %174 : vector<16x32xf32>
      %cst_111 = arith.constant 9.99999974E-6 : f32
      %176 = vector.broadcast %cst_111 : f32 to vector<16x1xf32>
      %177 = arith.addf %173, %176 : vector<16x1xf32>
      %178 = math.rsqrt %177 : vector<16x1xf32>
      %179 = vector.broadcast %178 : vector<16x1xf32> to vector<16x32xf32>
      %180 = arith.mulf %175, %179 : vector<16x32xf32>
      %181 = vector.broadcast %40 : vector<1x32xf32> to vector<16x32xf32>
      %182 = arith.mulf %180, %181 : vector<16x32xf32>
      %183 = vector.broadcast %42 : vector<1x32xf32> to vector<16x32xf32>
      %184 = arith.addf %182, %183 : vector<16x32xf32>
      %cst_112 = arith.constant dense<0.000000e+00> : vector<16x16xf32>
      %185 = tpu.matmul %184, %44, %cst_112 {dimension_numbers = #tpu.dot_dimension_numbers<[1], [0], [0], [1], [0, 0, 1, 1], [], []>} : vector<16x32xf32>, vector<32x16xf32>, vector<16x16xf32> -> vector<16x16xf32>
      %186 = vector.broadcast %46 : vector<1x16xf32> to vector<16x16xf32>
      %187 = arith.addf %185, %186 : vector<16x16xf32>
      %cst_113 = arith.constant dense<0.000000e+00> : vector<16x16xf32>
      %188 = tpu.matmul %72, %48, %cst_113 {dimension_numbers = #tpu.dot_dimension_numbers<[1], [0], [0], [1], [0, 0, 1, 1], [], []>} : vector<16x16xf32>, vector<16x16xf32>, vector<16x16xf32> -> vector<16x16xf32>
      %189 = vector.broadcast %50 : vector<1x16xf32> to vector<16x16xf32>
      %190 = arith.addf %188, %189 : vector<16x16xf32>
      %cst_114 = arith.constant dense<0.000000e+00> : vector<16x16xf32>
      %191 = tpu.matmul %72, %52, %cst_114 {dimension_numbers = #tpu.dot_dimension_numbers<[1], [0], [0], [1], [0, 0, 1, 1], [], []>} : vector<16x16xf32>, vector<16x16xf32>, vector<16x16xf32> -> vector<16x16xf32>
      %192 = vector.broadcast %54 : vector<1x16xf32> to vector<16x16xf32>
      %193 = arith.addf %191, %192 : vector<16x16xf32>
      %194 = vector.extract_strided_slice %187 {offsets = [0, 0], sizes = [8, 16], strides = [1, 1]} : vector<16x16xf32> to vector<8x16xf32>
      %195 = vector.shape_cast %194 : vector<8x16xf32> to vector<8x2x8xf32>
      %196 = vector.extract_strided_slice %190 {offsets = [0, 0], sizes = [8, 16], strides = [1, 1]} : vector<16x16xf32> to vector<8x16xf32>
      %197 = vector.shape_cast %196 : vector<8x16xf32> to vector<8x2x8xf32>
      %198 = vector.extract_strided_slice %193 {offsets = [0, 0], sizes = [8, 16], strides = [1, 1]} : vector<16x16xf32> to vector<8x16xf32>
      %199 = vector.shape_cast %198 : vector<8x16xf32> to vector<8x2x8xf32>
      %200 = tpu.transpose %195, [1, 0, 2] : vector<8x2x8xf32> -> vector<2x8x8xf32>
      %201 = tpu.transpose %197, [1, 0, 2] : vector<8x2x8xf32> -> vector<2x8x8xf32>
      %202 = tpu.transpose %199, [1, 0, 2] : vector<8x2x8xf32> -> vector<2x8x8xf32>
      "tpu.trace_start"() <{level = 10 : i32, message = "hqd,hkd->hqk"}> : () -> ()
      %cst_115 = arith.constant dense<0.000000e+00> : vector<2x8x8xf32>
      %203 = tpu.matmul %200, %201, %cst_115 {dimension_numbers = #tpu.dot_dimension_numbers<[2], [2], [1], [1], [0, 0, 0, 1, 1, 1], [0], [0]>} : vector<2x8x8xf32>, vector<2x8x8xf32>, vector<2x8x8xf32> -> vector<2x8x8xf32>
      "tpu.trace_stop"() : () -> ()
      %cst_116 = arith.constant dense<0xFF800000> : vector<2x8xf32>
      %204 = vector.multi_reduction <maximumf>, %203, %cst_116 [2] : vector<2x8x8xf32> to vector<2x8xf32>
      %205 = vector.shape_cast %204 : vector<2x8xf32> to vector<2x8x1xf32>
      %206 = vector.broadcast %205 : vector<2x8x1xf32> to vector<2x8x8xf32>
      %207 = arith.subf %203, %206 : vector<2x8x8xf32>
      %208 = math.exp %207 : vector<2x8x8xf32>
      %cst_117 = arith.constant dense<0.000000e+00> : vector<2x8xf32>
      %209 = vector.multi_reduction <add>, %208, %cst_117 [2] : vector<2x8x8xf32> to vector<2x8xf32>
      %210 = vector.shape_cast %209 : vector<2x8xf32> to vector<2x8x1xf32>
      %211 = vector.broadcast %210 : vector<2x8x1xf32> to vector<2x8x8xf32>
      %212 = arith.divf %208, %211 : vector<2x8x8xf32>
      "tpu.trace_start"() <{level = 10 : i32, message = "hqk,hkd->hqd"}> : () -> ()
      %cst_118 = arith.constant dense<0.000000e+00> : vector<2x8x8xf32>
      %213 = tpu.matmul %212, %202, %cst_118 {dimension_numbers = #tpu.dot_dimension_numbers<[2], [1], [1], [2], [0, 0, 0, 1, 1, 2], [0], [0]>} : vector<2x8x8xf32>, vector<2x8x8xf32>, vector<2x8x8xf32> -> vector<2x8x8xf32>
      "tpu.trace_stop"() : () -> ()
      %214 = tpu.transpose %213, [1, 0, 2] : vector<2x8x8xf32> -> vector<8x2x8xf32>
      %215 = vector.shape_cast %214 : vector<8x2x8xf32> to vector<8x16xf32>
      %216 = vector.extract_strided_slice %187 {offsets = [8, 0], sizes = [8, 16], strides = [1, 1]} : vector<16x16xf32> to vector<8x16xf32>
      %217 = vector.shape_cast %216 : vector<8x16xf32> to vector<8x2x8xf32>
      %218 = vector.extract_strided_slice %190 {offsets = [8, 0], sizes = [8, 16], strides = [1, 1]} : vector<16x16xf32> to vector<8x16xf32>
      %219 = vector.shape_cast %218 : vector<8x16xf32> to vector<8x2x8xf32>
      %220 = vector.extract_strided_slice %193 {offsets = [8, 0], sizes = [8, 16], strides = [1, 1]} : vector<16x16xf32> to vector<8x16xf32>
      %221 = vector.shape_cast %220 : vector<8x16xf32> to vector<8x2x8xf32>
      %222 = tpu.transpose %217, [1, 0, 2] : vector<8x2x8xf32> -> vector<2x8x8xf32>
      %223 = tpu.transpose %219, [1, 0, 2] : vector<8x2x8xf32> -> vector<2x8x8xf32>
      %224 = tpu.transpose %221, [1, 0, 2] : vector<8x2x8xf32> -> vector<2x8x8xf32>
      "tpu.trace_start"() <{level = 10 : i32, message = "hqd,hkd->hqk"}> : () -> ()
      %cst_119 = arith.constant dense<0.000000e+00> : vector<2x8x8xf32>
      %225 = tpu.matmul %222, %223, %cst_119 {dimension_numbers = #tpu.dot_dimension_numbers<[2], [2], [1], [1], [0, 0, 0, 1, 1, 1], [0], [0]>} : vector<2x8x8xf32>, vector<2x8x8xf32>, vector<2x8x8xf32> -> vector<2x8x8xf32>
      "tpu.trace_stop"() : () -> ()
      %cst_120 = arith.constant dense<0xFF800000> : vector<2x8xf32>
      %226 = vector.multi_reduction <maximumf>, %225, %cst_120 [2] : vector<2x8x8xf32> to vector<2x8xf32>
      %227 = vector.shape_cast %226 : vector<2x8xf32> to vector<2x8x1xf32>
      %228 = vector.broadcast %227 : vector<2x8x1xf32> to vector<2x8x8xf32>
      %229 = arith.subf %225, %228 : vector<2x8x8xf32>
      %230 = math.exp %229 : vector<2x8x8xf32>
      %cst_121 = arith.constant dense<0.000000e+00> : vector<2x8xf32>
      %231 = vector.multi_reduction <add>, %230, %cst_121 [2] : vector<2x8x8xf32> to vector<2x8xf32>
      %232 = vector.shape_cast %231 : vector<2x8xf32> to vector<2x8x1xf32>
      %233 = vector.broadcast %232 : vector<2x8x1xf32> to vector<2x8x8xf32>
      %234 = arith.divf %230, %233 : vector<2x8x8xf32>
      "tpu.trace_start"() <{level = 10 : i32, message = "hqk,hkd->hqd"}> : () -> ()
      %cst_122 = arith.constant dense<0.000000e+00> : vector<2x8x8xf32>
      %235 = tpu.matmul %234, %224, %cst_122 {dimension_numbers = #tpu.dot_dimension_numbers<[2], [1], [1], [2], [0, 0, 0, 1, 1, 2], [0], [0]>} : vector<2x8x8xf32>, vector<2x8x8xf32>, vector<2x8x8xf32> -> vector<2x8x8xf32>
      "tpu.trace_stop"() : () -> ()
      %236 = tpu.transpose %235, [1, 0, 2] : vector<2x8x8xf32> -> vector<8x2x8xf32>
      %237 = vector.shape_cast %236 : vector<8x2x8xf32> to vector<8x16xf32>
      %238 = tpu.concatenate %215, %237 in 0 : vector<8x16xf32>, vector<8x16xf32> -> vector<16x16xf32>
      %cst_123 = arith.constant dense<0.000000e+00> : vector<16x32xf32>
      %239 = tpu.matmul %238, %56, %cst_123 {dimension_numbers = #tpu.dot_dimension_numbers<[1], [0], [0], [1], [0, 0, 1, 1], [], []>} : vector<16x16xf32>, vector<16x32xf32>, vector<16x32xf32> -> vector<16x32xf32>
      %240 = arith.addf %162, %239 : vector<16x32xf32>
      %241 = vector.broadcast %58 : vector<1x32xf32> to vector<16x32xf32>
      %242 = arith.addf %240, %241 : vector<16x32xf32>
      %cst_124 = arith.constant dense<0.000000e+00> : vector<16xf32>
      %243 = vector.multi_reduction <add>, %242, %cst_124 [1] : vector<16x32xf32> to vector<16xf32>
      %244 = vector.shape_cast %243 : vector<16xf32> to vector<16x1xf32>
      %cst_125 = arith.constant 3.200000e+01 : f32
      %245 = vector.broadcast %cst_125 : f32 to vector<16x1xf32>
      %246 = arith.divf %244, %245 : vector<16x1xf32>
      %247 = vector.broadcast %246 : vector<16x1xf32> to vector<16x32xf32>
      %248 = arith.subf %242, %247 : vector<16x32xf32>
      %249 = arith.mulf %248, %248 : vector<16x32xf32>
      %cst_126 = arith.constant dense<0.000000e+00> : vector<16xf32>
      %250 = vector.multi_reduction <add>, %249, %cst_126 [1] : vector<16x32xf32> to vector<16xf32>
      %251 = vector.shape_cast %250 : vector<16xf32> to vector<16x1xf32>
      %cst_127 = arith.constant 3.200000e+01 : f32
      %252 = vector.broadcast %cst_127 : f32 to vector<16x1xf32>
      %253 = arith.divf %251, %252 : vector<16x1xf32>
      %254 = vector.broadcast %246 : vector<16x1xf32> to vector<16x32xf32>
      %255 = arith.subf %242, %254 : vector<16x32xf32>
      %cst_128 = arith.constant 9.99999974E-6 : f32
      %256 = vector.broadcast %cst_128 : f32 to vector<16x1xf32>
      %257 = arith.addf %253, %256 : vector<16x1xf32>
      %258 = math.rsqrt %257 : vector<16x1xf32>
      %259 = vector.broadcast %258 : vector<16x1xf32> to vector<16x32xf32>
      %260 = arith.mulf %255, %259 : vector<16x32xf32>
      %261 = vector.broadcast %60 : vector<1x32xf32> to vector<16x32xf32>
      %262 = arith.mulf %260, %261 : vector<16x32xf32>
      %263 = vector.broadcast %62 : vector<1x32xf32> to vector<16x32xf32>
      %264 = arith.addf %262, %263 : vector<16x32xf32>
      %cst_129 = arith.constant dense<0.000000e+00> : vector<16x128xf32>
      %265 = tpu.matmul %264, %64, %cst_129 {dimension_numbers = #tpu.dot_dimension_numbers<[1], [0], [0], [1], [0, 0, 1, 1], [], []>} : vector<16x32xf32>, vector<32x128xf32>, vector<16x128xf32> -> vector<16x128xf32>
      %266 = vector.broadcast %66 : vector<1x128xf32> to vector<16x128xf32>
      %267 = arith.addf %265, %266 : vector<16x128xf32>
      %cst_130 = arith.constant 0.000000e+00 : f32
      %268 = vector.broadcast %cst_130 : f32 to vector<16x128xf32>
      %269 = arith.maximumf %267, %268 : vector<16x128xf32>
      %cst_131 = arith.constant dense<0.000000e+00> : vector<16x32xf32>
      %270 = tpu.matmul %269, %68, %cst_131 {dimension_numbers = #tpu.dot_dimension_numbers<[1], [0], [0], [1], [0, 0, 1, 1], [], []>} : vector<16x128xf32>, vector<128x32xf32>, vector<16x32xf32> -> vector<16x32xf32>
      %271 = arith.addf %242, %270 : vector<16x32xf32>
      %272 = vector.broadcast %70 : vector<1x32xf32> to vector<16x32xf32>
      %273 = arith.addf %271, %272 : vector<16x32xf32>
      %c0_132 = arith.constant 0 : index
      %c0_133 = arith.constant 0 : index
      %274 = vector.load %arg50[%c0_132, %c0_133] : memref<16x32xf32, #tpu.memory_space<vmem>>, vector<16x32xf32>
      tpu.vector_store %arg50[%c0_132, %c0_133], %273 {strides = array<i32>} : memref<16x32xf32, #tpu.memory_space<vmem>>, vector<16x32xf32>,
    } else {
    }
    %c1_i32_5 = arith.constant 1 : i32
    %14 = arith.cmpi eq, %arg0, %c1_i32_5 : i32
    %c1_i32_6 = arith.constant 1 : i32
    %15 = arith.cmpi eq, %arg1, %c1_i32_6 : i32
    %16 = arith.andi %14, %15 : i1
    %17 = arith.extui %16 : i1 to i32
    %c0_i32_7 = arith.constant 0 : i32
    %18 = arith.cmpi ne, %17, %c0_i32_7 : i32
    scf.if %18 {
      %c0 = arith.constant 0 : index
      %c0_8 = arith.constant 0 : index
      %19 = vector.load %arg50[%c0, %c0_8] : memref<16x32xf32, #tpu.memory_space<vmem>>, vector<16x32xf32>
      %c0_9 = arith.constant 0 : index
      %c0_10 = arith.constant 0 : index
      %20 = vector.load %arg46[%c0_9, %c0_10] : memref<32x128xf32, #tpu.memory_space<vmem>>, vector<32x128xf32>
      %cst = arith.constant dense<0.000000e+00> : vector<16x128xf32>
      %21 = tpu.matmul %19, %20, %cst {dimension_numbers = #tpu.dot_dimension_numbers<[1], [0], [0], [1], [0, 0, 1, 1], [], []>} : vector<16x32xf32>, vector<32x128xf32>, vector<16x128xf32> -> vector<16x128xf32>
      %c0_11 = arith.constant 0 : index
      %c0_12 = arith.constant 0 : index
      %22 = vector.load %arg47[%c0_11, %c0_12] : memref<1x128xf32, #tpu.memory_space<vmem>>, vector<1x128xf32>
      %23 = vector.broadcast %22 : vector<1x128xf32> to vector<16x128xf32>
      %24 = arith.addf %21, %23 : vector<16x128xf32>
      %c0_13 = arith.constant 0 : index
      %c0_14 = arith.constant 0 : index
      %25 = vector.load %arg48[%c0_13, %c0_14] : memref<16x128xf32, #tpu.memory_space<vmem>>, vector<16x128xf32>
      tpu.vector_store %arg48[%c0_13, %c0_14], %24 {strides = array<i32>} : memref<16x128xf32, #tpu.memory_space<vmem>>, vector<16x128xf32>,
    } else {
    }
    return
  }
  func.func @transform_0(%arg0: i32, %arg1: i32) -> (i32, i32) {
    %c0_i32 = arith.constant 0 : i32
    %c0_i32_0 = arith.constant 0 : i32
    %c0_i32_1 = arith.constant 0 : i32
    return %c0_i32, %c0_i32_0 : i32, i32
  }
  func.func @transform_1(%arg0: i32, %arg1: i32) -> (i32, i32) {
    %c0_i32 = arith.constant 0 : i32
    %c0_i32_0 = arith.constant 0 : i32
    %c0_i32_1 = arith.constant 0 : i32
    return %c0_i32, %c0_i32_0 : i32, i32
  }
  func.func @transform_2(%arg0: i32, %arg1: i32) -> (i32, i32, i32) {
    %c1_i32 = arith.constant 1 : i32
    %0 = arith.subi %c1_i32, %arg0 : i32
    %1 = arith.muli %0, %arg1 : i32
    %c0_i32 = arith.constant 0 : i32
    %c0_i32_0 = arith.constant 0 : i32
    %c0_i32_1 = arith.constant 0 : i32
    return %1, %c0_i32, %c0_i32_0 : i32, i32, i32
  }
  func.func @transform_3(%arg0: i32, %arg1: i32) -> (i32, i32, i32) {
    %c1_i32 = arith.constant 1 : i32
    %0 = arith.subi %c1_i32, %arg0 : i32
    %1 = arith.muli %0, %arg1 : i32
    %c0_i32 = arith.constant 0 : i32
    %c0_i32_0 = arith.constant 0 : i32
    %c0_i32_1 = arith.constant 0 : i32
    return %1, %c0_i32, %c0_i32_0 : i32, i32, i32
  }
  func.func @transform_4(%arg0: i32, %arg1: i32) -> (i32, i32, i32) {
    %c1_i32 = arith.constant 1 : i32
    %0 = arith.subi %c1_i32, %arg0 : i32
    %1 = arith.muli %0, %arg1 : i32
    %c0_i32 = arith.constant 0 : i32
    %c0_i32_0 = arith.constant 0 : i32
    %c0_i32_1 = arith.constant 0 : i32
    return %1, %c0_i32, %c0_i32_0 : i32, i32, i32
  }
  func.func @transform_5(%arg0: i32, %arg1: i32) -> (i32, i32, i32) {
    %c1_i32 = arith.constant 1 : i32
    %0 = arith.subi %c1_i32, %arg0 : i32
    %1 = arith.muli %0, %arg1 : i32
    %c0_i32 = arith.constant 0 : i32
    %c0_i32_0 = arith.constant 0 : i32
    %c0_i32_1 = arith.constant 0 : i32
    return %1, %c0_i32, %c0_i32_0 : i32, i32, i32
  }
  func.func @transform_6(%arg0: i32, %arg1: i32) -> (i32, i32, i32) {
    %c1_i32 = arith.constant 1 : i32
    %0 = arith.subi %c1_i32, %arg0 : i32
    %1 = arith.muli %0, %arg1 : i32
    %c0_i32 = arith.constant 0 : i32
    %c0_i32_0 = arith.constant 0 : i32
    %c0_i32_1 = arith.constant 0 : i32
    return %1, %c0_i32, %c0_i32_0 : i32, i32, i32
  }
  func.func @transform_7(%arg0: i32, %arg1: i32) -> (i32, i32, i32) {
    %c1_i32 = arith.constant 1 : i32
    %0 = arith.subi %c1_i32, %arg0 : i32
    %1 = arith.muli %0, %arg1 : i32
    %c0_i32 = arith.constant 0 : i32
    %c0_i32_0 = arith.constant 0 : i32
    %c0_i32_1 = arith.constant 0 : i32
    return %1, %c0_i32, %c0_i32_0 : i32, i32, i32
  }
  func.func @transform_8(%arg0: i32, %arg1: i32) -> (i32, i32, i32) {
    %c1_i32 = arith.constant 1 : i32
    %0 = arith.subi %c1_i32, %arg0 : i32
    %1 = arith.muli %0, %arg1 : i32
    %c0_i32 = arith.constant 0 : i32
    %c0_i32_0 = arith.constant 0 : i32
    %c0_i32_1 = arith.constant 0 : i32
    return %1, %c0_i32, %c0_i32_0 : i32, i32, i32
  }
  func.func @transform_9(%arg0: i32, %arg1: i32) -> (i32, i32, i32) {
    %c1_i32 = arith.constant 1 : i32
    %0 = arith.subi %c1_i32, %arg0 : i32
    %1 = arith.muli %0, %arg1 : i32
    %c0_i32 = arith.constant 0 : i32
    %c0_i32_0 = arith.constant 0 : i32
    %c0_i32_1 = arith.constant 0 : i32
    return %1, %c0_i32, %c0_i32_0 : i32, i32, i32
  }
  func.func @transform_10(%arg0: i32, %arg1: i32) -> (i32, i32, i32) {
    %c1_i32 = arith.constant 1 : i32
    %0 = arith.subi %c1_i32, %arg0 : i32
    %1 = arith.muli %0, %arg1 : i32
    %c0_i32 = arith.constant 0 : i32
    %c0_i32_0 = arith.constant 0 : i32
    %c0_i32_1 = arith.constant 0 : i32
    return %1, %c0_i32, %c0_i32_0 : i32, i32, i32
  }
  func.func @transform_11(%arg0: i32, %arg1: i32) -> (i32, i32, i32) {
    %c1_i32 = arith.constant 1 : i32
    %0 = arith.subi %c1_i32, %arg0 : i32
    %1 = arith.muli %0, %arg1 : i32
    %c0_i32 = arith.constant 0 : i32
    %c0_i32_0 = arith.constant 0 : i32
    %c0_i32_1 = arith.constant 0 : i32
    return %1, %c0_i32, %c0_i32_0 : i32, i32, i32
  }
  func.func @transform_12(%arg0: i32, %arg1: i32) -> (i32, i32, i32) {
    %c1_i32 = arith.constant 1 : i32
    %0 = arith.subi %c1_i32, %arg0 : i32
    %1 = arith.muli %0, %arg1 : i32
    %c0_i32 = arith.constant 0 : i32
    %c0_i32_0 = arith.constant 0 : i32
    %c0_i32_1 = arith.constant 0 : i32
    return %1, %c0_i32, %c0_i32_0 : i32, i32, i32
  }
  func.func @transform_13(%arg0: i32, %arg1: i32) -> (i32, i32, i32) {
    %c1_i32 = arith.constant 1 : i32
    %0 = arith.subi %c1_i32, %arg0 : i32
    %1 = arith.muli %0, %arg1 : i32
    %c0_i32 = arith.constant 0 : i32
    %c0_i32_0 = arith.constant 0 : i32
    %c0_i32_1 = arith.constant 0 : i32
    return %1, %c0_i32, %c0_i32_0 : i32, i32, i32
  }
  func.func @transform_14(%arg0: i32, %arg1: i32) -> (i32, i32, i32) {
    %c1_i32 = arith.constant 1 : i32
    %0 = arith.subi %c1_i32, %arg0 : i32
    %1 = arith.muli %0, %arg1 : i32
    %c0_i32 = arith.constant 0 : i32
    %c0_i32_0 = arith.constant 0 : i32
    %c0_i32_1 = arith.constant 0 : i32
    return %1, %c0_i32, %c0_i32_0 : i32, i32, i32
  }
  func.func @transform_15(%arg0: i32, %arg1: i32) -> (i32, i32, i32) {
    %c1_i32 = arith.constant 1 : i32
    %0 = arith.subi %c1_i32, %arg0 : i32
    %1 = arith.muli %0, %arg1 : i32
    %c0_i32 = arith.constant 0 : i32
    %c0_i32_0 = arith.constant 0 : i32
    %c0_i32_1 = arith.constant 0 : i32
    return %1, %c0_i32, %c0_i32_0 : i32, i32, i32
  }
  func.func @transform_16(%arg0: i32, %arg1: i32) -> (i32, i32, i32) {
    %c1_i32 = arith.constant 1 : i32
    %0 = arith.subi %c1_i32, %arg0 : i32
    %1 = arith.muli %0, %arg1 : i32
    %c0_i32 = arith.constant 0 : i32
    %c0_i32_0 = arith.constant 0 : i32
    %c0_i32_1 = arith.constant 0 : i32
    return %1, %c0_i32, %c0_i32_0 : i32, i32, i32
  }
  func.func @transform_17(%arg0: i32, %arg1: i32) -> (i32, i32, i32) {
    %c1_i32 = arith.constant 1 : i32
    %0 = arith.subi %c1_i32, %arg0 : i32
    %1 = arith.muli %0, %arg1 : i32
    %c0_i32 = arith.constant 0 : i32
    %c0_i32_0 = arith.constant 0 : i32
    %c0_i32_1 = arith.constant 0 : i32
    return %1, %c0_i32, %c0_i32_0 : i32, i32, i32
  }
  func.func @transform_18(%arg0: i32, %arg1: i32) -> (i32, i32, i32) {
    %0 = arith.muli %arg0, %arg1 : i32
    %c0_i32 = arith.constant 0 : i32
    %c0_i32_0 = arith.constant 0 : i32
    %c0_i32_1 = arith.constant 0 : i32
    return %0, %c0_i32, %c0_i32_0 : i32, i32, i32
  }
  func.func @transform_19(%arg0: i32, %arg1: i32) -> (i32, i32, i32) {
    %0 = arith.muli %arg0, %arg1 : i32
    %c0_i32 = arith.constant 0 : i32
    %c0_i32_0 = arith.constant 0 : i32
    %c0_i32_1 = arith.constant 0 : i32
    return %0, %c0_i32, %c0_i32_0 : i32, i32, i32
  }
  func.func @transform_20(%arg0: i32, %arg1: i32) -> (i32, i32, i32) {
    %0 = arith.muli %arg0, %arg1 : i32
    %c0_i32 = arith.constant 0 : i32
    %c0_i32_0 = arith.constant 0 : i32
    %c0_i32_1 = arith.constant 0 : i32
    return %0, %c0_i32, %c0_i32_0 : i32, i32, i32
  }
  func.func @transform_21(%arg0: i32, %arg1: i32) -> (i32, i32, i32) {
    %0 = arith.muli %arg0, %arg1 : i32
    %c0_i32 = arith.constant 0 : i32
    %c0_i32_0 = arith.constant 0 : i32
    %c0_i32_1 = arith.constant 0 : i32
    return %0, %c0_i32, %c0_i32_0 : i32, i32, i32
  }
  func.func @transform_22(%arg0: i32, %arg1: i32) -> (i32, i32, i32) {
    %0 = arith.muli %arg0, %arg1 : i32
    %c0_i32 = arith.constant 0 : i32
    %c0_i32_0 = arith.constant 0 : i32
    %c0_i32_1 = arith.constant 0 : i32
    return %0, %c0_i32, %c0_i32_0 : i32, i32, i32
  }
  func.func @transform_23(%arg0: i32, %arg1: i32) -> (i32, i32, i32) {
    %0 = arith.muli %arg0, %arg1 : i32
    %c0_i32 = arith.constant 0 : i32
    %c0_i32_0 = arith.constant 0 : i32
    %c0_i32_1 = arith.constant 0 : i32
    return %0, %c0_i32, %c0_i32_0 : i32, i32, i32
  }
  func.func @transform_24(%arg0: i32, %arg1: i32) -> (i32, i32, i32) {
    %0 = arith.muli %arg0, %arg1 : i32
    %c0_i32 = arith.constant 0 : i32
    %c0_i32_0 = arith.constant 0 : i32
    %c0_i32_1 = arith.constant 0 : i32
    return %0, %c0_i32, %c0_i32_0 : i32, i32, i32
  }
  func.func @transform_25(%arg0: i32, %arg1: i32) -> (i32, i32, i32) {
    %0 = arith.muli %arg0, %arg1 : i32
    %c0_i32 = arith.constant 0 : i32
    %c0_i32_0 = arith.constant 0 : i32
    %c0_i32_1 = arith.constant 0 : i32
    return %0, %c0_i32, %c0_i32_0 : i32, i32, i32
  }
  func.func @transform_26(%arg0: i32, %arg1: i32) -> (i32, i32, i32) {
    %0 = arith.muli %arg0, %arg1 : i32
    %c0_i32 = arith.constant 0 : i32
    %c0_i32_0 = arith.constant 0 : i32
    %c0_i32_1 = arith.constant 0 : i32
    return %0, %c0_i32, %c0_i32_0 : i32, i32, i32
  }
  func.func @transform_27(%arg0: i32, %arg1: i32) -> (i32, i32, i32) {
    %0 = arith.muli %arg0, %arg1 : i32
    %c0_i32 = arith.constant 0 : i32
    %c0_i32_0 = arith.constant 0 : i32
    %c0_i32_1 = arith.constant 0 : i32
    return %0, %c0_i32, %c0_i32_0 : i32, i32, i32
  }
  func.func @transform_28(%arg0: i32, %arg1: i32) -> (i32, i32, i32) {
    %0 = arith.muli %arg0, %arg1 : i32
    %c0_i32 = arith.constant 0 : i32
    %c0_i32_0 = arith.constant 0 : i32
    %c0_i32_1 = arith.constant 0 : i32
    return %0, %c0_i32, %c0_i32_0 : i32, i32, i32
  }
  func.func @transform_29(%arg0: i32, %arg1: i32) -> (i32, i32, i32) {
    %0 = arith.muli %arg0, %arg1 : i32
    %c0_i32 = arith.constant 0 : i32
    %c0_i32_0 = arith.constant 0 : i32
    %c0_i32_1 = arith.constant 0 : i32
    return %0, %c0_i32, %c0_i32_0 : i32, i32, i32
  }
  func.func @transform_30(%arg0: i32, %arg1: i32) -> (i32, i32, i32) {
    %0 = arith.muli %arg0, %arg1 : i32
    %c0_i32 = arith.constant 0 : i32
    %c0_i32_0 = arith.constant 0 : i32
    %c0_i32_1 = arith.constant 0 : i32
    return %0, %c0_i32, %c0_i32_0 : i32, i32, i32
  }
  func.func @transform_31(%arg0: i32, %arg1: i32) -> (i32, i32, i32) {
    %0 = arith.muli %arg0, %arg1 : i32
    %c0_i32 = arith.constant 0 : i32
    %c0_i32_0 = arith.constant 0 : i32
    %c0_i32_1 = arith.constant 0 : i32
    return %0, %c0_i32, %c0_i32_0 : i32, i32, i32
  }
  func.func @transform_32(%arg0: i32, %arg1: i32) -> (i32, i32, i32) {
    %0 = arith.muli %arg0, %arg1 : i32
    %c0_i32 = arith.constant 0 : i32
    %c0_i32_0 = arith.constant 0 : i32
    %c0_i32_1 = arith.constant 0 : i32
    return %0, %c0_i32, %c0_i32_0 : i32, i32, i32
  }
  func.func @transform_33(%arg0: i32, %arg1: i32) -> (i32, i32, i32) {
    %0 = arith.muli %arg0, %arg1 : i32
    %c0_i32 = arith.constant 0 : i32
    %c0_i32_0 = arith.constant 0 : i32
    %c0_i32_1 = arith.constant 0 : i32
    return %0, %c0_i32, %c0_i32_0 : i32, i32, i32
  }
  func.func @transform_34(%arg0: i32, %arg1: i32) -> (i32, i32, i32) {
    %0 = arith.muli %arg0, %arg1 : i32
    %c0_i32 = arith.constant 0 : i32
    %c0_i32_0 = arith.constant 0 : i32
    %c0_i32_1 = arith.constant 0 : i32
    return %0, %c0_i32, %c0_i32_0 : i32, i32, i32
  }
  func.func @transform_35(%arg0: i32, %arg1: i32) -> (i32, i32, i32) {
    %0 = arith.muli %arg0, %arg1 : i32
    %c0_i32 = arith.constant 0 : i32
    %c0_i32_0 = arith.constant 0 : i32
    %c0_i32_1 = arith.constant 0 : i32
    return %0, %c0_i32, %c0_i32_0 : i32, i32, i32
  }
  func.func @transform_36(%arg0: i32, %arg1: i32) -> (i32, i32, i32) {
    %0 = arith.muli %arg0, %arg1 : i32
    %c0_i32 = arith.constant 0 : i32
    %c0_i32_0 = arith.constant 0 : i32
    %c0_i32_1 = arith.constant 0 : i32
    return %0, %c0_i32, %c0_i32_0 : i32, i32, i32
  }
  func.func @transform_37(%arg0: i32, %arg1: i32) -> (i32, i32, i32) {
    %0 = arith.muli %arg0, %arg1 : i32
    %c0_i32 = arith.constant 0 : i32
    %c0_i32_0 = arith.constant 0 : i32
    %c0_i32_1 = arith.constant 0 : i32
    return %0, %c0_i32, %c0_i32_0 : i32, i32, i32
  }
  func.func @transform_38(%arg0: i32, %arg1: i32) -> (i32, i32, i32) {
    %0 = arith.muli %arg0, %arg1 : i32
    %c0_i32 = arith.constant 0 : i32
    %c0_i32_0 = arith.constant 0 : i32
    %c0_i32_1 = arith.constant 0 : i32
    return %0, %c0_i32, %c0_i32_0 : i32, i32, i32
  }
  func.func @transform_39(%arg0: i32, %arg1: i32) -> (i32, i32, i32) {
    %0 = arith.muli %arg0, %arg1 : i32
    %c0_i32 = arith.constant 0 : i32
    %c0_i32_0 = arith.constant 0 : i32
    %c0_i32_1 = arith.constant 0 : i32
    return %0, %c0_i32, %c0_i32_0 : i32, i32, i32
  }
  func.func @transform_40(%arg0: i32, %arg1: i32) -> (i32, i32, i32) {
    %0 = arith.muli %arg0, %arg1 : i32
    %c0_i32 = arith.constant 0 : i32
    %c0_i32_0 = arith.constant 0 : i32
    %c0_i32_1 = arith.constant 0 : i32
    return %0, %c0_i32, %c0_i32_0 : i32, i32, i32
  }
  func.func @transform_41(%arg0: i32, %arg1: i32) -> (i32, i32, i32) {
    %0 = arith.muli %arg0, %arg1 : i32
    %c0_i32 = arith.constant 0 : i32
    %c0_i32_0 = arith.constant 0 : i32
    %c0_i32_1 = arith.constant 0 : i32
    return %0, %c0_i32, %c0_i32_0 : i32, i32, i32
  }
  func.func @transform_42(%arg0: i32, %arg1: i32) -> (i32, i32, i32) {
    %0 = arith.muli %arg0, %arg1 : i32
    %c0_i32 = arith.constant 0 : i32
    %c0_i32_0 = arith.constant 0 : i32
    %c0_i32_1 = arith.constant 0 : i32
    return %0, %c0_i32, %c0_i32_0 : i32, i32, i32
  }
  func.func @transform_43(%arg0: i32, %arg1: i32) -> (i32, i32, i32) {
    %0 = arith.muli %arg0, %arg1 : i32
    %c0_i32 = arith.constant 0 : i32
    %c0_i32_0 = arith.constant 0 : i32
    %c0_i32_1 = arith.constant 0 : i32
    return %0, %c0_i32, %c0_i32_0 : i32, i32, i32
  }
  func.func @transform_44(%arg0: i32, %arg1: i32) -> (i32, i32) {
    %c0_i32 = arith.constant 0 : i32
    %c0_i32_0 = arith.constant 0 : i32
    %c0_i32_1 = arith.constant 0 : i32
    return %c0_i32, %c0_i32_0 : i32, i32
  }
  func.func @transform_45(%arg0: i32, %arg1: i32) -> (i32, i32) {
    %c0_i32 = arith.constant 0 : i32
    %c0_i32_0 = arith.constant 0 : i32
    %c0_i32_1 = arith.constant 0 : i32
    return %c0_i32, %c0_i32_0 : i32, i32
  }
  func.func @transform_46(%arg0: i32, %arg1: i32) -> (i32, i32) {
    %c0_i32 = arith.constant 0 : i32
    %c0_i32_0 = arith.constant 0 : i32
    %c0_i32_1 = arith.constant 0 : i32
    return %c0_i32, %c0_i32_0 : i32, i32
  }
}

</mosaic_0001>

<bundles_post_ra>
// kernel: transformer_forward.1
= control target key start
LH: loop header
LB: loop body
LE: loop exit
PB: predicated region body
PF: predicated region fallthrough
CT: control target
= control target key end

     0   :  { %s10758_s6 = smov 1   ;;  %s10759_s10 = smov 2   ;;  %s12263_s0 = inlined_call_operand.smem [shape: u32[47], index: -1, kind: input, shape index: {}] }
   0x1   :  { %s10826_s5 = sld [smem:[%s12263_s0]]   ;;  %s10760_s14 = smov 3  }
   0x2   :  { %s10831_s9 = sld [smem:[%s12263_s0 + %s10758_s6]]   ;;  %s10761_s18 = smov 4  }
   0x3   :  { %s10836_s13 = sld [smem:[%s12263_s0 + %s10759_s10]]   ;;  %s10762_s22 = smov 5  }
   0x4   :  { %s10841_s17 = sld [smem:[%s12263_s0 + %s10760_s14]]   ;;  %s10763_s26 = smov 6  }
   0x5   :  { %s10846_s21 = sld [smem:[%s12263_s0 + %s10761_s18]]   ;;  %s10764_s30 = smov 7  }
   0x6   :  { %s10851_s25 = sld [smem:[%s12263_s0 + %s10762_s22]]   ;;  %s10765_s4 = smov 8  }
   0x7   :  { %12294 = sst [smem:[#allocation10_spill]] %s10826_s5  ;;  %s10766_s10 = smov 9  }
   0x8   :  { %12295 = sst [smem:[#allocation11_spill]] %s10831_s9  ;;  %s10767_s15 = smov 10  }
   0x9   :  { %12296 = sst [smem:[#allocation12_spill]] %s10836_s13  ;;  %s10768_s20 = smov 11  }
   0xa   :  { %12297 = sst [smem:[#allocation13_spill]] %s10841_s17  ;;  %s10770_s1 = smov 13  }
   0xb   :  { %12298 = sst [smem:[#allocation14_spill]] %s10846_s21  ;;  %s10771_s7 = smov 14  }
   0xc   :  { %12299 = sst [smem:[#allocation15_spill]] %s10851_s25  ;;  %s10773_s22 = smov 16  }
   0xd   :  { %s10856_s29 = sld [smem:[%s12263_s0 + %s10763_s26]]   ;;  %s10769_s26 = smov 12  }
   0xe   :  { %s10861_s3 = sld [smem:[%s12263_s0 + %s10764_s30]]   ;;  %s10774_s28 = smov 17  }
   0xf   :  { %s10866_s8 = sld [smem:[%s12263_s0 + %s10765_s4]]  }
  0x10   :  { %s10871_s14 = sld [smem:[%s12263_s0 + %s10766_s10]]  }
  0x11   :  { %s10876_s19 = sld [smem:[%s12263_s0 + %s10767_s15]]   ;;  %s10772_s15 = smov 15  }
  0x12   :  { %s10881_s24 = sld [smem:[%s12263_s0 + %s10768_s20]]  }
  0x13   :  { %12300 = sst [smem:[#allocation16_spill]] %s10856_s29 }
  0x14   :  { %12301 = sst [smem:[#allocation17_spill]] %s10861_s3 }
  0x15   :  { %12302 = sst [smem:[#allocation18_spill]] %s10866_s8 }
  0x16   :  { %12303 = sst [smem:[#allocation19_spill]] %s10871_s14 }
  0x17   :  { %12304 = sst [smem:[#allocation20_spill]] %s10876_s19 }
  0x18   :  { %12305 = sst [smem:[#allocation21_spill]] %s10881_s24 }
  0x19   :  { %s10886_s30 = sld [smem:[%s12263_s0 + %s10769_s26]]  }
  0x1a   :  { %s10891_s6 = sld [smem:[%s12263_s0 + %s10770_s1]]  }
  0x1b   :  { %s10896_s12 = sld [smem:[%s12263_s0 + %s10771_s7]]   ;;  %s10775_s7 = smov 18  }
  0x1c   :  { %s10901_s20 = sld [smem:[%s12263_s0 + %s10772_s15]]   ;;  %s10776_s15 = smov 19  }
  0x1d   :  { %s10906_s27 = sld [smem:[%s12263_s0 + %s10773_s22]]   ;;  %s10777_s22 = smov 20  }
  0x1e   :  { %s10911_s4 = sld [smem:[%s12263_s0 + %s10774_s28]]   ;;  %s10778_s28 = smov 21  }
  0x1f   :  { %12306 = sst [smem:[#allocation22_spill]] %s10886_s30 }
  0x20   :  { %12307 = sst [smem:[#allocation23_spill]] %s10891_s6 }
  0x21   :  { %12308 = sst [smem:[#allocation24_spill]] %s10896_s12 }
  0x22   :  { %12309 = sst [smem:[#allocation25_spill]] %s10901_s20 }
  0x23   :  { %12310 = sst [smem:[#allocation26_spill]] %s10906_s27 }
  0x24   :  { %12311 = sst [smem:[#allocation27_spill]] %s10911_s4 }
  0x25   :  { %s10916_s9 = sld [smem:[%s12263_s0 + %s10775_s7]]   ;;  %s10779_s7 = smov 22  }
  0x26   :  { %s10921_s5 = sld [smem:[%s12263_s0 + %s10776_s15]]   ;;  %s10780_s15 = smov 23  }
  0x27   :  { %s10926_s27 = sld [smem:[%s12263_s0 + %s10777_s22]]   ;;  %s10781_s22 = smov 24  }
  0x28   :  { %s10931_s4 = sld [smem:[%s12263_s0 + %s10778_s28]]   ;;  %s10782_s28 = smov 25  }
  0x29   :  { %s10936_s20 = sld [smem:[%s12263_s0 + %s10779_s7]]   ;;  %s10783_s7 = smov 26  }
  0x2a   :  { %s10941_s12 = sld [smem:[%s12263_s0 + %s10780_s15]]   ;;  %s10784_s15 = smov 27  }
  0x2b   :  { %12312 = sst [smem:[#allocation28_spill]] %s10916_s9 }
  0x2c   :  { %12313 = sst [smem:[#allocation29_spill]] %s10921_s5 }
  0x2d   :  { %12314 = sst [smem:[#allocation30_spill]] %s10926_s27 }
  0x2e   :  { %12315 = sst [smem:[#allocation31_spill]] %s10931_s4 }
  0x2f   :  { %12316 = sst [smem:[#allocation32_spill]] %s10936_s20 }
  0x30   :  { %12317 = sst [smem:[#allocation33_spill]] %s10941_s12 }
  0x31   :  { %s10946_s27 = sld [smem:[%s12263_s0 + %s10781_s22]]   ;;  %s10785_s22 = smov 28  }
  0x32   :  { %s10951_s4 = sld [smem:[%s12263_s0 + %s10782_s28]]   ;;  %s10786_s28 = smov 29  }
  0x33   :  { %s10956_s20 = sld [smem:[%s12263_s0 + %s10783_s7]]   ;;  %s10787_s7 = smov 30  }
  0x34   :  { %s10961_s12 = sld [smem:[%s12263_s0 + %s10784_s15]]   ;;  %s10788_s15 = smov 31  }
  0x37   :  { %12318 = sst [smem:[#allocation34_spill]] %s10946_s27 }
  0x38   :  { %12319 = sst [smem:[#allocation35_spill]] %s10951_s4 }
  0x39   :  { %12320 = sst [smem:[#allocation36_spill]] %s10956_s20 }
  0x3a   :  { %12321 = sst [smem:[#allocation37_spill]] %s10961_s12 }
  0x3b   :  { %s10966_s27 = sld [smem:[%s12263_s0 + %s10785_s22]]   ;;  %s10789_s22 = smov 32  }
  0x3c   :  { %s10971_s4 = sld [smem:[%s12263_s0 + %s10786_s28]]   ;;  %s10790_s28 = smov 33  }
  0x3d   :  { %s10976_s20 = sld [smem:[%s12263_s0 + %s10787_s7]]   ;;  %s10791_s7 = smov 34  }
  0x3e   :  { %s10981_s12 = sld [smem:[%s12263_s0 + %s10788_s15]]   ;;  %s10792_s15 = smov 35  }
  0x41   :  { %12322 = sst [smem:[#allocation38_spill]] %s10966_s27 }
  0x42   :  { %12323 = sst [smem:[#allocation39_spill]] %s10971_s4 }
  0x43   :  { %12324 = sst [smem:[#allocation40_spill]] %s10976_s20 }
  0x44   :  { %12325 = sst [smem:[#allocation41_spill]] %s10981_s12 }
  0x45   :  { %s10986_s27 = sld [smem:[%s12263_s0 + %s10789_s22]]   ;;  %s10793_s22 = smov 36  }
  0x46   :  { %s10991_s4 = sld [smem:[%s12263_s0 + %s10790_s28]]   ;;  %s10794_s28 = smov 37  }
  0x47   :  { %s10996_s20 = sld [smem:[%s12263_s0 + %s10791_s7]]   ;;  %s10795_s7 = smov 38  }
  0x48   :  { %s11001_s12 = sld [smem:[%s12263_s0 + %s10792_s15]]   ;;  %s10796_s15 = smov 39  }
  0x4b   :  { %12326 = sst [smem:[#allocation42_spill]] %s10986_s27 }
  0x4c   :  { %12327 = sst [smem:[#allocation43_spill]] %s10991_s4 }
  0x4d   :  { %12328 = sst [smem:[#allocation44_spill]] %s10996_s20 }
  0x4e   :  { %12329 = sst [smem:[#allocation45_spill]] %s11001_s12 }
  0x4f   :  { %s11006_s27 = sld [smem:[%s12263_s0 + %s10793_s22]]   ;;  %s10797_s22 = smov 40  }
  0x50   :  { %s11011_s4 = sld [smem:[%s12263_s0 + %s10794_s28]]   ;;  %s10798_s28 = smov 41  }
  0x51   :  { %s11016_s20 = sld [smem:[%s12263_s0 + %s10795_s7]]   ;;  %s10799_s7 = smov 42  }
  0x52   :  { %s11021_s12 = sld [smem:[%s12263_s0 + %s10796_s15]]   ;;  %s10800_s15 = smov 43  }
  0x55   :  { %12330 = sst [smem:[#allocation46_spill]] %s11006_s27 }
  0x56   :  { %12331 = sst [smem:[#allocation47_spill]] %s11011_s4 }
  0x57   :  { %12332 = sst [smem:[#allocation48_spill]] %s11016_s20 }
  0x58   :  { %12333 = sst [smem:[#allocation49_spill]] %s11021_s12 }
  0x59   :  { %s11026_s27 = sld [smem:[%s12263_s0 + %s10797_s22]]   ;;  %s10801_s22 = smov 44  }
  0x5a   :  { %s11031_s4 = sld [smem:[%s12263_s0 + %s10798_s28]]   ;;  %s10802_s28 = smov 45  }
  0x5b   :  { %s11036_s20 = sld [smem:[%s12263_s0 + %s10799_s7]]   ;;  %s10803_s7 = smov 46  }
  0x5c   :  { %s11041_s12 = sld [smem:[%s12263_s0 + %s10800_s15]]  }
  0x5f   :  { %12334 = sst [smem:[#allocation50_spill]] %s11026_s27 }
  0x60   :  { %12335 = sst [smem:[#allocation51_spill]] %s11031_s4 }
  0x61   :  { %12336 = sst [smem:[#allocation52_spill]] %s11036_s20 }
  0x62   :  { %12337 = sst [smem:[#allocation53_spill]] %s11041_s12 }
  0x63   :  { %s11046_s27 = sld [smem:[%s12263_s0 + %s10801_s22]]  }
  0x64   :  { %s11051_s4 = sld [smem:[%s12263_s0 + %s10802_s28]]  }
  0x65   :  { %s11056_s20 = sld [smem:[%s12263_s0 + %s10803_s7]]  }
  0x69   :  { %12338 = sst [smem:[#allocation54_spill]] %s11046_s27 }
  0x6a   :  { %12339 = sst [smem:[#allocation55_spill]] %s11051_s4 }
  0x6b   :  { %12340 = sst [smem:[#allocation56_spill]] %s11056_s20 }
  0x6c   :  { %98 = vsyncpa [#allocation5], 0 }
  0x6d   :  { %100 = vsyncpa [#allocation5 + $0x1], 0 }
  0x6e   :  { %101 = vsyncpa [#allocation7], 0  ;;  %s11058_s15 = smov 0   ;;  %s11060_s16 = smov 0  }
  0x6f   :  { %s11062_s18 = smov 0   ;;  %s11064_s22 = smov 0  }
  0x70   :  { %s11066_s23 = smov 0   ;;  %s11068_s26 = smov 0  }
  0x71   :  { %s11070_s28 = smov 0   ;;  %s11072_s1 = smov 0  }
  0x72 LB: > { %s12341_s12 = sld [smem:[#allocation53_spill]]  ;;  %s12342_s4 = sld [smem:[#allocation55_spill]]  ;;  %s10732_s16 = sphi %s11060_s16, %s12476_s16   ;;  %s10728_s15 = sphi %s11058_s15, %s12475_s15   ;;  %s10756_s1 = sphi %s11072_s1, %s107_s1   ;;  %s10752_s28 = sphi %s11070_s28, %s12481_s28   ;;  %s10748_s26 = sphi %s11068_s26, %s12480_s26   ;;  %s10744_s23 = sphi %s11066_s23, %s12479_s23   ;;  %s10740_s22 = sphi %s11064_s22, %s12478_s22   ;;  %s10736_s18 = sphi %s11062_s18, %s12477_s18  }
  0x73   : > { %12343 = sst [smem:[#allocation57_spill]] %s10732_s16  ;;  %s9635_s0 = sadd.s32 4294967295, %s10756_s1  }
  0x74   : > { %12344 = sst [smem:[#allocation58_spill]] %s10736_s18  ;;  %p1363_p0 = scmp.ne.s32.totalorder %s10732_s16, %s10728_s15 }
  0x75   : > { %12345 = sst [smem:[#allocation59_spill]] %s10740_s22  ;;  %p11098_p1 = scmp.eq.s32.totalorder %s9635_s0, 0 }
  0x76   : > { %12346 = sst [smem:[#allocation60_spill]] %s10748_s26  ;;  %p9636_p2 = scmp.ge.s32.totalorder %s10756_s1, 1 }
  0x77   : > { %12347 = sst [smem:[#allocation61_spill]] %s10752_s28  ;;  %p1437_p3 = scmp.lt.s32.totalorder %s10756_s1, 5 }
  0x78   : > { %12348 = sst [smem:[#allocation62_spill]] %s10756_s1  ;;  %p11106_p4 = por %p11098_p1, %p1363_p0 }
  0x79   : > { %s12349_s2 = scalar_select %p11098_p1, 1, 0 }
  0x7a   : > { %s12350_s7 = scalar_select %p11106_p4, 1, 0 }
  0x7b   : > { %p11110_p5 = pnand %p9636_p2, %p1437_p3  ;;  %s10804_s11 = smov [#allocation6]  }
  0x7c   : > { %s1459_s15 = sshll.u32 %s10804_s11, 4  ;;  %s116_s20 = sadd.s32 1, %s10748_s26  ;;  %s1460_s15 = int_to_ptr.vmem [resolvable:$true] %s1459_s15 }
  0x7d   : > { %s12351_s10 = scalar_select %p11110_p5, 1, 0 }
  0x7e   : > { %p10426_p6 = pneg %p11110_p5  ;;  %s10628_s27 = scalar_lea.hbm %s12342_s4, 16 }
  0x7f   : > { %p10629_p8 = scmp.ne.s32.totalorder %s12342_s4, %s10628_s27  ;;  %p10635_p12 = scmp.lt.u32.totalorder %s10628_s27, %s12342_s4 }
  0x80   : > { %p11118_p7 = pnand %p10426_p6, %p11098_p1 }
  0x82   : > { %p10630_p9 = pneg %p11118_p7 }
  0x84   : > { %p10631_p10 = pnand %p10630_p9, %p10629_p8 }
  0x86   : > { %p10632_p11 = pneg %p10631_p10 }
  0x88   : > { %p10637_p13 = pnand %p10635_p12, %p10632_p11 }
  0x8a   : > { %10640 = shalt.err (!%p10637_p13)
}
  0x8b   : > { %s10641_s11 = scalar_lea.vmem %s1460_s15, 16  ;;  %s10648_s6 = scalar_lea.vmem %s1460_s15, 32 }
  0x8c   : > { %p10642_p0 = scmp.ne.s32.totalorder %s1460_s15, %s10641_s11  ;;  %p10649_p6 = scmp.lt.s32.totalorder %s1460_s15, %s1460_s15 }
  0x8d   : > { %p10650_p1 = scmp.lt.s32.totalorder %s10648_s6, %s10641_s11 }
  0x8e   : > { %p10644_p2 = pnand %p10642_p0, %p10630_p9 }
  0x8f   : > { %p10651_p4 = por %p10650_p1, %p10649_p6 }
  0x90   : > { %p10645_p3 = pneg %p10644_p2 }
  0x92   : > { %p10652_p5 = pnand %p10651_p4, %p10645_p3 }
  0x94   : > { %10655 = shalt.err (!%p10652_p5)
}
  0x95   : > { %10429 = dma.hbm_to_vmem [thread:$0]  (!%p11118_p7), %s12342_s4, 16, %s1460_s15, [#allocation7]  }
  0x96   : > { %p117_p8 = scmp.ge.s32.totalorder %s116_s20, 2  ;;  %s119_s27 = sadd.s32 1, %s10752_s28 }
  0x97   : > { %p1357_p1 = scmp.ne.s32.totalorder %s10736_s18, %s10732_s16  ;;  %p1358_p4 = scmp.eq.s32.totalorder %s10756_s1, 0 }
  0x98   : > { %s12483_s20 = smov (%p117_p8, %s116_s20), 0  ;;  %s12485_s27 = smov (!%p117_p8, %s119_s27), %s10752_s28 }
  0x99   : > { %12353 = sst [smem:[#allocation63_spill]] %s12483_s20  ;;  %p121_p5 = scmp.ge.s32.totalorder %s12485_s27, 2 }
  0x9a   : > { %s1345_s6 = smul.u32 %s10748_s26, %s10752_s28  ;;  %p10435_p9 = scmp.lt.s32.totalorder %s10756_s1, 4 }
  0x9b   : > { %s1862_s0 = sand.u32 1, %s10736_s18   ;;  %s12487_s27 = smov (%p121_p5, %s12485_s27), 0 }
  0x9c   : > { %12354 = sst [smem:[#allocation64_spill]] %s12487_s27  ;;  %p1359_p10 = por %p1358_p4, %p1357_p1 }
  0x9d   : > { %s1346_s11 = smul.u32 %s12487_s27, %s12483_s20  ;;  %s1350_s15 = sadd.s32 1, %s10736_s18 }
  0x9e   : > { %s9639_s4 = sshll.u32 %s1345_s6, 4  ;;  %s1865_s30 = scalar_lea.vmem [#allocation4], %s1862_s0 }
  0x9f   : > { %s1873_s24 = sshll.u32 %s1865_s30, 4  ;;  %s1347_s19 = ssub.s32 %s1345_s6, %s1346_s11  ;;  %s11154_s24 = int_to_ptr.vmem [resolvable:$true] %s1873_s24 }
  0xa0   : > { %p1348_p7 = scmp.eq.s32.totalorder %s1347_s19, 0  ;;  %p11147_p11 = pnand %p10435_p9, %p1359_p10 }
  0xa1   : > { %s11152_s28 = scalar_lea.hbm %s12341_s12, %s9639_s4  ;;  %s1863_s20 = scalar_lea.sflag [#allocation5], %s1862_s0 }
  0xa2   : > { %s11157_s27 = scalar_select %p1348_p7, %s10736_s18, %s1350_s15  }
  0xa3   : > { %s10656_s30 = scalar_lea.hbm %s11152_s28, 16  ;;  %p10658_p13 = pneg %p11147_p11 }
  0xa4   : > { %12356 = sst [smem:[#allocation65_spill]] %s11157_s27  ;;  %p10657_p12 = scmp.ne.s32.totalorder %s11152_s28, %s10656_s30 }
  0xa5   : > { %s10661_s19 = scalar_lea.hbm %s12341_s12, 32  ;;  %p10662_p3 = scmp.lt.u32.totalorder %s11152_s28, %s12341_s12 }
  0xa6   : > { %p10659_p0 = pnand %p10658_p13, %p10657_p12  ;;  %p10663_p6 = scmp.lt.u32.totalorder %s10661_s19, %s10656_s30 }
  0xa7   : > { %p10665_p1 = scmp.lt.u32.totalorder %s10656_s30, %s11152_s28 }
  0xa8   : > { %p10660_p2 = pneg %p10659_p0  ;;  %p10664_p8 = por %p10663_p6, %p10662_p3 }
  0xaa   : > { %p10666_p4 = por %p10665_p1, %p10664_p8 }
  0xac   : > { %p10667_p5 = pnand %p10666_p4, %p10660_p2 }
  0xae   : > { %10670 = shalt.err (!%p10667_p5)
}
  0xaf   : > { %s10671_s4 = scalar_lea.vmem %s11154_s24, 16  ;;  %s10805_s6 = smov [#allocation4]  }
  0xb0   : > { %p10672_p9 = scmp.ne.s32.totalorder %s11154_s24, %s10671_s4  ;;  %s10676_s0 = sshll.u32 %s10805_s6, 4  ;;  %s10677_s0 = int_to_ptr.vmem [resolvable:$false] %s10676_s0 }
  0xb1   : > { %s10678_s11 = scalar_lea.vmem %s10677_s0, 32  ;;  %p10679_p12 = scmp.lt.s32.totalorder %s11154_s24, %s10677_s0 }
  0xb2   : > { %p10674_p10 = pnand %p10672_p9, %p10658_p13  ;;  %p10680_p0 = scmp.lt.s32.totalorder %s10678_s11, %s10671_s4 }
  0xb4   : > { %p10675_p7 = pneg %p10674_p10  ;;  %p10681_p3 = por %p10680_p0, %p10679_p12 }
  0xb6   : > { %p10682_p6 = pnand %p10681_p3, %p10675_p7 }
  0xb8   : > { %10685 = shalt.err (!%p10682_p6)
}
  0xb9   : > { %10433 = dma.hbm_to_vmem [thread:$0]  (!%p11147_p11), %s11152_s28, 16, %s11154_s24, %s1863_s20  }
  0xba   : > { %p12357_p2 = scmp.ne.s32.totalorder %s12351_s10, 0 }
  0xbc   : > { %1882 = sbr.rel (%p12357_p2) target bundleno = 8928 (0x22e0), region = 204 }
  0xc3   : > { %s1884_s15 = sand.u32 1, %s10732_s16   ;;  %p12359_p13 = scmp.ne.s32.totalorder %s12350_s7, 0 }
  0xc4   : > { %s1885_s30 = scalar_lea.sflag [#allocation5], %s1884_s15  ;;  %s11183_s19 = scalar_lea.vmem [#allocation4], %s1884_s15 }
  0xc5   : > { %12358 = sst [smem:[#allocation66_spill]] %s11183_s19 }
  0xc6   : > { %10719 = dma.done.wait (%p12359_p13), %s1885_s30, 16  }
  0xc7   : > { %10721 = vsyncadd (%p12359_p13), %s1885_s30, 4294967280  ;;  %p12360_p8 = scmp.ne.s32.totalorder %s12349_s2, 0 }
  0xc9   : > { %10723 = dma.done.wait (%p12360_p8), [#allocation7], 16  }
  0xca   : > { %10725 = vsyncadd (%p12360_p8), [#allocation7], 4294967280  ;;  %s2206_s14 = ssub.s32 1, %s10744_s23  ;;  %s2330_s24 = smul.u32 %s10740_s22, %s10744_s23  ;;  %v2476_v0 = vlaneseq }
  0xcb   : > { %s2207_s20 = smul.u32 %s10740_s22, %s2206_s14  ;;  %s12366_s21 = sld [smem:[#allocation14_spill]] }
  0xcc   : > { %p2331_p11 = scmp.lt.s32.totalorder %s2330_s24, 1  ;;  %s12367_s29 = sld [smem:[#allocation16_spill]]  ;;  %v11197_v1 = vshrl.u32 %v2476_v0, 7  ;;  %v11199_v2 = vand.u32 127, %v2476_v0 }
  0xcd   : > { %s12369_s8 = sld [smem:[#allocation18_spill]]  ;;  %p2481_p1 = scmp.eq.s32.totalorder %s10744_s23, 0 }
  0xce   : > { %p2208_p4 = scmp.lt.s32.totalorder %s2207_s20, 1  ;;  %s12371_s2 = sld [smem:[#allocation20_spill]]  ;;  %vm2480_vm0 = vcmp.gt.s32.totalorder %v11199_v2, %v11197_v1 }
  0xcf   : > { %p2482_p5 = scmp.eq.s32.totalorder %s10740_s22, 0  ;;  %s12489_s24 = smov (!%p2331_p11, %s2330_s24), 1 }
  0xd0   : > { %s12491_s20 = smov (!%p2208_p4, %s2207_s20), 1  ;;  %s12376_s6 = sld [smem:[#allocation24_spill]] }
  0xd1   : > { %12375 = sst [smem:[#allocation67_spill]] %s12491_s20  ;;  %s12378_s14 = sld [smem:[#allocation26_spill]] }
  0xd2   : > { %s9821_s27 = sshll.u32 %s12491_s20, 4  ;;  %s12382_s19 = sld [smem:[#allocation30_spill]] }
  0xd3   : > { %s11221_s1 = scalar_lea.vmem %s12366_s21, %s9821_s27  ;;  %s11224_s22 = scalar_lea.vmem %s12367_s29, %s9821_s27 }
  0xd4   : > { %12381 = sst [smem:[#allocation68_spill]] %s11221_s1  ;;  %s12384_s0 = sld [smem:[#allocation32_spill]] }
  0xd5   : > { %12383 = sst [smem:[#allocation69_spill]] %s11224_s22  ;;  %s11229_s5 = scalar_lea.vmem %s12369_s8, %s9821_s27 }
  0xd6   : > { %12386 = sst [smem:[#allocation70_spill]] %s11229_s5  ;;  %s12387_s30 = sld [smem:[#allocation34_spill]] }
  0xd7   : > { %s11234_s13 = scalar_lea.vmem %s12371_s2, %s9821_s27  ;;  %s12390_s25 = sld [smem:[#allocation36_spill]] }
  0xd8   : > { %12389 = sst [smem:[#allocation71_spill]] %s11234_s13  ;;  %s11243_s9 = scalar_lea.vmem %s12376_s6, %s9821_s27 }
  0xd9   : > { %12393 = sst [smem:[#allocation72_spill]] %s11243_s9  ;;  %s9826_s28 = sshll.u32 %s12491_s20, 6 }
  0xda   : > { %s12395_s5 = sld [smem:[#allocation40_spill]]  ;;  %s12396_s12 = sld [smem:[#allocation41_spill]] }
  0xdb   : > { %s11249_s2 = scalar_lea.vmem %s12378_s14, %s9826_s28  ;;  %s12398_s13 = sld [smem:[#allocation42_spill]] }
  0xdc   : > { %12397 = sst [smem:[#allocation73_spill]] %s11249_s2  ;;  %s12399_s10 = sld [smem:[#allocation43_spill]] }
  0xdd   : > { %s9827_s21 = sshll.u32 %s12489_s24, 5  ;;  %s12400_s18 = sld [smem:[#allocation44_spill]] }
  0xde   : > { %s12401_s29 = sld [smem:[#allocation45_spill]]  ;;  %s11257_s27 = scalar_lea.vmem %s12382_s19, %s9827_s21 }
  0xdf   : > { %12402 = sst [smem:[#allocation74_spill]] %s11257_s27  ;;  %s12403_s6 = sld [smem:[#allocation46_spill]] }
  0xe0   : > { %s11260_s9 = scalar_lea.vmem %s12384_s0, %s9827_s21  ;;  %s12405_s11 = sld [smem:[#allocation47_spill]] }
  0xe1   : > { %12404 = sst [smem:[#allocation75_spill]] %s11260_s9  ;;  %s12406_s14 = sld [smem:[#allocation48_spill]] }
  0xe2   : > { %s11265_s28 = scalar_lea.vmem %s12387_s30, %s9827_s21  ;;  %s12408_s26 = sld [smem:[#allocation49_spill]] }
  0xe3   : > { %12407 = sst [smem:[#allocation76_spill]] %s11265_s28  ;;  %s12409_s2 = sld [smem:[#allocation50_spill]] }
  0xe4   : > { %s9830_s20 = sshll.u32 %s12489_s24, 4  ;;  %s12410_s16 = sld [smem:[#allocation51_spill]] }
  0xe5   : > { %s11271_s4 = scalar_lea.vmem %s12390_s25, %s9830_s20  ;;  %s12413_s27 = sld [smem:[#allocation52_spill]] }
  0xe6   : > { %12411 = sst [smem:[#allocation77_spill]] %s11271_s4  ;;  %s11280_s3 = scalar_lea.vmem %s12395_s5, %s9827_s21 }
  0xe7   : > { %s2408_s30 = scalar_lea.vmem %s12396_s12, %s12489_s24  ;;  %s11285_s28 = scalar_lea.vmem %s12398_s13, %s9830_s20 }
  0xe8   : > { %s2420_s7 = scalar_lea.vmem %s12399_s10, %s12489_s24  ;;  %s11290_s17 = scalar_lea.vmem %s12400_s18, %s9830_s20 }
  0xe9   : > { %s2432_s25 = scalar_lea.vmem %s12401_s29, %s12489_s24  ;;  %s11295_s4 = scalar_lea.vmem %s12403_s6, %s9830_s20 }
  0xea   : > { %s2444_s1 = scalar_lea.vmem %s12405_s11, %s12489_s24  ;;  %s2449_s19 = scalar_lea.vmem %s12406_s14, %s12489_s24 }
  0xeb   : > { %s2454_s9 = scalar_lea.vmem %s12408_s26, %s12489_s24  ;;  %s11304_s22 = scalar_lea.vmem %s12409_s2, %s9827_s21 }
  0xec   : > { %s2466_s8 = scalar_lea.vmem %s12410_s16, %s12489_s24  ;;  %s9836_s15 = sshll.u32 %s12489_s24, 7 }
  0xed   : > { %p2483_p9 = pnand %p2482_p5, %p2481_p1  ;;  %s11314_s5 = scalar_lea.vmem %s12413_s27, %s9836_s15 }
  0xee   : > { %s12414_s13 = sld [smem:[#allocation10_spill]] (!%p2483_p9)  ;;  %s12415_s12 = sld [smem:[#allocation11_spill]] (!%p2483_p9)  ;;  %vm2489_vm1 = vcmask (!%p2483_p9), 130048   ;;  %vm2494_vm2 = vcmask (!%p2483_p9), 261120  }
  0xef   : > { %2486 = sbr.rel (%p2483_p9) target bundleno = 247 (0xf7), region = 216 }
  0xf4   : > { %v2487_v3 = vld [vmem:[%s12414_s13] sm:$0xff] (!%p2483_p9)  ;;  %v2488_v4 = vld [vmem:[%s12414_s13 + $0x8] sm:$0xff] (!%p2483_p9) }
  0xf5   : > { %v2492_v5 = vld [vmem:[%s12415_s12] sm:$0xff] (!%p2483_p9)  ;;  %2490 = vst.msk [vmem:[#allocation2] sm:$0xff] (!%p2483_p9), %vm2489_vm1, %v2487_v3  ;;  %2491 = vst.msk [vmem:[#allocation2 + $0x8] sm:$0xff] (!%p2483_p9), %vm2489_vm1, %v2488_v4  ;;  %v2493_v6 = vld [vmem:[%s12415_s12 + $0x8] sm:$0xff] (!%p2483_p9) }
  0xf6   : > { %2495 = vst.msk [vmem:[#allocation3] sm:$0xff] %vm2494_vm2, %v2492_v5  ;;  %2496 = vst.msk [vmem:[#allocation3 + $0x8] sm:$0xff] %vm2494_vm2, %v2493_v6 }
  0xf7 PF: > { %p9674_p10 = scmp.ne.s32.totalorder %s10744_s23, 0 }
  0xf8   : > { %vm2530_vm3 = vcmask (!%p9674_p10), 130048   ;;  %s12416_s21 = sld [smem:[#allocation68_spill]] (!%p9674_p10)  ;;  %s12417_s29 = sld [smem:[#allocation69_spill]] (!%p9674_p10)  ;;  %v10806_v46 = vmov (!%p9674_p10), 0.0   ;;  %vm10808_vm4 = vmmov (!%p9674_p10), 0   ;;  %vm3183_vm5 = vcmask (!%p9674_p10), 64512  }
  0xf9   : > { %2499 = sbr.rel (%p9674_p10) target bundleno = 3316 (0xcf4), region = 220  ;;  %s12418_s18 = sld [smem:[#allocation12_spill]] (!%p9674_p10)  ;;  %10006 = vmatprep.subr.mxu1 (!%p9674_p10), %v10806_v46  ;;  %10008 = vmatprep.mubr.msk.f32.mxu1 (!%p9674_p10), %vm10808_vm4, %v10806_v46  ;;  %v10809_v61 = vmov (!%p9674_p10), 1983009808   ;;  %v10810_v0 = vmov (!%p9674_p10), 1934713408  }
  0xfa   : > { %s12419_s20 = sld [smem:[#allocation67_spill]] (!%p9674_p10)  ;;  %s12420_s2 = sld [smem:[#allocation13_spill]] (!%p9674_p10)  ;;  %v2829_v62 = vunpack.c.l.s4 (!%p9674_p10), %v10809_v61  ;;  %v2860_v3 = vunpack.c.l.s4 (!%p9674_p10), %v10810_v0  ;;  %vm4648_vm6 = vcmask (!%p9674_p10), 523264  }
  0xfb   : > { %s12421_s10 = sld [smem:[#allocation70_spill]] (!%p9674_p10)  ;;  %s12424_s11 = sld [smem:[#allocation15_spill]] (!%p9674_p10) }
  0xfc   : > { %s12425_s14 = sld [smem:[#allocation17_spill]] (!%p9674_p10)  ;;  %s12426_s26 = sld [smem:[#allocation19_spill]] (!%p9674_p10)  ;;  %v2830_v63 = vunpack.c.0.s8 (!%p9674_p10), %v2829_v62  ;;  %v2861_v5 = vunpack.c.0.s8 (!%p9674_p10), %v2860_v3 }
  0xfd   : > { %v11321_v7 = vld [vmem:[#allocation2] sm:$0xff] (!%p9674_p10)  ;;  %v11323_v8 = vld [vmem:[#allocation2 + $0x8] sm:$0xff] (!%p9674_p10)  ;;  %s10807_s15 = smov (!%p9674_p10), 120  }
  0xfe   : > { %v2531_v9 = vsel (!%p9674_p10), %vm2530_vm3, %v11321_v7, 0.0  ;;  %v2534_v10 = vsel (!%p9674_p10), %vm2530_vm3, %v11323_v8, 0.0  ;;  %v2502_v21 = vld [vmem:[%s12416_s21] sm:$0xff] (!%p9674_p10)  ;;  %v2503_v22 = vld [vmem:[%s12416_s21 + $0x8] sm:$0xff] (!%p9674_p10)  ;;  %v11380_v4 = vsub.s32 (!%p9674_p10), %v2830_v63, %v11197_v1 }
  0xff   : > { %2532 = vadd.xlane.f32.xlu0 (!%p9674_p10), %v2531_v9  ;;  %v10288_v23 = vpack.c.bf16 (!%p9674_p10), %v2503_v22, %v2502_v21  ;;  %v2505_v24 = vld [vmem:[%s12417_s29] sm:$0xff] (!%p9674_p10)  ;;  %v2506_v25 = vld [vmem:[%s12417_s29 + $0x8] sm:$0xff] (!%p9674_p10)  ;;  %s12430_s29 = sld [smem:[#allocation71_spill]] (!%p9674_p10) }
 0x100   : > { %v10292_v26 = vpack.c.bf16 %v2506_v25, %v2505_v24  ;;  %s12422_s27 = scalar_lea.vmem %s12418_s18, %s12419_s20  ;;  %s12423_s6 = scalar_lea.vmem %s12420_s2, %s12419_s20 }
 0x101   : > { %10289 = vmatprep.subr.bf16.mxu0 %v10288_v23  ;;  %v9675_v34 = vld [vmem:[%s12422_s27] ss:$0 sm:$0xff]  ;;  %v2509_v42 = vld [vmem:[%s12421_s10 + $0x8] sm:$0xff]  ;;  %s12427_s16 = scalar_lea.vmem %s12424_s11, %s12419_s20  ;;  %s10811_s18 = smov 8  }
 0x102   : > { %10291 = vmatpush3.bf16.msra.mxu0 %v10288_v23  ;;  %v9676_v36 = vld [vmem:[%s12423_s6] ss:$0 sm:$0xff]  ;;  %s12428_s0 = scalar_lea.vmem %s12425_s14, %s12419_s20  ;;  %s12429_s21 = scalar_lea.vmem %s12426_s26, %s12419_s20 }
 0x103   : > { %2535 = vadd.xlane.f32.xlu0 %v2534_v10  ;;  %10293 = vmatprep.subr.bf16.mxu0 %v10292_v26  ;;  %v2508_v41 = vld [vmem:[%s12421_s10] sm:$0xff]  ;;  %s12431_s2 = sld [smem:[#allocation21_spill]]  ;;  %s12433_s27 = sld [smem:[#allocation72_spill]] }
 0x104   : > { %v10296_v45 = vpack.c.bf16 %v2509_v42, %v2508_v41  ;;  %v9677_v47 = vld [vmem:[%s12427_s16] ss:$0 sm:$0xff]  ;;  %s12434_s6 = sld [smem:[#allocation73_spill]]  ;;  %s12435_s11 = sld [smem:[#allocation22_spill]] }
 0x105   : > { %v9680_v52 = vld [vmem:[%s12428_s0] ss:$0 sm:$0xff]  ;;  %s12436_s14 = sld [smem:[#allocation23_spill]]  ;;  %s12438_s16 = sld [smem:[#allocation25_spill]] }
 0x106   : > { %v11367_v57 = vld [vmem:[%s12429_s21] ss:$0 sm:$0xff] }
 0x109   : > { %s12432_s10 = scalar_lea.vmem %s12431_s2, %s12419_s20 }
 0x10a   : > { %s12437_s26 = scalar_lea.vmem %s12435_s11, %s12419_s20 }
 0x10b   : > { %s12439_s0 = scalar_lea.vmem %s12436_s14, %s12419_s20  ;;  %s12441_s21 = scalar_lea.vmem %s12438_s16, %s12419_s20 }
 0x18c   : > { %v2533_v11 = vpop.xlane.xlu0 %2532 }
 0x18d   : > { %v2538_v12 = vmul.f32 0.0625, %v2533_v11 }
 0x18f   : > { %v2540_v13 = vsub.f32 %v11321_v7, %v2538_v12 }
 0x190   : > { %v2536_v14 = vpop.xlane.xlu0 %2535 }
 0x191   : > { %v2539_v15 = vmul.f32 0.0625, %v2536_v14  ;;  %v2542_v16 = vmul.f32 %v2540_v13, %v2540_v13 }
 0x193   : > { %v2541_v17 = vsub.f32 %v11323_v8, %v2539_v15  ;;  %v2544_v18 = vsel %vm2530_vm3, %v2542_v16, 0.0 }
 0x194   : > { %2545 = vadd.xlane.f32.xlu1 %v2544_v18 }
 0x195   : > { %v2543_v19 = vmul.f32 %v2541_v17, %v2541_v17 }
 0x197   : > { %v2547_v20 = vsel %vm2530_vm3, %v2543_v19, 0.0 }
 0x198   : > { %2548 = vadd.xlane.f32.xlu1 %v2547_v20 }
 0x221   : > { %v2546_v27 = vpop.xlane.xlu1 %2545 }
 0x222   : > { %v2550_v28 = vmul.f32 0.0625, %v2546_v27 }
 0x224   : > { %v2552_v29 = vadd.f32 1e-05, %v2550_v28 }
 0x225   : > { %v2549_v30 = vpop.xlane.xlu1 %2548 }
 0x226   : > { %10560 = vrsqrt.f32 %v2552_v29  ;;  %v2551_v31 = vmul.f32 0.0625, %v2549_v30 }
 0x228   : > { %v2553_v32 = vadd.f32 1e-05, %v2551_v31 }
 0x22a   : > { %10562 = vrsqrt.f32 %v2553_v32 }
 0x230   : > { %v10561_v33 = vpop.eup %10560 }
 0x231   : > { %v2556_v35 = vmul.f32 %v10561_v33, %v2540_v13  ;;  %v11387_v13 = vsub.s32 %v2861_v5, %v11197_v1 }
 0x233   : > { %v2564_v37 = vmul.f32 %v9675_v34, %v2556_v35 }
 0x234   : > { %v10563_v38 = vpop.eup %10562 }
 0x235   : > { %v2557_v39 = vmul.f32 %v10563_v38, %v2541_v17  ;;  %v2572_v40 = vadd.f32 %v9676_v36, %v2564_v37 }
 0x237   : > { %v2565_v43 = vmul.f32 %v9675_v34, %v2557_v39  ;;  %9989 = vmatprep.mubr.msk.f32.mxu0 %vm2530_vm3, %v2572_v40 }
 0x239   : > { %v2573_v44 = vadd.f32 %v9676_v36, %v2565_v43 }
 0x23b   : > { %9990 = vmatmul.mubr.msk.f32.vlgmr.msra.gmra.mrb[0].mxu0 %vm2530_vm3, %v2573_v44 }
 0x23c   : > { %10295 = vmatpush3.bf16.msra.mxu0 %v10292_v26  ;;  %9996 = vmatprep.mubr.msk.f32.mxu0 %vm2530_vm3, %v2572_v40 }
 0x23d   : > { %10297 = vmatprep.subr.bf16.mxu0 %v10296_v45 }
 0x23f   : > { %9997 = vmatmul.mubr.msk.f32.vlgmr.msra.gmra.mrb[2].mxu0 %vm2530_vm3, %v2573_v44 }
 0x240   : > { %10299 = vmatpush3.bf16.msra.mxu0 %v10296_v45  ;;  %10003 = vmatprep.mubr.msk.f32.mxu0 %vm2530_vm3, %v2572_v40 }
 0x241   : > { %10011 = vmatprep.subr.mxu0 %v10806_v46 }
 0x243   : > { %10004 = vmatmul.mubr.msk.f32.vlgmr.msra.gmra.mrb[4].mxu0 %vm2530_vm3, %v2573_v44 }
 0x244   : > { %10013 = vmatprep.mubr.msk.f32.mxu0 %vm10808_vm4, %v10806_v46 }
 0x30e   : > { %v9991_v48 = vpop.f32.mrb[0].mxu0 }
 0x30f   : > { %v11356_v49 = vadd.f32 %v9991_v48, %v9677_v47  ;;  %v2652_v50 = vpop.f32.mrb[1].mxu0 }
 0x310   : > { %v2653_v51 = vadd.f32 %v9677_v47, %v2652_v50 }
 0x312   : > { %v9998_v53 = vpop.f32.mrb[2].mxu0  ;;  %2824 = vrot.lane.b32.xlu1 %v2653_v51, %s10807_s15  ;;  %v2827_v6 = vcombine.high %v2653_v51, %v10806_v46  ;;  %v2834_v10 = vrot.slane %v2653_v51, %v11380_v4 }
 0x313   : > { %v11362_v54 = vadd.f32 %v9998_v53, %v9680_v52  ;;  %v2733_v55 = vpop.f32.mrb[3].mxu0 }
 0x314   : > { %v2734_v56 = vadd.f32 %v9680_v52, %v2733_v55  ;;  %v2841_v14 = vrot.slane %v2827_v6, %v11380_v4 }
 0x316   : > { %v10005_v58 = vpop.f32.mrb[4].mxu0  ;;  %2894 = vrot.lane.b32.xlu0 %v2734_v56, %s10807_s15  ;;  %v2897_v18 = vcombine.high %v2734_v56, %v10806_v46  ;;  %v2904_v22 = vrot.slane %v2734_v56, %v11380_v4 }
 0x317   : > { %v11371_v59 = vadd.f32 %v10005_v58, %v11367_v57  ;;  %v11373_v60 = vpop.f32.mrb[5].mxu0 }
 0x318   : > { %v2911_v29 = vrot.slane %v2897_v18, %v11380_v4 }
 0x384   : > { %v2825_v9 = vpop.permute.xlu1 %2824 }
 0x385   : > { %v2842_v11 = vcombine.high %v2825_v9, %v10806_v46  ;;  %v2849_v12 = vrot.slane %v2825_v9, %v11380_v4 }
 0x387   : > { %v2856_v15 = vrot.slane %v2842_v11, %v11380_v4  ;;  %v2857_v16 = vcombine.low %v2834_v10, %v2849_v12  ;;  %v2858_v17 = vcombine.high %v2834_v10, %v2849_v12 }
 0x388   : > { %v2895_v19 = vpop.permute.xlu0 %2894 }
 0x389   : > { %v2873_v20 = vcombine.low %v2841_v14, %v2856_v15  ;;  %v2874_v21 = vcombine.high %v2841_v14, %v2856_v15  ;;  %v2912_v23 = vcombine.high %v2895_v19, %v10806_v46  ;;  %v2919_v24 = vrot.slane %v2895_v19, %v11380_v4 }
 0x38a   : > { %v2865_v25 = vrot.slane %v2857_v16, %v11387_v13  ;;  %v2872_v26 = vrot.slane %v2858_v17, %v11387_v13 }
 0x38b   : > { %v2881_v27 = vrot.slane %v2873_v20, %v11387_v13  ;;  %v2888_v28 = vrot.slane %v2874_v21, %v11387_v13  ;;  %v2926_v30 = vrot.slane %v2912_v23, %v11380_v4  ;;  %v2927_v31 = vcombine.low %v2904_v22, %v2919_v24 }
 0x38c   : > { %v2928_v32 = vcombine.high %v2904_v22, %v2919_v24  ;;  %v3033_v39 = vcombine.low %v2865_v25, %v2872_v26  ;;  %v9686_v40 = vcombine.high %v2865_v25, %v2872_v26 }
 0x38d   : > { %v3049_v33 = vcombine.low %v2881_v27, %v2888_v28  ;;  %v9687_v34 = vcombine.high %v2881_v27, %v2888_v28  ;;  %v2935_v35 = vrot.slane %v2927_v31, %v11387_v13  ;;  %v2943_v37 = vcombine.low %v2911_v29, %v2926_v30 }
 0x38e   : > { %v2942_v36 = vrot.slane %v2928_v32, %v11387_v13  ;;  %v2944_v38 = vcombine.high %v2911_v29, %v2926_v30  ;;  %v3040_v53 = vrot.slane %v3033_v39, %v11380_v4  ;;  %v3048_v55 = vrot.slane %v9686_v40, %v11380_v4 }
 0x38f   : > { %v2951_v41 = vrot.slane %v2943_v37, %v11387_v13  ;;  %v3056_v45 = vrot.slane %v3049_v33, %v11380_v4  ;;  %v3064_v47 = vrot.slane %v9687_v34, %v11380_v4  ;;  %v2815_v31 = vadd.f32 %v11367_v57, %v11373_v60 }
 0x390   : > { %v2958_v42 = vrot.slane %v2944_v38, %v11387_v13  ;;  %v3083_v43 = vcombine.low %v2935_v35, %v2942_v36  ;;  %v9688_v44 = vcombine.high %v2935_v35, %v2942_v36  ;;  %v3065_v0 = vcombine.low %v3040_v53, %v3048_v55 }
 0x391   : > { %v3073_v62 = vcombine.low %v3056_v45, %v3064_v47  ;;  %v3699_v34 = vcombine.high %v11362_v54, %v10806_v46  ;;  %v3629_v36 = vcombine.high %v11356_v49, %v10806_v46  ;;  %v2967_v39 = vcombine.high %v2815_v31, %v10806_v46 }
 0x392   : > { %v3090_v48 = vrot.slane %v3083_v43, %v11380_v4  ;;  %v3098_v50 = vrot.slane %v9688_v44, %v11380_v4  ;;  %v3099_v51 = vcombine.low %v2951_v41, %v2958_v42  ;;  %v9689_v52 = vcombine.high %v2951_v41, %v2958_v42 }
 0x393   : > { %v3080_v6 = vrot.slane %v3073_v62, %v11387_v13  ;;  %v3072_v11 = vrot.slane %v3065_v0, %v11387_v13  ;;  %v3713_v38 = vrot.slane %v3699_v34, %v11380_v4  ;;  %v3636_v42 = vrot.slane %v11356_v49, %v11380_v4 }
 0x394   : > { %v3106_v56 = vrot.slane %v3099_v51, %v11380_v4  ;;  %v3114_v58 = vrot.slane %v9689_v52, %v11380_v4  ;;  %v3115_v61 = vcombine.low %v3090_v48, %v3098_v50  ;;  %v3643_v43 = vrot.slane %v3629_v36, %v11380_v4 }
 0x395   : > { %v3081_v12 = vcombine.low %v3072_v11, %v3080_v6  ;;  %v3082_v14 = vcombine.high %v3072_v11, %v3080_v6  ;;  %v3706_v44 = vrot.slane %v11362_v54, %v11380_v4  ;;  %v2974_v47 = vrot.slane %v2815_v31, %v11380_v4 }
 0x396   : > { %v3123_v63 = vcombine.low %v3106_v56, %v3114_v58  ;;  %v3122_v3 = vrot.slane %v3115_v61, %v11387_v13  ;;  %v2981_v48 = vrot.slane %v2967_v39, %v11380_v4 }
 0x398   : > { %v3130_v5 = vrot.slane %v3123_v63, %v11387_v13 }
 0x39a   : > { %v3131_v9 = vcombine.low %v3122_v3, %v3130_v5  ;;  %v3132_v10 = vcombine.high %v3122_v3, %v3130_v5 }
 0x39c   : > { %10007 = vmatpush3.xpose.msk.msra.mxu1 %vm3183_vm5, %v3131_v9  ;;  %10012 = vmatpush3.xpose.msk.msra.mxu0 %vm3183_vm5, %v3132_v10 }
 0x39d   : > { %10016 = vmatprep.subr.mxu1 %v10806_v46  ;;  %10021 = vmatprep.subr.mxu0 %v10806_v46 }
 0x39f   : > { %10009 = vmatmul.mubr.msk.f32.vlgmr.msra.gmra.mrb[0].mxu1 %vm3183_vm5, %v3081_v12  ;;  %10014 = vmatmul.mubr.msk.f32.vlgmr.msra.gmra.mrb[6].mxu0 %vm3183_vm5, %v3082_v14 }
 0x3a0   : > { %10018 = vmatprep.mubr.msk.f32.mxu1 %vm10808_vm4, %v10806_v46  ;;  %10023 = vmatprep.mubr.msk.f32.mxu0 %vm10808_vm4, %v10806_v46 }
 0x472   : > { %v3256_v15 = vpop.f32.mrb[0].mxu1  ;;  %v3332_v16 = vpop.f32.mrb[6].mxu0 }
 0x473   : > { %v10010_v17 = vpop.f32.mrb[1].mxu1  ;;  %v10015_v18 = vpop.f32.mrb[7].mxu0  ;;  %v3339_v19 = vsel %vm3183_vm5, %v3332_v16, -inf  ;;  %v3336_v20 = vsel %vm3183_vm5, %v3256_v15, -inf }
 0x474   : > { %3340 = vmax.xlane.f32.xlu0 %v3339_v19  ;;  %3337 = vmax.xlane.f32.xlu1 %v3336_v20 }
 0x485   : > { %3696 = vrot.lane.b32.xlu1 %v11362_v54, %s10807_s15 }
 0x501   : > { %v3341_v21 = vpop.xlane.xlu0 %3340  ;;  %v3338_v22 = vpop.xlane.xlu1 %3337 }
 0x502   : > { %v3343_v23 = vsub.f32 %v3332_v16, %v3341_v21  ;;  %v3342_v24 = vsub.f32 %v3256_v15, %v3338_v22 }
 0x504   : > { %v3346_v25 = vmul.f32 1.442695, %v3343_v23  ;;  %v3344_v26 = vmul.f32 1.442695, %v3342_v24 }
 0x505   : > { %v3697_v32 = vpop.permute.xlu1 %3696 }
 0x506   : > { %10564 = vpow2.f32 %v3346_v25  ;;  %v3714_v33 = vcombine.high %v3697_v32, %v10806_v46  ;;  %v3721_v57 = vrot.slane %v3697_v32, %v11380_v4 }
 0x507   : > { %10566 = vpow2.f32 %v3344_v26 }
 0x508   : > { %v3728_v35 = vrot.slane %v3714_v33, %v11380_v4  ;;  %v3729_v53 = vcombine.low %v3706_v44, %v3721_v57  ;;  %v3730_v55 = vcombine.high %v3706_v44, %v3721_v57 }
 0x50a   : > { %v3745_v60 = vcombine.low %v3713_v38, %v3728_v35  ;;  %v3746_v41 = vcombine.high %v3713_v38, %v3728_v35  ;;  %v3737_v15 = vrot.slane %v3729_v53, %v11387_v13  ;;  %v3744_v16 = vrot.slane %v3730_v55, %v11387_v13 }
 0x50c   : > { %v3753_v58 = vrot.slane %v3745_v60, %v11387_v13  ;;  %v3760_v54 = vrot.slane %v3746_v41, %v11387_v13  ;;  %v3885_v32 = vcombine.low %v3737_v15, %v3744_v16  ;;  %v9702_v33 = vcombine.high %v3737_v15, %v3744_v16 }
 0x50e   : > { %v3901_v22 = vcombine.low %v3753_v58, %v3760_v54  ;;  %v9703_v23 = vcombine.high %v3753_v58, %v3760_v54 }
 0x510   : > { %v11431_v27 = vpop.eup %10564  ;;  %v3916_v57 = vrot.slane %v9703_v23, %v11380_v4 }
 0x511   : > { %v11433_v28 = vpop.eup %10566  ;;  %v3351_v29 = vsel %vm3183_vm5, %v11431_v27, 0.0 }
 0x512   : > { %3352 = vadd.xlane.f32.xlu1 %v3351_v29  ;;  %v3348_v30 = vsel %vm3183_vm5, %v11433_v28, 0.0 }
 0x513   : > { %3349 = vadd.xlane.f32.xlu0 %v3348_v30 }
 0x523   : > { %3626 = vrot.lane.b32.xlu1 %v11356_v49, %s10807_s15 }
 0x529   : > { %2964 = vrot.lane.b32.xlu0 %v2815_v31, %s10807_s15 }
 0x59f   : > { %v3353_v37 = vpop.xlane.xlu1 %3352 }
 0x5a0   : > { %v3350_v40 = vpop.xlane.xlu0 %3349  ;;  %10568 = vrcp.f32 %v3353_v37 }
 0x5a1   : > { %10570 = vrcp.f32 %v3350_v40  ;;  %v3908_v40 = vrot.slane %v3901_v22, %v11380_v4 }
 0x5a3   : > { %v3627_v45 = vpop.permute.xlu1 %3626  ;;  %v3925_v53 = vcombine.low %v3908_v40, %v3916_v57 }
 0x5a4   : > { %v2965_v50 = vpop.permute.xlu0 %2964  ;;  %v3644_v51 = vcombine.high %v3627_v45, %v10806_v46  ;;  %v3651_v52 = vrot.slane %v3627_v45, %v11380_v4  ;;  %v3892_v45 = vrot.slane %v3885_v32, %v11380_v4 }
 0x5a5   : > { %v2982_v56 = vcombine.high %v2965_v50, %v10806_v46  ;;  %v2989_v49 = vrot.slane %v2965_v50, %v11380_v4 }
 0x5a6   : > { %v3658_v61 = vrot.slane %v3644_v51, %v11380_v4  ;;  %v3659_v3 = vcombine.low %v3636_v42, %v3651_v52  ;;  %v3660_v5 = vcombine.high %v3636_v42, %v3651_v52 }
 0x5a7   : > { %v2996_v62 = vrot.slane %v2982_v56, %v11380_v4  ;;  %v2997_v63 = vcombine.low %v2974_v47, %v2989_v49  ;;  %v2998_v0 = vcombine.high %v2974_v47, %v2989_v49  ;;  %v3900_v47 = vrot.slane %v9702_v33, %v11380_v4 }
 0x5a8   : > { %v3675_v6 = vcombine.low %v3643_v43, %v3658_v61  ;;  %v3676_v9 = vcombine.high %v3643_v43, %v3658_v61  ;;  %v3667_v25 = vrot.slane %v3659_v3, %v11387_v13  ;;  %v3674_v31 = vrot.slane %v3660_v5, %v11387_v13 }
 0x5a9   : > { %v3005_v10 = vrot.slane %v2997_v63, %v11387_v13  ;;  %v3012_v11 = vrot.slane %v2998_v0, %v11387_v13  ;;  %v3013_v12 = vcombine.low %v2981_v48, %v2996_v62  ;;  %v3014_v14 = vcombine.high %v2981_v48, %v2996_v62 }
 0x5aa   : > { %v3683_v17 = vrot.slane %v3675_v6, %v11387_v13  ;;  %v3690_v21 = vrot.slane %v3676_v9, %v11387_v13  ;;  %v10569_v39 = vpop.eup %10568  ;;  %v3835_v42 = vcombine.low %v3667_v25, %v3674_v31  ;;  %v9700_v43 = vcombine.high %v3667_v25, %v3674_v31 }
 0x5ab   : > { %v3021_v18 = vrot.slane %v3013_v12, %v11387_v13  ;;  %v3028_v19 = vrot.slane %v3014_v14, %v11387_v13  ;;  %v3133_v20 = vcombine.low %v3005_v10, %v3012_v11  ;;  %v9690_v24 = vcombine.high %v3005_v10, %v3012_v11  ;;  %v10571_v41 = vpop.eup %10570 }
 0x5ac   : > { %v3851_v37 = vcombine.low %v3683_v17, %v3690_v21  ;;  %v9701_v38 = vcombine.high %v3683_v17, %v3690_v21  ;;  %v3842_v55 = vrot.slane %v3835_v42, %v11380_v4  ;;  %v3850_v56 = vrot.slane %v9700_v43, %v11380_v4 }
 0x5ad   : > { %v3140_v26 = vrot.slane %v3133_v20, %v11380_v4  ;;  %v3149_v29 = vcombine.low %v3021_v18, %v3028_v19  ;;  %v9691_v30 = vcombine.high %v3021_v18, %v3028_v19  ;;  %v3148_v34 = vrot.slane %v9690_v24, %v11380_v4 }
 0x5ae   : > { %v3858_v48 = vrot.slane %v3851_v37, %v11380_v4  ;;  %v3866_v50 = vrot.slane %v9701_v38, %v11380_v4  ;;  %v3917_v54 = vcombine.low %v3892_v45, %v3900_v47  ;;  %v3355_v61 = vmul.f32 %v10571_v41, %v11433_v28 }
 0x5af   : > { %v3156_v35 = vrot.slane %v3149_v29, %v11380_v4  ;;  %v3164_v36 = vrot.slane %v9691_v30, %v11380_v4  ;;  %v3165_v60 = vcombine.low %v3140_v26, %v3148_v34  ;;  %v3357_v62 = vmul.f32 %v10569_v39, %v11431_v27 }
 0x5b0   : > { %v3875_v63 = vcombine.low %v3858_v48, %v3866_v50  ;;  %v3932_v0 = vrot.slane %v3925_v53, %v11387_v13  ;;  %v3867_v3 = vcombine.low %v3842_v55, %v3850_v56  ;;  %v3924_v5 = vrot.slane %v3917_v54, %v11387_v13 }
 0x5b1   : > { %v3173_v44 = vcombine.low %v3156_v35, %v3164_v36  ;;  %v3172_v51 = vrot.slane %v3165_v60, %v11387_v13 }
 0x5b2   : > { %v3882_v27 = vrot.slane %v3875_v63, %v11387_v13  ;;  %v3933_v28 = vcombine.low %v3924_v5, %v3932_v0  ;;  %v3934_v6 = vcombine.high %v3924_v5, %v3932_v0  ;;  %v3874_v9 = vrot.slane %v3867_v3, %v11387_v13 }
 0x5b3   : > { %v3180_v52 = vrot.slane %v3173_v44, %v11387_v13  ;;  %v3776_v63 = vrot.slane %v11371_v59, %v11380_v4 }
 0x5b4   : > { %v3883_v10 = vcombine.low %v3874_v9, %v3882_v27  ;;  %v3884_v11 = vcombine.high %v3874_v9, %v3882_v27 }
 0x5b5   : > { %v3181_v49 = vcombine.low %v3172_v51, %v3180_v52  ;;  %v3182_v58 = vcombine.high %v3172_v51, %v3180_v52 }
 0x5b7   : > { %10017 = vmatpush3.msra.mxu1 %v3181_v49  ;;  %10022 = vmatpush3.msra.mxu0 %v3182_v58  ;;  %v3769_v58 = vcombine.high %v11371_v59, %v10806_v46 }
 0x5b8   : > { %10019 = vmatmul.mubr.msk.f32.vlgmr.msra.gmra.mrb[2].mxu1 %vm3183_vm5, %v3355_v61  ;;  %10024 = vmatmul.mubr.msk.f32.vlgmr.msra.gmra.mrb[8].mxu0 %vm3183_vm5, %v3357_v62 }
 0x5b9   : > { %10026 = vmatprep.subr.mxu1 %v10806_v46  ;;  %10031 = vmatprep.subr.mxu0 %v10806_v46  ;;  %v3783_v5 = vrot.slane %v3769_v58, %v11380_v4 }
 0x5ba   : > { %10028 = vmatprep.mubr.msk.f32.mxu1 %vm10808_vm4, %v10806_v46  ;;  %10033 = vmatprep.mubr.msk.f32.mxu0 %vm10808_vm4, %v10806_v46 }
 0x5be   : > { %10027 = vmatpush3.xpose.msk.msra.mxu1 %vm3183_vm5, %v3933_v28  ;;  %10032 = vmatpush3.xpose.msk.msra.mxu0 %vm3183_vm5, %v3934_v6 }
 0x5bf   : > { %10036 = vmatprep.subr.mxu1 %v10806_v46  ;;  %10041 = vmatprep.subr.mxu0 %v10806_v46 }
 0x5c1   : > { %10029 = vmatmul.mubr.msk.f32.vlgmr.msra.gmra.mrb[4].mxu1 %vm3183_vm5, %v3883_v10  ;;  %10034 = vmatmul.mubr.msk.f32.vlgmr.msra.gmra.mrb[10].mxu0 %vm3183_vm5, %v3884_v11 }
 0x5c2   : > { %10038 = vmatprep.mubr.msk.f32.mxu1 %vm10808_vm4, %v10806_v46  ;;  %10043 = vmatprep.mubr.msk.f32.mxu0 %vm10808_vm4, %v10806_v46 }
 0x68b   : > { %v3427_v12 = vpop.f32.mrb[2].mxu1  ;;  %v3500_v14 = vpop.f32.mrb[8].mxu0 }
 0x68c   : > { %v3504_v15 = vcombine.high %v3427_v12, %v10806_v46  ;;  %v3511_v16 = vrot.slane %v3427_v12, %v11380_v4  ;;  %v3519_v17 = vcombine.high %v3500_v14, %v10806_v46  ;;  %v3526_v18 = vrot.slane %v3500_v14, %v11380_v4  ;;  %v10020_v19 = vpop.f32.mrb[3].mxu1  ;;  %v10025_v20 = vpop.f32.mrb[9].mxu0 }
 0x68e   : > { %v3518_v21 = vrot.slane %v3504_v15, %v11380_v4  ;;  %v3533_v22 = vrot.slane %v3519_v17, %v11380_v4  ;;  %v3534_v23 = vcombine.low %v3511_v16, %v3526_v18  ;;  %v3535_v24 = vcombine.high %v3511_v16, %v3526_v18 }
 0x690   : > { %v3542_v25 = vrot.slane %v3534_v23, %v11387_v13  ;;  %v3549_v26 = vrot.slane %v3535_v24, %v11387_v13  ;;  %v3550_v29 = vcombine.low %v3518_v21, %v3533_v22  ;;  %v3551_v30 = vcombine.high %v3518_v21, %v3533_v22 }
 0x692   : > { %v3558_v31 = vrot.slane %v3550_v29, %v11387_v13  ;;  %v3565_v32 = vrot.slane %v3551_v30, %v11387_v13  ;;  %v3570_v33 = vcombine.low %v3542_v25, %v3549_v26  ;;  %v9698_v34 = vcombine.high %v3542_v25, %v3549_v26 }
 0x694   : > { %v3577_v35 = vrot.slane %v3570_v33, %v11380_v4  ;;  %v3585_v36 = vrot.slane %v9698_v34, %v11380_v4  ;;  %v3586_v37 = vcombine.low %v3558_v31, %v3565_v32  ;;  %v9699_v38 = vcombine.high %v3558_v31, %v3565_v32  ;;  %v4057_v39 = vpop.f32.mrb[4].mxu1  ;;  %v4133_v40 = vpop.f32.mrb[10].mxu0 }
 0x695   : > { %v10030_v57 = vpop.f32.mrb[5].mxu1  ;;  %v10035_v60 = vpop.f32.mrb[11].mxu0  ;;  %v4140_v41 = vsel %vm3183_vm5, %v4133_v40, -inf  ;;  %v4137_v42 = vsel %vm3183_vm5, %v4057_v39, -inf }
 0x696   : > { %4141 = vmax.xlane.f32.xlu0 %v4140_v41  ;;  %4138 = vmax.xlane.f32.xlu1 %v4137_v42  ;;  %v3593_v43 = vrot.slane %v3586_v37, %v11380_v4  ;;  %v3601_v44 = vrot.slane %v9699_v38, %v11380_v4  ;;  %v3602_v45 = vcombine.low %v3577_v35, %v3585_v36  ;;  %v2511_v41 = vld [vmem:[%s12430_s29] sm:$0xff]  ;;  %v2512_v42 = vld [vmem:[%s12430_s29 + $0x8] sm:$0xff] }
 0x698   : > { %v3610_v47 = vcombine.low %v3593_v43, %v3601_v44  ;;  %v3609_v48 = vrot.slane %v3602_v45, %v11387_v13  ;;  %v10300_v43 = vpack.c.bf16 %v2512_v42, %v2511_v41  ;;  %v2522_v42 = vld [vmem:[%s12434_s6 + $0x18] sm:$0xff] }
 0x69a   : > { %v3617_v50 = vrot.slane %v3610_v47, %v11387_v13 }
 0x69c   : > { %v3619_v51 = vcombine.high %v3609_v48, %v3617_v50  ;;  %v3618_v52 = vcombine.low %v3609_v48, %v3617_v50 }
 0x6a7   : > { %3766 = vrot.lane.b32.xlu1 %v11371_v59, %s10807_s15  ;;  %s12440_s15 = sld [smem:[#allocation27_spill]] }
 0x6ad   : > { %s12442_s29 = scalar_lea.vmem %s12440_s15, %s12419_s20 }
 0x723   : > { %v4142_v53 = vpop.xlane.xlu0 %4141  ;;  %v4139_v55 = vpop.xlane.xlu1 %4138 }
 0x724   : > { %v4144_v56 = vsub.f32 %v4133_v40, %v4142_v53  ;;  %v4143_v49 = vsub.f32 %v4057_v39, %v4139_v55 }
 0x726   : > { %v4145_v54 = vmul.f32 1.442695, %v4143_v49  ;;  %v4147_v61 = vmul.f32 1.442695, %v4144_v56 }
 0x727   : > { %v3767_v62 = vpop.permute.xlu1 %3766 }
 0x728   : > { %v3784_v0 = vcombine.high %v3767_v62, %v10806_v46  ;;  %v3791_v3 = vrot.slane %v3767_v62, %v11380_v4  ;;  %10572 = vpow2.f32 %v4145_v54 }
 0x729   : > { %10574 = vpow2.f32 %v4147_v61 }
 0x72a   : > { %v3798_v27 = vrot.slane %v3784_v0, %v11380_v4  ;;  %v3799_v28 = vcombine.low %v3776_v63, %v3791_v3  ;;  %v3800_v6 = vcombine.high %v3776_v63, %v3791_v3 }
 0x72c   : > { %v3807_v9 = vrot.slane %v3799_v28, %v11387_v13  ;;  %v3814_v10 = vrot.slane %v3800_v6, %v11387_v13  ;;  %v3815_v11 = vcombine.low %v3783_v5, %v3798_v27  ;;  %v3816_v12 = vcombine.high %v3783_v5, %v3798_v27 }
 0x72e   : > { %v3823_v59 = vrot.slane %v3815_v11, %v11387_v13  ;;  %v3830_v14 = vrot.slane %v3816_v12, %v11387_v13  ;;  %v3935_v15 = vcombine.low %v3807_v9, %v3814_v10  ;;  %v9704_v16 = vcombine.high %v3807_v9, %v3814_v10 }
 0x730   : > { %v3942_v17 = vrot.slane %v3935_v15, %v11380_v4  ;;  %v3950_v18 = vrot.slane %v9704_v16, %v11380_v4  ;;  %v3951_v19 = vcombine.low %v3823_v59, %v3830_v14  ;;  %v9705_v20 = vcombine.high %v3823_v59, %v3830_v14 }
 0x732   : > { %v3958_v21 = vrot.slane %v3951_v19, %v11380_v4  ;;  %v3966_v22 = vrot.slane %v9705_v20, %v11380_v4  ;;  %v3967_v23 = vcombine.low %v3942_v17, %v3950_v18  ;;  %v10573_v24 = vpop.eup %10572  ;;  %v9716_v20 = vld [vmem:[%s12432_s10] ss:$0 sm:$0xff] }
 0x733   : > { %v4149_v25 = vsel %vm3183_vm5, %v10573_v24, 0.0  ;;  %v10575_v29 = vpop.eup %10574 }
 0x734   : > { %v3975_v26 = vcombine.low %v3958_v21, %v3966_v22  ;;  %4150 = vadd.xlane.f32.xlu0 %v4149_v25  ;;  %v3974_v30 = vrot.slane %v3967_v23, %v11387_v13  ;;  %v4152_v32 = vsel %vm3183_vm5, %v10575_v29, 0.0 }
 0x736   : > { %v3982_v31 = vrot.slane %v3975_v26, %v11387_v13 }
 0x738   : > { %v3983_v33 = vcombine.low %v3974_v30, %v3982_v31  ;;  %v3984_v34 = vcombine.high %v3974_v30, %v3982_v31  ;;  %4153 = vadd.xlane.f32.xlu0 %v4152_v32 }
 0x73a   : > { %10037 = vmatpush3.msra.mxu1 %v3983_v33  ;;  %10042 = vmatpush3.msra.mxu0 %v3984_v34 }
 0x73b   : > { %10301 = vmatprep.subr.bf16.mxu1 %v10300_v43 }
 0x74e   : > { %3621 = vrot.lane.b32.xlu0 %v3619_v51, %s10811_s18 }
 0x7c1   : > { %v4151_v35 = vpop.xlane.xlu0 %4150 }
 0x7c2   : > { %10576 = vrcp.f32 %v4151_v35 }
 0x7c5   : > { %v4154_v36 = vpop.xlane.xlu0 %4153 }
 0x7c6   : > { %10578 = vrcp.f32 %v4154_v36 }
 0x7c9   : > { %v3622_v38 = vpop.permute.xlu0 %3621 }
 0x7ca   : > { %v3624_v40 = vsel %vm3183_vm5, %v3618_v52, %v3622_v38  ;;  %v2517_v38 = vld [vmem:[%s12433_s27 + $0x8] sm:$0xff] }
 0x7cc   : > { %v10577_v37 = vpop.eup %10576 }
 0x7cd   : > { %v4156_v39 = vmul.f32 %v10577_v37, %v10573_v24  ;;  %v2516_v37 = vld [vmem:[%s12433_s27] sm:$0xff] }
 0x7cf   : > { %10039 = vmatmul.mubr.msk.f32.vlgmr.msra.gmra.mrb[6].mxu1 %vm3183_vm5, %v4156_v39  ;;  %v10304_v39 = vpack.c.bf16 %v2517_v38, %v2516_v37 }
 0x7d0   : > { %v10579_v57 = vpop.eup %10578  ;;  %10050 = vmatprep.mubr.msk.f32.mxu1 %vm2530_vm3, %v3624_v40  ;;  %10303 = vmatpush3.bf16.msra.mxu1 %v10300_v43  ;;  %v2519_v40 = vld [vmem:[%s12434_s6] sm:$0xff] }
 0x7d1   : > { %v4158_v60 = vmul.f32 %v10579_v57, %v10575_v29  ;;  %10305 = vmatprep.subr.bf16.mxu0 %v10304_v39  ;;  %v2520_v57 = vld [vmem:[%s12434_s6 + $0x8] sm:$0xff] }
 0x7d2   : > { %v10308_v41 = vpack.c.bf16 %v2520_v57, %v2519_v40 }
 0x7d3   : > { %10044 = vmatmul.mubr.msk.f32.vlgmr.msra.gmra.mrb[12].mxu0 %vm3183_vm5, %v4158_v60  ;;  %v2521_v60 = vld [vmem:[%s12434_s6 + $0x10] sm:$0xff] }
 0x7d4   : > { %10307 = vmatpush3.bf16.msra.mxu0 %v10304_v39  ;;  %v10312_v43 = vpack.c.bf16 %v2522_v42, %v2521_v60  ;;  %10309 = vmatprep.subr.bf16.mxu1 %v10308_v41 }
 0x8a2   : > { %v4228_v44 = vpop.f32.mrb[6].mxu1 }
 0x8a3   : > { %v10040_v45 = vpop.f32.mrb[7].mxu1  ;;  %v4305_v47 = vcombine.high %v4228_v44, %v10806_v46  ;;  %v4312_v50 = vrot.slane %v4228_v44, %v11380_v4  ;;  %v2523_v44 = vld [vmem:[%s12434_s6 + $0x20] sm:$0xff] }
 0x8a4   : > { %v2524_v45 = vld [vmem:[%s12434_s6 + $0x28] sm:$0xff] }
 0x8a5   : > { %v4319_v55 = vrot.slane %v4305_v47, %v11380_v4  ;;  %v10316_v47 = vpack.c.bf16 %v2524_v45, %v2523_v44 }
 0x8a6   : > { %v4301_v48 = vpop.f32.mrb[12].mxu0 }
 0x8a7   : > { %v4320_v51 = vcombine.high %v4301_v48, %v10806_v46  ;;  %v4327_v52 = vrot.slane %v4301_v48, %v11380_v4  ;;  %v10045_v53 = vpop.f32.mrb[13].mxu0 }
 0x8a9   : > { %v4334_v56 = vrot.slane %v4320_v51, %v11380_v4  ;;  %v4335_v49 = vcombine.low %v4312_v50, %v4327_v52  ;;  %v4336_v58 = vcombine.high %v4312_v50, %v4327_v52 }
 0x8ab   : > { %v4343_v54 = vrot.slane %v4335_v49, %v11387_v13  ;;  %v4350_v61 = vrot.slane %v4336_v58, %v11387_v13  ;;  %v4351_v62 = vcombine.low %v4319_v55, %v4334_v56  ;;  %v4352_v63 = vcombine.high %v4319_v55, %v4334_v56  ;;  %v9717_v49 = vld [vmem:[%s12437_s26] ss:$0 sm:$0xff] }
 0x8ad   : > { %v4359_v0 = vrot.slane %v4351_v62, %v11387_v13  ;;  %v4366_v3 = vrot.slane %v4352_v63, %v11387_v13  ;;  %v4371_v46 = vcombine.low %v4343_v54, %v4350_v61  ;;  %v9712_v5 = vcombine.high %v4343_v54, %v4350_v61  ;;  %v9718_v62 = vld [vmem:[%s12439_s0] ss:$0 sm:$0xff] }
 0x8af   : > { %v4378_v27 = vrot.slane %v4371_v46, %v11380_v4  ;;  %v4386_v28 = vrot.slane %v9712_v5, %v11380_v4  ;;  %v4387_v6 = vcombine.low %v4359_v0, %v4366_v3  ;;  %v9713_v9 = vcombine.high %v4359_v0, %v4366_v3  ;;  %v2525_v5 = vld [vmem:[%s12434_s6 + $0x30] sm:$0xff] }
 0x8b1   : > { %v4394_v10 = vrot.slane %v4387_v6, %v11380_v4  ;;  %v4402_v11 = vrot.slane %v9713_v9, %v11380_v4  ;;  %v4403_v12 = vcombine.low %v4378_v27, %v4386_v28  ;;  %v2526_v27 = vld [vmem:[%s12434_s6 + $0x38] sm:$0xff]  ;;  %v9719_v6 = vld [vmem:[%s12441_s21] ss:$0 sm:$0xff] }
 0x8b2   : > { %v10320_v28 = vpack.c.bf16 %v2526_v27, %v2525_v5 }
 0x8b3   : > { %v4411_v59 = vcombine.low %v4394_v10, %v4402_v11  ;;  %v4410_v14 = vrot.slane %v4403_v12, %v11387_v13 }
 0x8b5   : > { %v4418_v15 = vrot.slane %v4411_v59, %v11387_v13 }
 0x8b7   : > { %v4420_v16 = vcombine.high %v4410_v14, %v4418_v15  ;;  %v4419_v17 = vcombine.low %v4410_v14, %v4418_v15  ;;  %v9724_v15 = vld [vmem:[%s12442_s29] ss:$0 sm:$0xff] }
 0x8b9   : > { %4422 = vrot.lane.b32.xlu1 %v4420_v16, %s10811_s18 }
 0x92b   : > { %v4423_v18 = vpop.permute.xlu1 %4422 }
 0x92c   : > { %v4425_v19 = vsel %vm3183_vm5, %v4419_v17, %v4423_v18 }
 0x92d   : > { %10051 = vmatmul.mubr.msk.f32.vlgmr.msra.gmra.mrb[8].mxu1 %vm2530_vm3, %v4425_v19 }
 0x92e   : > { %10311 = vmatpush3.bf16.msra.mxu1 %v10308_v41 }
 0x92f   : > { %10313 = vmatprep.subr.bf16.mxu1 %v10312_v43 }
 0x932   : > { %10315 = vmatpush3.bf16.msra.mxu1 %v10312_v43 }
 0x933   : > { %10317 = vmatprep.subr.bf16.mxu1 %v10316_v47 }
 0x936   : > { %10319 = vmatpush3.bf16.msra.mxu1 %v10316_v47 }
 0x937   : > { %10321 = vmatprep.subr.bf16.mxu1 %v10320_v28 }
 0x93a   : > { %10323 = vmatpush3.bf16.msra.mxu1 %v10320_v28 }
 0xa00   : > { %v10052_v21 = vpop.f32.mrb[8].mxu1 }
 0xa01   : > { %v4508_v4 = vadd.f32 %v10052_v21, %v11323_v8  ;;  %v4498_v22 = vpop.f32.mrb[9].mxu1 }
 0xa02   : > { %v4507_v23 = vadd.f32 %v4498_v22, %v11321_v7 }
 0xa03   : > { %v11587_v24 = vadd.f32 %v9716_v20, %v4508_v4 }
 0xa04   : > { %v11589_v13 = vadd.f32 %v9716_v20, %v4507_v23 }
 0xa05   : > { %v4520_v25 = vsel %vm2530_vm3, %v11587_v24, 0.0 }
 0xa06   : > { %4521 = vadd.xlane.f32.xlu0 %v4520_v25  ;;  %v4517_v26 = vsel %vm2530_vm3, %v11589_v13, 0.0 }
 0xa07   : > { %4518 = vadd.xlane.f32.xlu1 %v4517_v26 }
 0xa93   : > { %v4522_v29 = vpop.xlane.xlu0 %4521 }
 0xa94   : > { %v4524_v30 = vmul.f32 0.0625, %v4522_v29  ;;  %v4519_v8 = vpop.xlane.xlu1 %4518 }
 0xa95   : > { %v4523_v7 = vmul.f32 0.0625, %v4519_v8 }
 0xa96   : > { %v4526_v31 = vsub.f32 %v11587_v24, %v4524_v30 }
 0xa97   : > { %v4525_v32 = vsub.f32 %v11589_v13, %v4523_v7 }
 0xa98   : > { %v4528_v33 = vmul.f32 %v4526_v31, %v4526_v31 }
 0xa99   : > { %v4527_v34 = vmul.f32 %v4525_v32, %v4525_v32 }
 0xa9a   : > { %v4532_v35 = vsel %vm2530_vm3, %v4528_v33, 0.0 }
 0xa9b   : > { %4533 = vadd.xlane.f32.xlu1 %v4532_v35  ;;  %v4529_v36 = vsel %vm2530_vm3, %v4527_v34, 0.0 }
 0xa9c   : > { %4530 = vadd.xlane.f32.xlu0 %v4529_v36 }
 0xb28   : > { %v4534_v48 = vpop.xlane.xlu1 %4533 }
 0xb29   : > { %v4536_v50 = vmul.f32 0.0625, %v4534_v48  ;;  %v4531_v51 = vpop.xlane.xlu0 %4530 }
 0xb2a   : > { %v4535_v52 = vmul.f32 0.0625, %v4531_v51 }
 0xb2b   : > { %v4538_v53 = vadd.f32 1e-05, %v4536_v50 }
 0xb2c   : > { %v4537_v55 = vadd.f32 1e-05, %v4535_v52 }
 0xb2d   : > { %10580 = vrsqrt.f32 %v4538_v53 }
 0xb2e   : > { %10582 = vrsqrt.f32 %v4537_v55 }
 0xb37   : > { %v10581_v56 = vpop.eup %10580 }
 0xb38   : > { %v10583_v58 = vpop.eup %10582  ;;  %v4542_v54 = vmul.f32 %v10581_v56, %v4526_v31 }
 0xb39   : > { %v4541_v61 = vmul.f32 %v10583_v58, %v4525_v32 }
 0xb3a   : > { %v4550_v63 = vmul.f32 %v9717_v49, %v4542_v54 }
 0xb3b   : > { %v4549_v0 = vmul.f32 %v9717_v49, %v4541_v61 }
 0xb3c   : > { %v4558_v46 = vadd.f32 %v9718_v62, %v4550_v63 }
 0xb3d   : > { %v4557_v3 = vadd.f32 %v9718_v62, %v4549_v0 }
 0xb3f   : > { %10057 = vmatprep.mubr.msk.f32.mxu0 %vm2530_vm3, %v4557_v3 }
 0xb40   : > { %10058 = vmatmul.mubr.msk.f32.vlgmr.msra.gmra.mrb[14].mxu0 %vm2530_vm3, %v4558_v46 }
 0xc13   : > { %v10059_v9 = vpop.f32.mrb[14].mxu0 }
 0xc14   : > { %v4643_v10 = vadd.f32 %v10059_v9, %v9719_v6  ;;  %v4637_v11 = vpop.f32.mrb[15].mxu0 }
 0xc15   : > { %v4638_v12 = vadd.f32 %v9719_v6, %v4637_v11 }
 0xc16   : > { %v4647_v14 = vmax.f32 %v4643_v10, 0.0 }
 0xc17   : > { %v4646_v59 = vmax.f32 %v4638_v12, 0.0 }
 0xc19   : > { %10076 = vmatprep.mubr.msk.f32.mxu1 %vm4648_vm6, %v4646_v59 }
 0xc1a   : > { %10077 = vmatmul.mubr.msk.f32.vlgmr.msra.gmra.mrb[10].mxu1 %vm4648_vm6, %v4647_v14 }
 0xced   : > { %v10078_v16 = vpop.f32.mrb[10].mxu1 }
 0xcee   : > { %v4731_v17 = vadd.f32 %v10078_v16, %v11587_v24  ;;  %v4721_v18 = vpop.f32.mrb[11].mxu1 }
 0xcef   : > { %v4730_v19 = vadd.f32 %v4721_v18, %v11589_v13 }
 0xcf0   : > { %v4739_v20 = vadd.f32 %v9724_v15, %v4731_v17 }
 0xcf1   : > { %v4738_v21 = vadd.f32 %v9724_v15, %v4730_v19 }
 0xcf2   : > { %4741 = vst.msk [vmem:[#allocation2 + $0x8] sm:$0xff] %vm2530_vm3, %v4739_v20 }
 0xcf3   : > { %4740 = vst.msk [vmem:[#allocation2] sm:$0xff] %vm2530_vm3, %v4738_v21 }
 0xcf4 PF: > { %p4742_p7 = scmp.eq.s32.totalorder %s10744_s23, 1  ;;  %p9725_p12 = scmp.ne.s32.totalorder %s10744_s23, 1 }
 0xcf5   : > { %v11629_v4 = vld [vmem:[#allocation3] sm:$0xff] (!%p9725_p12)  ;;  %vm4810_vm7 = vcmask (!%p9725_p12), 261120   ;;  %v11631_v22 = vld [vmem:[#allocation3 + $0x8] sm:$0xff] (!%p9725_p12)  ;;  %s12443_s20 = sld [smem:[#allocation74_spill]] (!%p9725_p12)  ;;  %s12444_s18 = sld [smem:[#allocation75_spill]] (!%p9725_p12)  ;;  %v10812_v6 = vmov (!%p9725_p12), 0.0  }
 0xcf6   : > { %4745 = sbr.rel (%p9725_p12) target bundleno = 8686 (0x21ee), region = 224  ;;  %v4811_v23 = vsel (!%p9725_p12), %vm4810_vm7, %v11629_v4, 0.0  ;;  %v4814_v24 = vsel (!%p9725_p12), %vm4810_vm7, %v11631_v22, 0.0  ;;  %s12445_s2 = sld [smem:[#allocation28_spill]] (!%p9725_p12)  ;;  %10117 = vmatprep.subr.mxu1 (!%p9725_p12), %v10812_v6  ;;  %vm10814_vm8 = vmmov (!%p9725_p12), 0   ;;  %vm5463_vm9 = vcmask (!%p9725_p12), 64512  }
 0xcf7   : > { %4812 = vadd.xlane.f32.xlu0 (!%p9725_p12), %v4811_v23  ;;  %s12446_s10 = sld [smem:[#allocation29_spill]] (!%p9725_p12)  ;;  %s12447_s27 = sld [smem:[#allocation76_spill]] (!%p9725_p12)  ;;  %10119 = vmatprep.mubr.msk.f32.mxu1 (!%p9725_p12), %vm10814_vm8, %v10812_v6  ;;  %vm6712_vm10 = vcmask (!%p9725_p12), 130048  }
 0xcf8   : > { %s12450_s14 = sld [smem:[#allocation31_spill]] (!%p9725_p12)  ;;  %s12451_s26 = sld [smem:[#allocation33_spill]] (!%p9725_p12) }
 0xcf9   : > { %s12452_s16 = sld [smem:[#allocation35_spill]] (!%p9725_p12)  ;;  %s10813_s15 = smov (!%p9725_p12), 120  }
 0xcfb   : > { %4815 = vadd.xlane.f32.xlu0 (!%p9725_p12), %v4814_v24  ;;  %v4748_v34 = vld [vmem:[%s12443_s20] sm:$0xff] (!%p9725_p12)  ;;  %v4749_v35 = vld [vmem:[%s12443_s20 + $0x8] sm:$0xff] (!%p9725_p12)  ;;  %v4750_v36 = vld [vmem:[%s12443_s20 + $0x10] sm:$0xff] (!%p9725_p12)  ;;  %v10815_v24 = vmov (!%p9725_p12), 1983009808  }
 0xcfc   : > { %v10324_v37 = vpack.c.bf16 (!%p9725_p12), %v4749_v35, %v4748_v34  ;;  %v4751_v38 = vld [vmem:[%s12443_s20 + $0x18] sm:$0xff] (!%p9725_p12)  ;;  %v4753_v40 = vld [vmem:[%s12444_s18] sm:$0xff] (!%p9725_p12)  ;;  %v4754_v57 = vld [vmem:[%s12444_s18 + $0x8] sm:$0xff] (!%p9725_p12)  ;;  %s12448_s6 = scalar_lea.vmem (!%p9725_p12), %s12445_s2, %s12489_s24  ;;  %s10817_s20 = smov (!%p9725_p12), 8  }
 0xcfd   : > { %v10328_v39 = vpack.c.bf16 %v4751_v38, %v4750_v36  ;;  %v10332_v60 = vpack.c.bf16 %v4754_v57, %v4753_v40  ;;  %v9726_v50 = vld [vmem:[%s12448_s6] ss:$0 sm:$0xff]  ;;  %s12449_s11 = scalar_lea.vmem %s12446_s10, %s12489_s24  ;;  %v4755_v58 = vld [vmem:[%s12444_s18 + $0x10] sm:$0xff]  ;;  %v4756_v54 = vld [vmem:[%s12444_s18 + $0x18] sm:$0xff]  ;;  %s12456_s18 = sld [smem:[#allocation77_spill]] }
 0xcfe   : > { %10325 = vmatprep.subr.bf16.mxu0 %v10324_v37  ;;  %v9727_v52 = vld [vmem:[%s12449_s11] ss:$0 sm:$0xff]  ;;  %v10336_v63 = vpack.c.bf16 %v4756_v54, %v4755_v58  ;;  %v4759_v3 = vld [vmem:[%s12447_s27 + $0x8] sm:$0xff]  ;;  %v4760_v5 = vld [vmem:[%s12447_s27 + $0x10] sm:$0xff]  ;;  %s12453_s0 = scalar_lea.vmem %s12450_s14, %s12489_s24  ;;  %s12454_s21 = scalar_lea.vmem %s12451_s26, %s12489_s24 }
 0xcff   : > { %10327 = vmatpush3.bf16.msra.mxu0 %v10324_v37  ;;  %v4758_v0 = vld [vmem:[%s12447_s27] sm:$0xff]  ;;  %v4761_v27 = vld [vmem:[%s12447_s27 + $0x18] sm:$0xff]  ;;  %s12455_s29 = scalar_lea.vmem %s12452_s16, %s12489_s24  ;;  %s12457_s2 = sld [smem:[#allocation37_spill]] }
 0xd00   : > { %10329 = vmatprep.subr.bf16.mxu0 %v10328_v39  ;;  %v10340_v46 = vpack.c.bf16 %v4759_v3, %v4758_v0  ;;  %v10344_v28 = vpack.c.bf16 %v4761_v27, %v4760_v5  ;;  %v9728_v9 = vld [vmem:[%s12453_s0] ss:$0 sm:$0xff]  ;;  %s12460_s27 = sld [smem:[#allocation38_spill]]  ;;  %s12461_s6 = sld [smem:[#allocation39_spill]] }
 0xd01   : > { %v9731_v14 = vld [vmem:[%s12454_s21] ss:$0 sm:$0xff] }
 0xd02   : > { %v11682_v19 = vld [vmem:[%s12455_s29] ss:$0 sm:$0xff] }
 0xd03   : > { %10331 = vmatpush3.bf16.msra.mxu0 %v10328_v39 }
 0xd04   : > { %10333 = vmatprep.subr.bf16.mxu0 %v10332_v60 }
 0xd05   : > { %s12458_s10 = scalar_lea.vmem %s12457_s2, %s12489_s24 }
 0xd84   : > { %v4813_v13 = vpop.xlane.xlu0 %4812 }
 0xd85   : > { %v4818_v25 = vmul.f32 0.03125, %v4813_v13  ;;  %v5109_v13 = vunpack.c.l.s4 %v10815_v24 }
 0xd87   : > { %v4820_v26 = vsub.f32 %v11629_v4, %v4818_v25  ;;  %v5110_v25 = vunpack.c.0.s8 %v5109_v13 }
 0xd88   : > { %v4816_v29 = vpop.xlane.xlu0 %4815 }
 0xd89   : > { %v4819_v30 = vmul.f32 0.03125, %v4816_v29  ;;  %v4822_v8 = vmul.f32 %v4820_v26, %v4820_v26  ;;  %v10816_v29 = vmov 1934713408  }
 0xd8b   : > { %v4821_v7 = vsub.f32 %v11631_v22, %v4819_v30  ;;  %v4824_v31 = vsel %vm4810_vm7, %v4822_v8, 0.0  ;;  %v5140_v30 = vunpack.c.l.s4 %v10816_v29 }
 0xd8c   : > { %4825 = vadd.xlane.f32.xlu1 %v4824_v31 }
 0xd8d   : > { %v4823_v32 = vmul.f32 %v4821_v7, %v4821_v7 }
 0xd8f   : > { %v4827_v33 = vsel %vm4810_vm7, %v4823_v32, 0.0 }
 0xd90   : > { %4828 = vadd.xlane.f32.xlu1 %v4827_v33  ;;  %v5141_v33 = vunpack.c.0.s8 %v5140_v30 }
 0xd92   : > { %v11703_v39 = vsub.s32 %v5141_v33, %v11197_v1 }
 0xe19   : > { %v4826_v41 = vpop.xlane.xlu1 %4825 }
 0xe1a   : > { %v4830_v42 = vmul.f32 0.03125, %v4826_v41 }
 0xe1c   : > { %v4832_v43 = vadd.f32 1e-05, %v4830_v42 }
 0xe1d   : > { %v4829_v44 = vpop.xlane.xlu1 %4828 }
 0xe1e   : > { %10584 = vrsqrt.f32 %v4832_v43  ;;  %v4831_v45 = vmul.f32 0.03125, %v4829_v44 }
 0xe20   : > { %v4833_v47 = vadd.f32 1e-05, %v4831_v45 }
 0xe22   : > { %10586 = vrsqrt.f32 %v4833_v47 }
 0xe28   : > { %v10585_v48 = vpop.eup %10584 }
 0xe29   : > { %v4836_v51 = vmul.f32 %v10585_v48, %v4820_v26 }
 0xe2b   : > { %v4844_v53 = vmul.f32 %v9726_v50, %v4836_v51 }
 0xe2c   : > { %v10587_v55 = vpop.eup %10586 }
 0xe2d   : > { %v4837_v56 = vmul.f32 %v10587_v55, %v4821_v7  ;;  %v4852_v49 = vadd.f32 %v9727_v52, %v4844_v53  ;;  %v11695_v7 = vsub.s32 %v5110_v25, %v11197_v1 }
 0xe2f   : > { %v4845_v61 = vmul.f32 %v9726_v50, %v4837_v56  ;;  %10087 = vmatprep.mubr.msk.f32.mxu0 %vm4810_vm7, %v4852_v49 }
 0xe31   : > { %v4853_v62 = vadd.f32 %v9727_v52, %v4845_v61 }
 0xe33   : > { %10088 = vmatmul.mubr.msk.f32.vlgmr.msra.gmra.mrb[0].mxu0 %vm4810_vm7, %v4853_v62 }
 0xe34   : > { %10335 = vmatpush3.bf16.msra.mxu0 %v10332_v60  ;;  %10098 = vmatprep.mubr.msk.f32.mxu0 %vm4810_vm7, %v4852_v49 }
 0xe35   : > { %10337 = vmatprep.subr.bf16.mxu0 %v10336_v63 }
 0xe38   : > { %10339 = vmatpush3.bf16.msra.mxu0 %v10336_v63 }
 0xe39   : > { %10341 = vmatprep.subr.bf16.mxu0 %v10340_v46 }
 0xe3b   : > { %10099 = vmatmul.mubr.msk.f32.vlgmr.msra.gmra.mrb[2].mxu0 %vm4810_vm7, %v4853_v62 }
 0xe3c   : > { %10343 = vmatpush3.bf16.msra.mxu0 %v10340_v46  ;;  %10109 = vmatprep.mubr.msk.f32.mxu0 %vm4810_vm7, %v4852_v49 }
 0xe3d   : > { %10345 = vmatprep.subr.bf16.mxu0 %v10344_v28 }
 0xe40   : > { %10347 = vmatpush3.bf16.msra.mxu0 %v10344_v28 }
 0xe41   : > { %10112 = vmatprep.subr.mxu0 %v10812_v6 }
 0xe43   : > { %10110 = vmatmul.mubr.msk.f32.vlgmr.msra.gmra.mrb[4].mxu0 %vm4810_vm7, %v4853_v62 }
 0xe44   : > { %10114 = vmatprep.mubr.msk.f32.mxu0 %vm10814_vm8, %v10812_v6 }
 0xf06   : > { %v10089_v10 = vpop.f32.mrb[0].mxu0 }
 0xf07   : > { %v11670_v11 = vadd.f32 %v10089_v10, %v9728_v9  ;;  %v4932_v12 = vpop.f32.mrb[1].mxu0 }
 0xf08   : > { %v4933_v59 = vadd.f32 %v9728_v9, %v4932_v12 }
 0xf0a   : > { %5104 = vrot.lane.b32.xlu1 %v4933_v59, %s10813_s15  ;;  %v5107_v26 = vcombine.high %v4933_v59, %v10812_v6  ;;  %v5114_v36 = vrot.slane %v4933_v59, %v11695_v7 }
 0xf0c   : > { %v5121_v32 = vrot.slane %v5107_v26, %v11695_v7 }
 0xf0e   : > { %v10100_v15 = vpop.f32.mrb[2].mxu0 }
 0xf0f   : > { %v11676_v16 = vadd.f32 %v10100_v15, %v9731_v14  ;;  %v5013_v17 = vpop.f32.mrb[3].mxu0 }
 0xf10   : > { %v5014_v18 = vadd.f32 %v9731_v14, %v5013_v17 }
 0xf12   : > { %5174 = vrot.lane.b32.xlu0 %v5014_v18, %s10813_s15  ;;  %v5177_v60 = vcombine.high %v5014_v18, %v10812_v6  ;;  %v5184_v44 = vrot.slane %v5014_v18, %v11695_v7 }
 0xf14   : > { %v5191_v51 = vrot.slane %v5177_v60, %v11695_v7 }
 0xf16   : > { %v10111_v20 = vpop.f32.mrb[4].mxu0 }
 0xf17   : > { %v11685_v21 = vadd.f32 %v10111_v20, %v11682_v19  ;;  %v11687_v23 = vpop.f32.mrb[5].mxu0 }
 0xf7c   : > { %v5105_v8 = vpop.permute.xlu1 %5104 }
 0xf7d   : > { %v5122_v31 = vcombine.high %v5105_v8, %v10812_v6  ;;  %v5129_v34 = vrot.slane %v5105_v8, %v11695_v7 }
 0xf7f   : > { %v5136_v35 = vrot.slane %v5122_v31, %v11695_v7  ;;  %v5137_v40 = vcombine.low %v5114_v36, %v5129_v34  ;;  %v5138_v57 = vcombine.high %v5114_v36, %v5129_v34 }
 0xf81   : > { %v5153_v37 = vcombine.low %v5121_v32, %v5136_v35  ;;  %v5154_v38 = vcombine.high %v5121_v32, %v5136_v35  ;;  %v5145_v48 = vrot.slane %v5137_v40, %v11703_v39  ;;  %v5152_v50 = vrot.slane %v5138_v57, %v11703_v39 }
 0xf83   : > { %v5161_v42 = vrot.slane %v5153_v37, %v11703_v39  ;;  %v5168_v43 = vrot.slane %v5154_v38, %v11703_v39  ;;  %v5313_v63 = vcombine.low %v5145_v48, %v5152_v50  ;;  %v9737_v0 = vcombine.high %v5145_v48, %v5152_v50 }
 0xf84   : > { %v5175_v41 = vpop.permute.xlu0 %5174 }
 0xf85   : > { %v5192_v45 = vcombine.high %v5175_v41, %v10812_v6  ;;  %v5199_v47 = vrot.slane %v5175_v41, %v11695_v7  ;;  %v5329_v56 = vcombine.low %v5161_v42, %v5168_v43  ;;  %v9738_v49 = vcombine.high %v5161_v42, %v5168_v43 }
 0xf86   : > { %v5320_v15 = vrot.slane %v5313_v63, %v11695_v7  ;;  %v5328_v17 = vrot.slane %v9737_v0, %v11695_v7 }
 0xf87   : > { %v5206_v52 = vrot.slane %v5192_v45, %v11695_v7  ;;  %v5207_v53 = vcombine.low %v5184_v44, %v5199_v47  ;;  %v5208_v55 = vcombine.high %v5184_v44, %v5199_v47  ;;  %v5336_v28 = vrot.slane %v5329_v56, %v11695_v7 }
 0xf88   : > { %v5344_v9 = vrot.slane %v9738_v49, %v11695_v7  ;;  %v5345_v26 = vcombine.low %v5320_v15, %v5328_v17  ;;  %v5095_v56 = vadd.f32 %v11682_v19, %v11687_v23 }
 0xf89   : > { %v5215_v58 = vrot.slane %v5207_v53, %v11703_v39  ;;  %v5222_v54 = vrot.slane %v5208_v55, %v11703_v39  ;;  %v5223_v61 = vcombine.low %v5191_v51, %v5206_v52  ;;  %v5224_v62 = vcombine.high %v5191_v51, %v5206_v52 }
 0xf8a   : > { %v5353_v13 = vcombine.low %v5336_v28, %v5344_v9  ;;  %v5352_v33 = vrot.slane %v5345_v26, %v11703_v39  ;;  %v5990_v9 = vrot.slane %v11676_v16, %v11695_v7 }
 0xf8b   : > { %v5231_v3 = vrot.slane %v5223_v61, %v11703_v39  ;;  %v5238_v46 = vrot.slane %v5224_v62, %v11703_v39  ;;  %v5363_v5 = vcombine.low %v5215_v58, %v5222_v54  ;;  %v9739_v27 = vcombine.high %v5215_v58, %v5222_v54 }
 0xf8c   : > { %v5360_v8 = vrot.slane %v5353_v13, %v11703_v39  ;;  %v5983_v54 = vcombine.high %v11676_v16, %v10812_v6  ;;  %v5913_v62 = vcombine.high %v11670_v11, %v10812_v6 }
 0xf8d   : > { %v5370_v10 = vrot.slane %v5363_v5, %v11695_v7  ;;  %v5378_v12 = vrot.slane %v9739_v27, %v11695_v7  ;;  %v5379_v59 = vcombine.low %v5231_v3, %v5238_v46  ;;  %v9740_v14 = vcombine.high %v5231_v3, %v5238_v46 }
 0xf8e   : > { %v5361_v34 = vcombine.low %v5352_v33, %v5360_v8  ;;  %v5362_v35 = vcombine.high %v5352_v33, %v5360_v8  ;;  %v5997_v0 = vrot.slane %v5983_v54, %v11695_v7  ;;  %v5247_v3 = vcombine.high %v5095_v56, %v10812_v6 }
 0xf8f   : > { %v5386_v18 = vrot.slane %v5379_v59, %v11695_v7  ;;  %v5394_v20 = vrot.slane %v9740_v14, %v11695_v7  ;;  %v5395_v24 = vcombine.low %v5370_v10, %v5378_v12  ;;  %v5920_v27 = vrot.slane %v11670_v11, %v11695_v7 }
 0xf90   : > { %v5927_v28 = vrot.slane %v5913_v62, %v11695_v7  ;;  %v5254_v12 = vrot.slane %v5095_v56, %v11695_v7  ;;  %v5261_v59 = vrot.slane %v5247_v3, %v11695_v7 }
 0xf91   : > { %v5403_v25 = vcombine.low %v5386_v18, %v5394_v20  ;;  %v5402_v29 = vrot.slane %v5395_v24, %v11703_v39 }
 0xf93   : > { %v5410_v30 = vrot.slane %v5403_v25, %v11703_v39 }
 0xf95   : > { %v5411_v31 = vcombine.low %v5402_v29, %v5410_v30  ;;  %v5412_v32 = vcombine.high %v5402_v29, %v5410_v30 }
 0xf97   : > { %10113 = vmatpush3.xpose.msk.msra.mxu0 %vm5463_vm9, %v5411_v31  ;;  %10118 = vmatpush3.xpose.msk.msra.mxu1 %vm5463_vm9, %v5412_v32 }
 0xf98   : > { %10122 = vmatprep.subr.mxu0 %v10812_v6  ;;  %10127 = vmatprep.subr.mxu1 %v10812_v6 }
 0xf9a   : > { %10115 = vmatmul.mubr.msk.f32.vlgmr.msra.gmra.mrb[6].mxu0 %vm5463_vm9, %v5361_v34  ;;  %10120 = vmatmul.mubr.msk.f32.vlgmr.msra.gmra.mrb[0].mxu1 %vm5463_vm9, %v5362_v35 }
 0xf9b   : > { %10124 = vmatprep.mubr.msk.f32.mxu0 %vm10814_vm8, %v10812_v6  ;;  %10129 = vmatprep.mubr.msk.f32.mxu1 %vm10814_vm8, %v10812_v6 }
0x106d   : > { %v5536_v36 = vpop.f32.mrb[6].mxu0  ;;  %v5612_v37 = vpop.f32.mrb[0].mxu1 }
0x106e   : > { %v5618_v38 = vsel %vm2480_vm0, -inf, %v5536_v36  ;;  %v5619_v40 = vsel %vm2480_vm0, -inf, %v5612_v37  ;;  %v10116_v57 = vpop.f32.mrb[7].mxu0  ;;  %v10121_v60 = vpop.f32.mrb[1].mxu1 }
0x106f   : > { %v5623_v41 = vsel %vm5463_vm9, %v5619_v40, -inf  ;;  %v5620_v42 = vsel %vm5463_vm9, %v5618_v38, -inf }
0x1070   : > { %5624 = vmax.xlane.f32.xlu0 %v5623_v41  ;;  %5621 = vmax.xlane.f32.xlu1 %v5620_v42 }
0x1081   : > { %5980 = vrot.lane.b32.xlu1 %v11676_v16, %s10813_s15 }
0x10fd   : > { %v5625_v43 = vpop.xlane.xlu0 %5624  ;;  %v5622_v44 = vpop.xlane.xlu1 %5621 }
0x10fe   : > { %v5627_v45 = vsub.f32 %v5619_v40, %v5625_v43  ;;  %v5626_v47 = vsub.f32 %v5618_v38, %v5622_v44 }
0x1100   : > { %v5630_v48 = vmul.f32 1.442695, %v5627_v45  ;;  %v5628_v50 = vmul.f32 1.442695, %v5626_v47 }
0x1101   : > { %v5981_v49 = vpop.permute.xlu1 %5980 }
0x1102   : > { %10588 = vpow2.f32 %v5630_v48  ;;  %v5998_v58 = vcombine.high %v5981_v49, %v10812_v6  ;;  %v6005_v19 = vrot.slane %v5981_v49, %v11695_v7 }
0x1103   : > { %10590 = vpow2.f32 %v5628_v50 }
0x1104   : > { %v6012_v61 = vrot.slane %v5998_v58, %v11695_v7  ;;  %v6013_v18 = vcombine.low %v5990_v9, %v6005_v19  ;;  %v6014_v20 = vcombine.high %v5990_v9, %v6005_v19 }
0x1106   : > { %v6029_v23 = vcombine.low %v5997_v0, %v6012_v61  ;;  %v6030_v5 = vcombine.high %v5997_v0, %v6012_v61  ;;  %v6021_v38 = vrot.slane %v6013_v18, %v11703_v39  ;;  %v6028_v40 = vrot.slane %v6014_v20, %v11703_v39 }
0x1108   : > { %v6037_v13 = vrot.slane %v6029_v23, %v11703_v39  ;;  %v6044_v16 = vrot.slane %v6030_v5, %v11703_v39  ;;  %v6169_v49 = vcombine.low %v6021_v38, %v6028_v40  ;;  %v9753_v58 = vcombine.high %v6021_v38, %v6028_v40 }
0x110a   : > { %v6185_v44 = vcombine.low %v6037_v13, %v6044_v16  ;;  %v9754_v45 = vcombine.high %v6037_v13, %v6044_v16 }
0x110c   : > { %v11751_v51 = vpop.eup %10588  ;;  %v6200_v19 = vrot.slane %v9754_v45, %v11695_v7 }
0x110d   : > { %v11753_v52 = vpop.eup %10590  ;;  %v5635_v53 = vsel %vm5463_vm9, %v11751_v51, 0.0 }
0x110e   : > { %5636 = vadd.xlane.f32.xlu1 %v5635_v53  ;;  %v5632_v55 = vsel %vm5463_vm9, %v11753_v52, 0.0 }
0x110f   : > { %5633 = vadd.xlane.f32.xlu0 %v5632_v55 }
0x111f   : > { %5910 = vrot.lane.b32.xlu1 %v11670_v11, %s10813_s15 }
0x1125   : > { %5244 = vrot.lane.b32.xlu0 %v5095_v56, %s10813_s15 }
0x119b   : > { %v5637_v63 = vpop.xlane.xlu1 %5636 }
0x119c   : > { %v5634_v46 = vpop.xlane.xlu0 %5633  ;;  %10592 = vrcp.f32 %v5637_v63 }
0x119d   : > { %10594 = vrcp.f32 %v5634_v46  ;;  %v6192_v46 = vrot.slane %v6185_v44, %v11695_v7 }
0x119f   : > { %v5911_v10 = vpop.permute.xlu1 %5910  ;;  %v6209_v18 = vcombine.low %v6192_v46, %v6200_v19 }
0x11a0   : > { %v5245_v14 = vpop.permute.xlu0 %5244  ;;  %v5928_v15 = vcombine.high %v5911_v10, %v10812_v6  ;;  %v5935_v17 = vrot.slane %v5911_v10, %v11695_v7  ;;  %v6176_v10 = vrot.slane %v6169_v49, %v11695_v7 }
0x11a1   : > { %v5262_v24 = vcombine.high %v5245_v14, %v10812_v6  ;;  %v5269_v11 = vrot.slane %v5245_v14, %v11695_v7 }
0x11a2   : > { %v5942_v25 = vrot.slane %v5928_v15, %v11695_v7  ;;  %v5943_v8 = vcombine.low %v5920_v27, %v5935_v17  ;;  %v5944_v31 = vcombine.high %v5920_v27, %v5935_v17 }
0x11a3   : > { %v5276_v26 = vrot.slane %v5262_v24, %v11695_v7  ;;  %v5277_v29 = vcombine.low %v5254_v12, %v5269_v11  ;;  %v5278_v30 = vcombine.high %v5254_v12, %v5269_v11  ;;  %v6184_v12 = vrot.slane %v9753_v58, %v11695_v7 }
0x11a4   : > { %v5959_v32 = vcombine.low %v5927_v28, %v5942_v25  ;;  %v5960_v33 = vcombine.high %v5927_v28, %v5942_v25  ;;  %v5951_v48 = vrot.slane %v5943_v8, %v11703_v39  ;;  %v5958_v56 = vrot.slane %v5944_v31, %v11703_v39 }
0x11a5   : > { %v5285_v34 = vrot.slane %v5277_v29, %v11703_v39  ;;  %v5292_v35 = vrot.slane %v5278_v30, %v11703_v39  ;;  %v5293_v36 = vcombine.low %v5261_v59, %v5276_v26  ;;  %v5294_v37 = vcombine.high %v5261_v59, %v5276_v26 }
0x11a6   : > { %v5967_v57 = vrot.slane %v5959_v32, %v11703_v39  ;;  %v5974_v43 = vrot.slane %v5960_v33, %v11703_v39  ;;  %v10593_v3 = vpop.eup %10592  ;;  %v6119_v27 = vcombine.low %v5951_v48, %v5958_v56  ;;  %v9751_v28 = vcombine.high %v5951_v48, %v5958_v56 }
0x11a7   : > { %v5301_v60 = vrot.slane %v5293_v36, %v11703_v39  ;;  %v5308_v41 = vrot.slane %v5294_v37, %v11703_v39  ;;  %v5413_v42 = vcombine.low %v5285_v34, %v5292_v35  ;;  %v9741_v47 = vcombine.high %v5285_v34, %v5292_v35  ;;  %v10595_v5 = vpop.eup %10594 }
0x11a8   : > { %v6135_v63 = vcombine.low %v5967_v57, %v5974_v43  ;;  %v9752_v0 = vcombine.high %v5967_v57, %v5974_v43  ;;  %v6126_v20 = vrot.slane %v6119_v27, %v11695_v7  ;;  %v6134_v24 = vrot.slane %v9751_v28, %v11695_v7 }
0x11a9   : > { %v5420_v50 = vrot.slane %v5413_v42, %v11695_v7  ;;  %v5429_v53 = vcombine.low %v5301_v60, %v5308_v41  ;;  %v9742_v55 = vcombine.high %v5301_v60, %v5308_v41  ;;  %v5428_v54 = vrot.slane %v9741_v47, %v11695_v7 }
0x11aa   : > { %v6142_v59 = vrot.slane %v6135_v63, %v11695_v7  ;;  %v6150_v14 = vrot.slane %v9752_v0, %v11695_v7  ;;  %v6201_v16 = vcombine.low %v6176_v10, %v6184_v12  ;;  %v5639_v25 = vmul.f32 %v10595_v5, %v11753_v52 }
0x11ab   : > { %v5436_v61 = vrot.slane %v5429_v53, %v11695_v7  ;;  %v5444_v62 = vrot.slane %v9742_v55, %v11695_v7  ;;  %v5445_v23 = vcombine.low %v5420_v50, %v5428_v54  ;;  %v5641_v26 = vmul.f32 %v10593_v3, %v11751_v51 }
0x11ac   : > { %v6159_v29 = vcombine.low %v6142_v59, %v6150_v14  ;;  %v6216_v30 = vrot.slane %v6209_v18, %v11703_v39  ;;  %v6151_v8 = vcombine.low %v6126_v20, %v6134_v24  ;;  %v6208_v31 = vrot.slane %v6201_v16, %v11703_v39 }
0x11ad   : > { %v5453_v9 = vcombine.low %v5436_v61, %v5444_v62  ;;  %v5452_v15 = vrot.slane %v5445_v23, %v11703_v39 }
0x11ae   : > { %v6166_v51 = vrot.slane %v6159_v29, %v11703_v39  ;;  %v6217_v52 = vcombine.low %v6208_v31, %v6216_v30  ;;  %v6218_v32 = vcombine.high %v6208_v31, %v6216_v30  ;;  %v6158_v33 = vrot.slane %v6151_v8, %v11703_v39 }
0x11af   : > { %v5460_v17 = vrot.slane %v5453_v9, %v11703_v39  ;;  %v6060_v29 = vrot.slane %v11685_v21, %v11695_v7 }
0x11b0   : > { %v6167_v34 = vcombine.low %v6158_v33, %v6166_v51  ;;  %v6168_v35 = vcombine.high %v6158_v33, %v6166_v51 }
0x11b1   : > { %v5461_v11 = vcombine.low %v5452_v15, %v5460_v17  ;;  %v5462_v13 = vcombine.high %v5452_v15, %v5460_v17 }
0x11b3   : > { %10123 = vmatpush3.msra.mxu0 %v5461_v11  ;;  %10128 = vmatpush3.msra.mxu1 %v5462_v13  ;;  %v6053_v13 = vcombine.high %v11685_v21, %v10812_v6 }
0x11b4   : > { %10125 = vmatmul.mubr.msk.f32.vlgmr.msra.gmra.mrb[8].mxu0 %vm5463_vm9, %v5639_v25  ;;  %10130 = vmatmul.mubr.msk.f32.vlgmr.msra.gmra.mrb[2].mxu1 %vm5463_vm9, %v5641_v26 }
0x11b5   : > { %10132 = vmatprep.subr.mxu0 %v10812_v6  ;;  %10137 = vmatprep.subr.mxu1 %v10812_v6  ;;  %v6067_v31 = vrot.slane %v6053_v13, %v11695_v7 }
0x11b6   : > { %10134 = vmatprep.mubr.msk.f32.mxu0 %vm10814_vm8, %v10812_v6  ;;  %10139 = vmatprep.mubr.msk.f32.mxu1 %vm10814_vm8, %v10812_v6 }
0x11ba   : > { %10133 = vmatpush3.xpose.msk.msra.mxu0 %vm5463_vm9, %v6217_v52  ;;  %10138 = vmatpush3.xpose.msk.msra.mxu1 %vm5463_vm9, %v6218_v32 }
0x11bb   : > { %10142 = vmatprep.subr.mxu0 %v10812_v6  ;;  %10147 = vmatprep.subr.mxu1 %v10812_v6 }
0x11bd   : > { %10135 = vmatmul.mubr.msk.f32.vlgmr.msra.gmra.mrb[10].mxu0 %vm5463_vm9, %v6167_v34  ;;  %10140 = vmatmul.mubr.msk.f32.vlgmr.msra.gmra.mrb[4].mxu1 %vm5463_vm9, %v6168_v35 }
0x11be   : > { %10144 = vmatprep.mubr.msk.f32.mxu0 %vm10814_vm8, %v10812_v6  ;;  %10149 = vmatprep.mubr.msk.f32.mxu1 %vm10814_vm8, %v10812_v6 }
0x1287   : > { %v5711_v36 = vpop.f32.mrb[8].mxu0  ;;  %v5784_v37 = vpop.f32.mrb[2].mxu1 }
0x1288   : > { %v5788_v38 = vcombine.high %v5711_v36, %v10812_v6  ;;  %v5795_v40 = vrot.slane %v5711_v36, %v11695_v7  ;;  %v5803_v57 = vcombine.high %v5784_v37, %v10812_v6  ;;  %v5810_v60 = vrot.slane %v5784_v37, %v11695_v7  ;;  %v10126_v41 = vpop.f32.mrb[9].mxu0  ;;  %v10131_v42 = vpop.f32.mrb[3].mxu1 }
0x128a   : > { %v5802_v43 = vrot.slane %v5788_v38, %v11695_v7  ;;  %v5817_v44 = vrot.slane %v5803_v57, %v11695_v7  ;;  %v5818_v45 = vcombine.low %v5795_v40, %v5810_v60  ;;  %v5819_v47 = vcombine.high %v5795_v40, %v5810_v60 }
0x128c   : > { %v5826_v48 = vrot.slane %v5818_v45, %v11703_v39  ;;  %v5833_v50 = vrot.slane %v5819_v47, %v11703_v39  ;;  %v5834_v53 = vcombine.low %v5802_v43, %v5817_v44  ;;  %v5835_v55 = vcombine.high %v5802_v43, %v5817_v44 }
0x128e   : > { %v5842_v56 = vrot.slane %v5834_v53, %v11703_v39  ;;  %v5849_v49 = vrot.slane %v5835_v55, %v11703_v39  ;;  %v5854_v58 = vcombine.low %v5826_v48, %v5833_v50  ;;  %v9749_v54 = vcombine.high %v5826_v48, %v5833_v50 }
0x1290   : > { %v5861_v61 = vrot.slane %v5854_v58, %v11695_v7  ;;  %v5869_v62 = vrot.slane %v9749_v54, %v11695_v7  ;;  %v5870_v63 = vcombine.low %v5842_v56, %v5849_v49  ;;  %v9750_v0 = vcombine.high %v5842_v56, %v5849_v49  ;;  %v6341_v3 = vpop.f32.mrb[10].mxu0  ;;  %v6417_v46 = vpop.f32.mrb[4].mxu1 }
0x1291   : > { %v6421_v19 = vsel %vm2480_vm0, -inf, %v6341_v3  ;;  %v6422_v23 = vsel %vm2480_vm0, -inf, %v6417_v46  ;;  %v10136_v5 = vpop.f32.mrb[11].mxu0  ;;  %v10141_v27 = vpop.f32.mrb[5].mxu1 }
0x1292   : > { %v6426_v28 = vsel %vm5463_vm9, %v6422_v23, -inf  ;;  %v6423_v9 = vsel %vm5463_vm9, %v6421_v19, -inf  ;;  %v5877_v10 = vrot.slane %v5870_v63, %v11695_v7  ;;  %v5885_v12 = vrot.slane %v9750_v0, %v11695_v7  ;;  %v4763_v5 = vld [vmem:[%s12456_s18] sm:$0xff]  ;;  %v4764_v27 = vld [vmem:[%s12456_s18 + $0x8] sm:$0xff] }
0x1293   : > { %6427 = vmax.xlane.f32.xlu0 %v6426_v28  ;;  %6424 = vmax.xlane.f32.xlu1 %v6423_v9  ;;  %v5886_v59 = vcombine.low %v5861_v61, %v5869_v62  ;;  %v10348_v28 = vpack.c.bf16 %v4764_v27, %v4763_v5  ;;  %v4768_v5 = vld [vmem:[%s11280_s3] sm:$0xff]  ;;  %v4769_v27 = vld [vmem:[%s11280_s3 + $0x8] sm:$0xff] }
0x1294   : > { %v5894_v14 = vcombine.low %v5877_v10, %v5885_v12 }
0x1295   : > { %v5893_v15 = vrot.slane %v5886_v59, %v11703_v39 }
0x1296   : > { %v5901_v17 = vrot.slane %v5894_v14, %v11703_v39 }
0x1298   : > { %v5903_v1 = vcombine.high %v5893_v15, %v5901_v17  ;;  %v5902_v2 = vcombine.low %v5893_v15, %v5901_v17 }
0x12a4   : > { %6050 = vrot.lane.b32.xlu1 %v11685_v21, %s10813_s15 }
0x1320   : > { %v6428_v18 = vpop.xlane.xlu0 %6427  ;;  %v6425_v20 = vpop.xlane.xlu1 %6424 }
0x1321   : > { %v6430_v24 = vsub.f32 %v6422_v23, %v6428_v18  ;;  %v6429_v11 = vsub.f32 %v6421_v19, %v6425_v20 }
0x1323   : > { %v6431_v16 = vmul.f32 1.442695, %v6429_v11  ;;  %v6433_v25 = vmul.f32 1.442695, %v6430_v24 }
0x1324   : > { %v6051_v26 = vpop.permute.xlu1 %6050 }
0x1325   : > { %v6068_v30 = vcombine.high %v6051_v26, %v10812_v6  ;;  %v6075_v8 = vrot.slane %v6051_v26, %v11695_v7  ;;  %10596 = vpow2.f32 %v6431_v16 }
0x1326   : > { %10598 = vpow2.f32 %v6433_v25 }
0x1327   : > { %v6082_v51 = vrot.slane %v6068_v30, %v11695_v7  ;;  %v6083_v52 = vcombine.low %v6060_v29, %v6075_v8  ;;  %v6084_v32 = vcombine.high %v6060_v29, %v6075_v8 }
0x1329   : > { %v6091_v33 = vrot.slane %v6083_v52, %v11703_v39  ;;  %v6098_v34 = vrot.slane %v6084_v32, %v11703_v39  ;;  %v6099_v35 = vcombine.low %v6067_v31, %v6082_v51  ;;  %v6100_v36 = vcombine.high %v6067_v31, %v6082_v51 }
0x132b   : > { %v6107_v21 = vrot.slane %v6099_v35, %v11703_v39  ;;  %v6114_v37 = vrot.slane %v6100_v36, %v11703_v39  ;;  %v6219_v38 = vcombine.low %v6091_v33, %v6098_v34  ;;  %v9755_v40 = vcombine.high %v6091_v33, %v6098_v34 }
0x132d   : > { %v6226_v57 = vrot.slane %v6219_v38, %v11695_v7  ;;  %v6234_v60 = vrot.slane %v9755_v40, %v11695_v7  ;;  %v6235_v41 = vcombine.low %v6107_v21, %v6114_v37  ;;  %v9756_v42 = vcombine.high %v6107_v21, %v6114_v37 }
0x132f   : > { %v6242_v43 = vrot.slane %v6235_v41, %v11695_v7  ;;  %v6250_v44 = vrot.slane %v9756_v42, %v11695_v7  ;;  %v6251_v45 = vcombine.low %v6226_v57, %v6234_v60  ;;  %v10597_v47 = vpop.eup %10596  ;;  %v9767_v41 = vld [vmem:[%s12458_s10] ss:$0 sm:$0xff] }
0x1330   : > { %v6435_v48 = vsel %vm5463_vm9, %v10597_v47, 0.0  ;;  %v10599_v53 = vpop.eup %10598 }
0x1331   : > { %v6259_v50 = vcombine.low %v6242_v43, %v6250_v44  ;;  %6436 = vadd.xlane.f32.xlu0 %v6435_v48  ;;  %v6258_v55 = vrot.slane %v6251_v45, %v11703_v39  ;;  %v6438_v49 = vsel %vm5463_vm9, %v10599_v53, 0.0 }
0x1333   : > { %v6266_v56 = vrot.slane %v6259_v50, %v11703_v39 }
0x1335   : > { %v6267_v58 = vcombine.low %v6258_v55, %v6266_v56  ;;  %v6268_v54 = vcombine.high %v6258_v55, %v6266_v56  ;;  %6439 = vadd.xlane.f32.xlu0 %v6438_v49  ;;  %v4773_v55 = vld [vmem:[%s11285_s28] sm:$0xff]  ;;  %v4774_v56 = vld [vmem:[%s11285_s28 + $0x8] sm:$0xff] }
0x1336   : > { %v4808_v49 = vld [vmem:[#allocation2] sm:$0xff] }
0x1337   : > { %10143 = vmatpush3.msra.mxu0 %v6267_v58  ;;  %10148 = vmatpush3.msra.mxu1 %v6268_v54  ;;  %v10360_v58 = vpack.c.bf16 %v4774_v56, %v4773_v55 }
0x1338   : > { %10349 = vmatprep.subr.bf16.mxu0 %v10348_v28 }
0x134b   : > { %5905 = vrot.lane.b32.xlu0 %v5903_v1, %s10817_s20 }
0x13be   : > { %v6437_v61 = vpop.xlane.xlu0 %6436 }
0x13bf   : > { %10600 = vrcp.f32 %v6437_v61 }
0x13c2   : > { %v6440_v62 = vpop.xlane.xlu0 %6439 }
0x13c3   : > { %10602 = vrcp.f32 %v6440_v62 }
0x13c6   : > { %v5906_v0 = vpop.permute.xlu0 %5905 }
0x13c7   : > { %v5908_v46 = vsel %vm5463_vm9, %v5902_v2, %v5906_v0 }
0x13c9   : > { %v10601_v63 = vpop.eup %10600 }
0x13ca   : > { %v6442_v3 = vmul.f32 %v10601_v63, %v10597_v47 }
0x13cc   : > { %10145 = vmatmul.mubr.msk.f32.vlgmr.msra.gmra.mrb[12].mxu0 %vm5463_vm9, %v6442_v3 }
0x13cd   : > { %v10603_v19 = vpop.eup %10602  ;;  %10156 = vmatprep.mubr.msk.f32.mxu0 %vm6712_vm10, %v5908_v46  ;;  %10351 = vmatpush3.bf16.msra.mxu0 %v10348_v28  ;;  %v10352_v28 = vpack.c.bf16 %v4769_v27, %v4768_v5  ;;  %v9770_v27 = vld [vmem:[%s2408_s30] ss:$0 sm:$0xff] }
0x13ce   : > { %v6444_v23 = vmul.f32 %v10603_v19, %v10599_v53  ;;  %10361 = vmatprep.subr.bf16.mxu0 %v10360_v58 }
0x13cf   : > { %10353 = vmatprep.subr.bf16.mxu1 %v10352_v28 }
0x13d0   : > { %10150 = vmatmul.mubr.msk.f32.vlgmr.msra.gmra.mrb[6].mxu1 %vm5463_vm9, %v6444_v23 }
0x13d1   : > { %10355 = vmatpush3.bf16.msra.mxu1 %v10352_v28 }
0x149f   : > { %v6514_v9 = vpop.f32.mrb[12].mxu0 }
0x14a0   : > { %v10146_v10 = vpop.f32.mrb[13].mxu0  ;;  %v6591_v12 = vcombine.high %v6514_v9, %v10812_v6  ;;  %v6598_v14 = vrot.slane %v6514_v9, %v11695_v7  ;;  %v4770_v9 = vld [vmem:[%s11280_s3 + $0x10] sm:$0xff] }
0x14a1   : > { %v4771_v10 = vld [vmem:[%s11280_s3 + $0x18] sm:$0xff]  ;;  %s12462_s3 = scalar_lea.vmem %s12460_s27, %s12489_s24 }
0x14a2   : > { %v6605_v2 = vrot.slane %v6591_v12, %v11695_v7  ;;  %v10356_v12 = vpack.c.bf16 %v4771_v10, %v4770_v9 }
0x14a3   : > { %v6587_v59 = vpop.f32.mrb[6].mxu1 }
0x14a4   : > { %v6606_v15 = vcombine.high %v6587_v59, %v10812_v6  ;;  %v6613_v17 = vrot.slane %v6587_v59, %v11695_v7  ;;  %v10151_v1 = vpop.f32.mrb[7].mxu1  ;;  %10357 = vmatprep.subr.bf16.mxu1 %v10356_v12  ;;  %v9773_v59 = vld [vmem:[%s2420_s7] ss:$0 sm:$0xff]  ;;  %s12463_s7 = scalar_lea.vmem %s12461_s6, %s12489_s24 }
0x14a5   : > { %10359 = vmatpush3.bf16.msra.mxu1 %v10356_v12 }
0x14a6   : > { %v6620_v18 = vrot.slane %v6606_v15, %v11695_v7  ;;  %v6621_v20 = vcombine.low %v6598_v14, %v6613_v17  ;;  %v6622_v24 = vcombine.high %v6598_v14, %v6613_v17  ;;  %10184 = vmatprep.subr.mxu1 %v10812_v6 }
0x14a8   : > { %v6629_v11 = vrot.slane %v6621_v20, %v11703_v39  ;;  %v6636_v13 = vrot.slane %v6622_v24, %v11703_v39  ;;  %v6637_v16 = vcombine.low %v6605_v2, %v6620_v18  ;;  %v6638_v25 = vcombine.high %v6605_v2, %v6620_v18 }
0x14aa   : > { %v6645_v26 = vrot.slane %v6637_v16, %v11703_v39  ;;  %v6652_v29 = vrot.slane %v6638_v25, %v11703_v39  ;;  %v6657_v30 = vcombine.low %v6629_v11, %v6636_v13  ;;  %v9763_v8 = vcombine.high %v6629_v11, %v6636_v13  ;;  %v9768_v25 = vld [vmem:[%s12462_s3] ss:$0 sm:$0xff] }
0x14ac   : > { %v6664_v31 = vrot.slane %v6657_v30, %v11695_v7  ;;  %v6672_v51 = vrot.slane %v9763_v8, %v11695_v7  ;;  %v6673_v52 = vcombine.low %v6645_v26, %v6652_v29  ;;  %v9764_v32 = vcombine.high %v6645_v26, %v6652_v29  ;;  %v9769_v8 = vld [vmem:[%s12463_s7] ss:$0 sm:$0xff] }
0x14ae   : > { %v6680_v33 = vrot.slane %v6673_v52, %v11695_v7  ;;  %v6688_v34 = vrot.slane %v9764_v32, %v11695_v7  ;;  %v6689_v35 = vcombine.low %v6664_v31, %v6672_v51 }
0x14b0   : > { %v6697_v36 = vcombine.low %v6680_v33, %v6688_v34  ;;  %v6696_v21 = vrot.slane %v6689_v35, %v11703_v39 }
0x14b2   : > { %v6704_v37 = vrot.slane %v6697_v36, %v11703_v39 }
0x14b4   : > { %v6706_v38 = vcombine.high %v6696_v21, %v6704_v37  ;;  %v6705_v40 = vcombine.low %v6696_v21, %v6704_v37 }
0x14b6   : > { %6708 = vrot.lane.b32.xlu1 %v6706_v38, %s10817_s20 }
0x1528   : > { %v6709_v57 = vpop.permute.xlu1 %6708 }
0x1529   : > { %v6711_v60 = vsel %vm5463_vm9, %v6705_v40, %v6709_v57 }
0x152a   : > { %10157 = vmatmul.mubr.msk.f32.vlgmr.msra.gmra.mrb[14].mxu0 %vm6712_vm10, %v6711_v60 }
0x152b   : > { %10174 = vmatprep.mubr.msk.f32.mxu0 %vm6712_vm10, %v4808_v49  ;;  %10363 = vmatpush3.bf16.msra.mxu0 %v10360_v58 }
0x15fd   : > { %v10158_v42 = vpop.f32.mrb[14].mxu0 }
0x15fe   : > { %v6795_v43 = vadd.f32 %v10158_v42, %v11631_v22  ;;  %v6785_v44 = vpop.f32.mrb[15].mxu0 }
0x15ff   : > { %v6794_v45 = vadd.f32 %v6785_v44, %v11629_v4  ;;  %v11924_v4 = vld [vmem:[#allocation2 + $0x8] sm:$0xff] }
0x1600   : > { %v11913_v47 = vadd.f32 %v9767_v41, %v6795_v43  ;;  %10175 = vmatmul.mubr.msk.f32.vlgmr.msra.gmra.mrb[16].mxu0 %vm6712_vm10, %v11924_v4 }
0x1601   : > { %v11915_v48 = vadd.f32 %v9767_v41, %v6794_v45  ;;  %10181 = vmatprep.mubr.msk.f32.mxu0 %vm6712_vm10, %v4808_v49 }
0x1602   : > { %v6807_v50 = vsel %vm4810_vm7, %v11913_v47, 0.0 }
0x1603   : > { %6808 = vadd.xlane.f32.xlu0 %v6807_v50  ;;  %v6804_v53 = vsel %vm4810_vm7, %v11915_v48, 0.0 }
0x1604   : > { %6805 = vadd.xlane.f32.xlu1 %v6804_v53 }
0x1690   : > { %v6809_v22 = vpop.xlane.xlu0 %6808 }
0x1691   : > { %v6811_v54 = vmul.f32 0.03125, %v6809_v22  ;;  %v6806_v61 = vpop.xlane.xlu1 %6805 }
0x1692   : > { %v6810_v62 = vmul.f32 0.03125, %v6806_v61 }
0x1693   : > { %v6813_v63 = vsub.f32 %v11913_v47, %v6811_v54 }
0x1694   : > { %v6812_v0 = vsub.f32 %v11915_v48, %v6810_v62 }
0x1695   : > { %v6815_v3 = vmul.f32 %v6813_v63, %v6813_v63 }
0x1696   : > { %v6814_v46 = vmul.f32 %v6812_v0, %v6812_v0 }
0x1697   : > { %v6819_v19 = vsel %vm4810_vm7, %v6815_v3, 0.0 }
0x1698   : > { %6820 = vadd.xlane.f32.xlu1 %v6819_v19  ;;  %v6816_v23 = vsel %vm4810_vm7, %v6814_v46, 0.0 }
0x1699   : > { %6817 = vadd.xlane.f32.xlu0 %v6816_v23 }
0x16d3   : > { %v10176_v14 = vpop.f32.mrb[16].mxu0 }
0x16d4   : > { %v11941_v15 = vadd.f32 %v10176_v14, %v9773_v59  ;;  %v7011_v17 = vpop.f32.mrb[17].mxu0 }
0x16d5   : > { %v7012_v1 = vadd.f32 %v9773_v59, %v7011_v17 }
0x16d7   : > { %7172 = vrot.lane.b32.xlu0 %v7012_v1, %s10813_s15  ;;  %v7175_v34 = vcombine.high %v7012_v1, %v10812_v6  ;;  %v7182_v36 = vrot.slane %v7012_v1, %v11695_v7 }
0x16d9   : > { %v7189_v37 = vrot.slane %v7175_v34, %v11695_v7 }
0x1725   : > { %v6821_v2 = vpop.xlane.xlu1 %6820 }
0x1726   : > { %v6823_v18 = vmul.f32 0.03125, %v6821_v2  ;;  %v6818_v20 = vpop.xlane.xlu0 %6817 }
0x1727   : > { %v6822_v24 = vmul.f32 0.03125, %v6818_v20 }
0x1728   : > { %v6825_v11 = vadd.f32 1e-05, %v6823_v18 }
0x1729   : > { %v6824_v13 = vadd.f32 1e-05, %v6822_v24 }
0x172a   : > { %10604 = vrsqrt.f32 %v6825_v11 }
0x172b   : > { %10606 = vrsqrt.f32 %v6824_v13 }
0x1734   : > { %v10605_v16 = vpop.eup %10604 }
0x1735   : > { %v10607_v26 = vpop.eup %10606  ;;  %v6829_v29 = vmul.f32 %v10605_v16, %v6813_v63  ;;  %v4776_v63 = vld [vmem:[%s11290_s17] sm:$0xff] }
0x1736   : > { %v6828_v30 = vmul.f32 %v10607_v26, %v6812_v0  ;;  %v4777_v0 = vld [vmem:[%s11290_s17 + $0x8] sm:$0xff] }
0x1737   : > { %v6837_v31 = vmul.f32 %v9768_v25, %v6829_v29  ;;  %v10364_v46 = vpack.c.bf16 %v4777_v0, %v4776_v63 }
0x1738   : > { %v6836_v51 = vmul.f32 %v9768_v25, %v6828_v30 }
0x1739   : > { %v6845_v32 = vadd.f32 %v9769_v8, %v6837_v31  ;;  %10365 = vmatprep.subr.bf16.mxu0 %v10364_v46 }
0x173a   : > { %v6844_v52 = vadd.f32 %v9769_v8, %v6836_v51  ;;  %10367 = vmatpush3.bf16.msra.mxu0 %v10364_v46 }
0x173b   : > { %10189 = vmatprep.subr.mxu0 %v10812_v6 }
0x173c   : > { %10167 = vmatprep.mubr.msk.f32.mxu1 %vm4810_vm7, %v6844_v52 }
0x173d   : > { %10168 = vmatmul.mubr.msk.f32.vlgmr.msra.gmra.mrb[8].mxu1 %vm4810_vm7, %v6845_v32  ;;  %10182 = vmatmul.mubr.msk.f32.vlgmr.msra.gmra.mrb[18].mxu0 %vm6712_vm10, %v11924_v4  ;;  %v9776_v4 = vld [vmem:[%s2432_s25] ss:$0 sm:$0xff] }
0x173e   : > { %10186 = vmatprep.mubr.msk.f32.mxu1 %vm10814_vm8, %v10812_v6  ;;  %10191 = vmatprep.mubr.msk.f32.mxu0 %vm10814_vm8, %v10812_v6 }
0x1749   : > { %v7173_v33 = vpop.permute.xlu0 %7172 }
0x174a   : > { %v7190_v35 = vcombine.high %v7173_v33, %v10812_v6  ;;  %v7197_v21 = vrot.slane %v7173_v33, %v11695_v7 }
0x174c   : > { %v7204_v38 = vrot.slane %v7190_v35, %v11695_v7  ;;  %v7205_v40 = vcombine.low %v7182_v36, %v7197_v21  ;;  %v7206_v57 = vcombine.high %v7182_v36, %v7197_v21 }
0x174e   : > { %v7221_v60 = vcombine.low %v7189_v37, %v7204_v38  ;;  %v7222_v41 = vcombine.high %v7189_v37, %v7204_v38  ;;  %v7213_v42 = vrot.slane %v7205_v40, %v11703_v39  ;;  %v7220_v43 = vrot.slane %v7206_v57, %v11703_v39 }
0x1750   : > { %v7229_v44 = vrot.slane %v7221_v60, %v11703_v39  ;;  %v7236_v45 = vrot.slane %v7222_v41, %v11703_v39  ;;  %v7361_v50 = vcombine.low %v7213_v42, %v7220_v43  ;;  %v9781_v53 = vcombine.high %v7213_v42, %v7220_v43 }
0x1752   : > { %v7377_v55 = vcombine.low %v7229_v44, %v7236_v45  ;;  %v9782_v56 = vcombine.high %v7229_v44, %v7236_v45  ;;  %v7368_v49 = vrot.slane %v7361_v50, %v11695_v7  ;;  %v7376_v58 = vrot.slane %v9781_v53, %v11695_v7 }
0x1754   : > { %v7384_v22 = vrot.slane %v7377_v55, %v11695_v7  ;;  %v7392_v54 = vrot.slane %v9782_v56, %v11695_v7  ;;  %v7393_v61 = vcombine.low %v7368_v49, %v7376_v58 }
0x1756   : > { %v7401_v62 = vcombine.low %v7384_v22, %v7392_v54  ;;  %v7400_v3 = vrot.slane %v7393_v61, %v11703_v39 }
0x1758   : > { %v7408_v19 = vrot.slane %v7401_v62, %v11703_v39 }
0x175a   : > { %v7409_v23 = vcombine.low %v7400_v3, %v7408_v19  ;;  %v7410_v5 = vcombine.high %v7400_v3, %v7408_v19 }
0x175c   : > { %10185 = vmatpush3.xpose.msk.msra.mxu1 %vm5463_vm9, %v7409_v23  ;;  %10190 = vmatpush3.xpose.msk.msra.mxu0 %vm5463_vm9, %v7410_v5  ;;  %v7976_v5 = vcombine.high %v11941_v15, %v10812_v6 }
0x175d   : > { %10194 = vmatprep.subr.mxu1 %v10812_v6  ;;  %10199 = vmatprep.subr.mxu0 %v10812_v6 }
0x1810   : > { %v10169_v28 = vpop.f32.mrb[8].mxu1  ;;  %v10183_v59 = vpop.f32.mrb[18].mxu0 }
0x1811   : > { %v11984_v9 = vadd.f32 %v10169_v28, %v9770_v27  ;;  %v6924_v10 = vpop.f32.mrb[9].mxu1  ;;  %v11990_v14 = vadd.f32 %v10183_v59, %v9776_v4  ;;  %v7092_v17 = vpop.f32.mrb[19].mxu0 }
0x1812   : > { %v6925_v12 = vadd.f32 %v9770_v27, %v6924_v10  ;;  %v7093_v46 = vadd.f32 %v9776_v4, %v7092_v17 }
0x1813   : > { %v7906_v28 = vcombine.high %v11984_v9, %v10812_v6 }
0x1814   : > { %7102 = vrot.lane.b32.xlu1 %v6925_v12, %s10813_s15  ;;  %v7105_v1 = vcombine.high %v6925_v12, %v10812_v6  ;;  %v7112_v18 = vrot.slane %v6925_v12, %v11695_v7  ;;  %v7990_v12 = vrot.slane %v7976_v5, %v11695_v7  ;;  %v7245_v59 = vcombine.high %v7093_v46, %v10812_v6 }
0x1816   : > { %v7119_v11 = vrot.slane %v7105_v1, %v11695_v7 }
0x1886   : > { %v7103_v2 = vpop.permute.xlu1 %7102 }
0x1887   : > { %v7120_v20 = vcombine.high %v7103_v2, %v10812_v6  ;;  %v7127_v24 = vrot.slane %v7103_v2, %v11695_v7 }
0x1889   : > { %v7134_v13 = vrot.slane %v7120_v20, %v11695_v7  ;;  %v7135_v16 = vcombine.low %v7112_v18, %v7127_v24  ;;  %v7136_v25 = vcombine.high %v7112_v18, %v7127_v24  ;;  %v7983_v18 = vrot.slane %v11941_v15, %v11695_v7 }
0x188a   : > { %v7913_v20 = vrot.slane %v11984_v9, %v11695_v7  ;;  %v7920_v24 = vrot.slane %v7906_v28, %v11695_v7 }
0x188b   : > { %v7143_v26 = vrot.slane %v7135_v16, %v11703_v39  ;;  %v7150_v29 = vrot.slane %v7136_v25, %v11703_v39  ;;  %v7151_v30 = vcombine.low %v7119_v11, %v7134_v13  ;;  %v7152_v8 = vcombine.high %v7119_v11, %v7134_v13 }
0x188c   : > { %v7252_v13 = vrot.slane %v7093_v46, %v11695_v7  ;;  %v7259_v16 = vrot.slane %v7245_v59, %v11695_v7 }
0x188d   : > { %v7159_v31 = vrot.slane %v7151_v30, %v11703_v39  ;;  %v7166_v51 = vrot.slane %v7152_v8, %v11703_v39  ;;  %v7311_v52 = vcombine.low %v7143_v26, %v7150_v29  ;;  %v9779_v32 = vcombine.high %v7143_v26, %v7150_v29 }
0x188f   : > { %v7318_v33 = vrot.slane %v7311_v52, %v11695_v7  ;;  %v7326_v34 = vrot.slane %v9779_v32, %v11695_v7  ;;  %v7327_v35 = vcombine.low %v7159_v31, %v7166_v51  ;;  %v9780_v36 = vcombine.high %v7159_v31, %v7166_v51 }
0x1891   : > { %v7334_v21 = vrot.slane %v7327_v35, %v11695_v7  ;;  %v7342_v37 = vrot.slane %v9780_v36, %v11695_v7  ;;  %v7343_v38 = vcombine.low %v7318_v33, %v7326_v34 }
0x1893   : > { %v7351_v40 = vcombine.low %v7334_v21, %v7342_v37  ;;  %v7350_v57 = vrot.slane %v7343_v38, %v11703_v39 }
0x1895   : > { %v7358_v60 = vrot.slane %v7351_v40, %v11703_v39 }
0x1897   : > { %v7359_v41 = vcombine.low %v7350_v57, %v7358_v60  ;;  %v7360_v42 = vcombine.high %v7350_v57, %v7358_v60 }
0x1899   : > { %10187 = vmatmul.mubr.msk.f32.vlgmr.msra.gmra.mrb[10].mxu1 %vm5463_vm9, %v7359_v41  ;;  %10192 = vmatmul.mubr.msk.f32.vlgmr.msra.gmra.mrb[20].mxu0 %vm5463_vm9, %v7360_v42 }
0x189a   : > { %10196 = vmatprep.mubr.msk.f32.mxu1 %vm10814_vm8, %v10812_v6  ;;  %10201 = vmatprep.mubr.msk.f32.mxu0 %vm10814_vm8, %v10812_v6 }
0x196c   : > { %v7533_v43 = vpop.f32.mrb[10].mxu1  ;;  %v7609_v44 = vpop.f32.mrb[20].mxu0 }
0x196d   : > { %v10188_v45 = vpop.f32.mrb[11].mxu1  ;;  %v10193_v50 = vpop.f32.mrb[21].mxu0  ;;  %v7616_v53 = vsel %vm5463_vm9, %v7609_v44, -inf  ;;  %v7613_v55 = vsel %vm5463_vm9, %v7533_v43, -inf }
0x196e   : > { %7617 = vmax.xlane.f32.xlu0 %v7616_v53  ;;  %7614 = vmax.xlane.f32.xlu1 %v7613_v55 }
0x197f   : > { %7973 = vrot.lane.b32.xlu1 %v11941_v15, %s10813_s15 }
0x19fb   : > { %v7618_v56 = vpop.xlane.xlu0 %7617  ;;  %v7615_v49 = vpop.xlane.xlu1 %7614 }
0x19fc   : > { %v7620_v58 = vsub.f32 %v7609_v44, %v7618_v56  ;;  %v7619_v22 = vsub.f32 %v7533_v43, %v7615_v49 }
0x19fe   : > { %v7623_v54 = vmul.f32 1.442695, %v7620_v58  ;;  %v7621_v61 = vmul.f32 1.442695, %v7619_v22 }
0x19ff   : > { %v7974_v19 = vpop.permute.xlu1 %7973 }
0x1a00   : > { %10608 = vpow2.f32 %v7623_v54  ;;  %v7991_v23 = vcombine.high %v7974_v19, %v10812_v6  ;;  %v7998_v4 = vrot.slane %v7974_v19, %v11695_v7 }
0x1a01   : > { %10610 = vpow2.f32 %v7621_v61 }
0x1a02   : > { %v8005_v27 = vrot.slane %v7991_v23, %v11695_v7  ;;  %v8006_v30 = vcombine.low %v7983_v18, %v7998_v4  ;;  %v8007_v8 = vcombine.high %v7983_v18, %v7998_v4 }
0x1a04   : > { %v8022_v17 = vcombine.low %v7990_v12, %v8005_v27  ;;  %v8023_v2 = vcombine.high %v7990_v12, %v8005_v27  ;;  %v8014_v41 = vrot.slane %v8006_v30, %v11703_v39  ;;  %v8021_v42 = vrot.slane %v8007_v8, %v11703_v39 }
0x1a06   : > { %v8037_v51 = vrot.slane %v8023_v2, %v11703_v39 }
0x1a0a   : > { %v12018_v62 = vpop.eup %10608 }
0x1a0b   : > { %v12020_v63 = vpop.eup %10610  ;;  %v7628_v0 = vsel %vm5463_vm9, %v12018_v62, 0.0 }
0x1a0c   : > { %7629 = vadd.xlane.f32.xlu1 %v7628_v0  ;;  %v7625_v3 = vsel %vm5463_vm9, %v12020_v63, 0.0 }
0x1a0d   : > { %7626 = vadd.xlane.f32.xlu0 %v7625_v3  ;;  %v8162_v3 = vcombine.low %v8014_v41, %v8021_v42 }
0x1a1d   : > { %7903 = vrot.lane.b32.xlu1 %v11984_v9, %s10813_s15  ;;  %v8030_v9 = vrot.slane %v8022_v17, %v11703_v39 }
0x1a1f   : > { %v8178_v55 = vcombine.low %v8030_v9, %v8037_v51  ;;  %v9796_v56 = vcombine.high %v8030_v9, %v8037_v51 }
0x1a21   : > { %v8185_v12 = vrot.slane %v8178_v55, %v11695_v7  ;;  %v8193_v59 = vrot.slane %v9796_v56, %v11695_v7 }
0x1a23   : > { %7242 = vrot.lane.b32.xlu0 %v7093_v46, %s10813_s15  ;;  %v9795_v46 = vcombine.high %v8014_v41, %v8021_v42 }
0x1a99   : > { %v7630_v10 = vpop.xlane.xlu1 %7629 }
0x1a9a   : > { %v7627_v1 = vpop.xlane.xlu0 %7626  ;;  %10612 = vrcp.f32 %v7630_v10 }
0x1a9b   : > { %10614 = vrcp.f32 %v7627_v1 }
0x1a9d   : > { %v7904_v11 = vpop.permute.xlu1 %7903 }
0x1a9e   : > { %v7243_v25 = vpop.permute.xlu0 %7242  ;;  %v7921_v26 = vcombine.high %v7904_v11, %v10812_v6  ;;  %v7928_v29 = vrot.slane %v7904_v11, %v11695_v7 }
0x1a9f   : > { %v7260_v31 = vcombine.high %v7243_v25, %v10812_v6  ;;  %v7267_v15 = vrot.slane %v7243_v25, %v11695_v7 }
0x1aa0   : > { %v7935_v52 = vrot.slane %v7921_v26, %v11695_v7  ;;  %v7936_v35 = vcombine.low %v7913_v20, %v7928_v29  ;;  %v7937_v36 = vcombine.high %v7913_v20, %v7928_v29  ;;  %v8169_v20 = vrot.slane %v8162_v3, %v11695_v7 }
0x1aa1   : > { %v7274_v32 = vrot.slane %v7260_v31, %v11695_v7  ;;  %v7275_v33 = vcombine.low %v7252_v13, %v7267_v15  ;;  %v7276_v34 = vcombine.high %v7252_v13, %v7267_v15  ;;  %v8202_v26 = vcombine.low %v8185_v12, %v8193_v59 }
0x1aa2   : > { %v7952_v21 = vcombine.low %v7920_v24, %v7935_v52  ;;  %v7953_v37 = vcombine.high %v7920_v24, %v7935_v52  ;;  %v7944_v58 = vrot.slane %v7936_v35, %v11703_v39  ;;  %v7951_v0 = vrot.slane %v7937_v36, %v11703_v39 }
0x1aa3   : > { %v7283_v38 = vrot.slane %v7275_v33, %v11703_v39  ;;  %v7290_v40 = vrot.slane %v7276_v34, %v11703_v39  ;;  %v7291_v57 = vcombine.low %v7259_v16, %v7274_v32  ;;  %v7292_v60 = vcombine.high %v7259_v16, %v7274_v32 }
0x1aa4   : > { %v7960_v43 = vrot.slane %v7952_v21, %v11703_v39  ;;  %v7967_v53 = vrot.slane %v7953_v37, %v11703_v39  ;;  %v10613_v10 = vpop.eup %10612  ;;  %v8112_v17 = vcombine.low %v7944_v58, %v7951_v0  ;;  %v9793_v2 = vcombine.high %v7944_v58, %v7951_v0 }
0x1aa5   : > { %v7299_v44 = vrot.slane %v7291_v57, %v11703_v39  ;;  %v7306_v45 = vrot.slane %v7292_v60, %v11703_v39  ;;  %v7411_v50 = vcombine.low %v7283_v38, %v7290_v40  ;;  %v9783_v49 = vcombine.high %v7283_v38, %v7290_v40  ;;  %v10615_v4 = vpop.eup %10614 }
0x1aa6   : > { %v8128_v27 = vcombine.low %v7960_v43, %v7967_v53  ;;  %v9794_v28 = vcombine.high %v7960_v43, %v7967_v53  ;;  %v8177_v24 = vrot.slane %v9795_v46, %v11695_v7  ;;  %v8119_v29 = vrot.slane %v8112_v17, %v11695_v7 }
0x1aa7   : > { %v7418_v22 = vrot.slane %v7411_v50, %v11695_v7  ;;  %v7427_v54 = vcombine.low %v7299_v44, %v7306_v45  ;;  %v9784_v61 = vcombine.high %v7299_v44, %v7306_v45  ;;  %v7426_v19 = vrot.slane %v9783_v49, %v11695_v7 }
0x1aa8   : > { %v8135_v11 = vrot.slane %v8128_v27, %v11695_v7  ;;  %v8143_v13 = vrot.slane %v9794_v28, %v11695_v7  ;;  %v8127_v30 = vrot.slane %v9793_v2, %v11695_v7  ;;  %v8194_v15 = vcombine.low %v8169_v20, %v8177_v24 }
0x1aa9   : > { %v7434_v23 = vrot.slane %v7427_v54, %v11695_v7  ;;  %v7442_v5 = vrot.slane %v9784_v61, %v11695_v7  ;;  %v7443_v1 = vcombine.low %v7418_v22, %v7426_v19  ;;  %v7632_v9 = vmul.f32 %v10615_v4, %v12020_v63 }
0x1aaa   : > { %v7634_v51 = vmul.f32 %v10613_v10, %v12018_v62  ;;  %v8152_v52 = vcombine.low %v8135_v11, %v8143_v13  ;;  %v8209_v32 = vrot.slane %v8202_v26, %v11703_v39  ;;  %v8144_v33 = vcombine.low %v8119_v29, %v8127_v30 }
0x1aab   : > { %v7451_v18 = vcombine.low %v7434_v23, %v7442_v5  ;;  %v7450_v16 = vrot.slane %v7443_v1, %v11703_v39  ;;  %v8201_v34 = vrot.slane %v8194_v15, %v11703_v39  ;;  %v8046_v30 = vcombine.high %v11990_v14, %v10812_v6 }
0x1aac   : > { %v8159_v62 = vrot.slane %v8152_v52, %v11703_v39  ;;  %v8151_v36 = vrot.slane %v8144_v33, %v11703_v39 }
0x1aad   : > { %v7458_v25 = vrot.slane %v7451_v18, %v11703_v39  ;;  %v8210_v63 = vcombine.low %v8201_v34, %v8209_v32  ;;  %v8211_v35 = vcombine.high %v8201_v34, %v8209_v32  ;;  %v8060_v32 = vrot.slane %v8046_v30, %v11695_v7 }
0x1aae   : > { %v8160_v21 = vcombine.low %v8151_v36, %v8159_v62  ;;  %v8161_v37 = vcombine.high %v8151_v36, %v8159_v62 }
0x1aaf   : > { %v7459_v8 = vcombine.low %v7450_v16, %v7458_v25  ;;  %v7460_v31 = vcombine.high %v7450_v16, %v7458_v25 }
0x1ab1   : > { %10195 = vmatpush3.msra.mxu1 %v7459_v8  ;;  %10200 = vmatpush3.msra.mxu0 %v7460_v31 }
0x1ab2   : > { %10197 = vmatmul.mubr.msk.f32.vlgmr.msra.gmra.mrb[12].mxu1 %vm5463_vm9, %v7632_v9  ;;  %10202 = vmatmul.mubr.msk.f32.vlgmr.msra.gmra.mrb[22].mxu0 %vm5463_vm9, %v7634_v51  ;;  %v8053_v9 = vrot.slane %v11990_v14, %v11695_v7 }
0x1ab3   : > { %10204 = vmatprep.subr.mxu1 %v10812_v6  ;;  %10209 = vmatprep.subr.mxu0 %v10812_v6 }
0x1ab4   : > { %10206 = vmatprep.mubr.msk.f32.mxu1 %vm10814_vm8, %v10812_v6  ;;  %10211 = vmatprep.mubr.msk.f32.mxu0 %vm10814_vm8, %v10812_v6 }
0x1ab8   : > { %10205 = vmatpush3.xpose.msk.msra.mxu1 %vm5463_vm9, %v8210_v63  ;;  %10210 = vmatpush3.xpose.msk.msra.mxu0 %vm5463_vm9, %v8211_v35 }
0x1ab9   : > { %10214 = vmatprep.subr.mxu1 %v10812_v6  ;;  %10219 = vmatprep.subr.mxu0 %v10812_v6 }
0x1abb   : > { %10207 = vmatmul.mubr.msk.f32.vlgmr.msra.gmra.mrb[14].mxu1 %vm5463_vm9, %v8160_v21  ;;  %10212 = vmatmul.mubr.msk.f32.vlgmr.msra.gmra.mrb[24].mxu0 %vm5463_vm9, %v8161_v37 }
0x1abc   : > { %10216 = vmatprep.mubr.msk.f32.mxu1 %vm10814_vm8, %v10812_v6  ;;  %10221 = vmatprep.mubr.msk.f32.mxu0 %vm10814_vm8, %v10812_v6 }
0x1b85   : > { %v7704_v38 = vpop.f32.mrb[12].mxu1  ;;  %v7777_v40 = vpop.f32.mrb[22].mxu0 }
0x1b86   : > { %v7781_v57 = vcombine.high %v7704_v38, %v10812_v6  ;;  %v7788_v60 = vrot.slane %v7704_v38, %v11695_v7  ;;  %v7796_v41 = vcombine.high %v7777_v40, %v10812_v6  ;;  %v7803_v42 = vrot.slane %v7777_v40, %v11695_v7  ;;  %v10198_v43 = vpop.f32.mrb[13].mxu1  ;;  %v10203_v44 = vpop.f32.mrb[23].mxu0 }
0x1b88   : > { %v7795_v45 = vrot.slane %v7781_v57, %v11695_v7  ;;  %v7810_v50 = vrot.slane %v7796_v41, %v11695_v7  ;;  %v7811_v53 = vcombine.low %v7788_v60, %v7803_v42  ;;  %v7812_v55 = vcombine.high %v7788_v60, %v7803_v42 }
0x1b8a   : > { %v7819_v56 = vrot.slane %v7811_v53, %v11703_v39  ;;  %v7826_v49 = vrot.slane %v7812_v55, %v11703_v39  ;;  %v7827_v58 = vcombine.low %v7795_v45, %v7810_v50  ;;  %v7828_v22 = vcombine.high %v7795_v45, %v7810_v50 }
0x1b8c   : > { %v7835_v54 = vrot.slane %v7827_v58, %v11703_v39  ;;  %v7842_v61 = vrot.slane %v7828_v22, %v11703_v39  ;;  %v7847_v0 = vcombine.low %v7819_v56, %v7826_v49  ;;  %v9791_v3 = vcombine.high %v7819_v56, %v7826_v49 }
0x1b8e   : > { %v7854_v46 = vrot.slane %v7847_v0, %v11695_v7  ;;  %v7862_v19 = vrot.slane %v9791_v3, %v11695_v7  ;;  %v7863_v23 = vcombine.low %v7835_v54, %v7842_v61  ;;  %v9792_v5 = vcombine.high %v7835_v54, %v7842_v61  ;;  %v8334_v27 = vpop.f32.mrb[14].mxu1  ;;  %v8410_v28 = vpop.f32.mrb[24].mxu0 }
0x1b8f   : > { %v10208_v10 = vpop.f32.mrb[15].mxu1  ;;  %v10213_v12 = vpop.f32.mrb[25].mxu0  ;;  %v8417_v59 = vsel %vm5463_vm9, %v8410_v28, -inf  ;;  %v8414_v1 = vsel %vm5463_vm9, %v8334_v27, -inf }
0x1b90   : > { %8418 = vmax.xlane.f32.xlu0 %v8417_v59  ;;  %8415 = vmax.xlane.f32.xlu1 %v8414_v1  ;;  %v7870_v4 = vrot.slane %v7863_v23, %v11695_v7  ;;  %v7878_v17 = vrot.slane %v9792_v5, %v11695_v7  ;;  %v7879_v2 = vcombine.low %v7854_v46, %v7862_v19  ;;  %v4779_v10 = vld [vmem:[%s11295_s4] sm:$0xff]  ;;  %v4780_v12 = vld [vmem:[%s11295_s4 + $0x8] sm:$0xff] }
0x1b91   : > { %v10368_v59 = vpack.c.bf16 %v4780_v12, %v4779_v10  ;;  %v4791_v10 = vld [vmem:[%s11314_s5 + $0x10] sm:$0xff] }
0x1b92   : > { %v7887_v18 = vcombine.low %v7870_v4, %v7878_v17  ;;  %v7886_v20 = vrot.slane %v7879_v2, %v11703_v39 }
0x1b94   : > { %v7894_v24 = vrot.slane %v7887_v18, %v11703_v39 }
0x1b96   : > { %v7896_v11 = vcombine.high %v7886_v20, %v7894_v24  ;;  %v7895_v13 = vcombine.low %v7886_v20, %v7894_v24 }
0x1ba1   : > { %8043 = vrot.lane.b32.xlu1 %v11990_v14, %s10813_s15 }
0x1c1d   : > { %v8419_v16 = vpop.xlane.xlu0 %8418  ;;  %v8416_v25 = vpop.xlane.xlu1 %8415 }
0x1c1e   : > { %v8421_v26 = vsub.f32 %v8410_v28, %v8419_v16  ;;  %v8420_v29 = vsub.f32 %v8334_v27, %v8416_v25 }
0x1c20   : > { %v8422_v8 = vmul.f32 1.442695, %v8420_v29  ;;  %v8424_v31 = vmul.f32 1.442695, %v8421_v26 }
0x1c21   : > { %v8044_v15 = vpop.permute.xlu1 %8043 }
0x1c22   : > { %v8061_v51 = vcombine.high %v8044_v15, %v10812_v6  ;;  %v8068_v52 = vrot.slane %v8044_v15, %v11695_v7  ;;  %10616 = vpow2.f32 %v8422_v8 }
0x1c23   : > { %10618 = vpow2.f32 %v8424_v31 }
0x1c24   : > { %v8075_v33 = vrot.slane %v8061_v51, %v11695_v7  ;;  %v8076_v34 = vcombine.low %v8053_v9, %v8068_v52  ;;  %v8077_v62 = vcombine.high %v8053_v9, %v8068_v52 }
0x1c26   : > { %v8084_v63 = vrot.slane %v8076_v34, %v11703_v39  ;;  %v8091_v35 = vrot.slane %v8077_v62, %v11703_v39  ;;  %v8092_v36 = vcombine.low %v8060_v32, %v8075_v33  ;;  %v8093_v21 = vcombine.high %v8060_v32, %v8075_v33 }
0x1c28   : > { %v8100_v14 = vrot.slane %v8092_v36, %v11703_v39  ;;  %v8107_v37 = vrot.slane %v8093_v21, %v11703_v39  ;;  %v8212_v38 = vcombine.low %v8084_v63, %v8091_v35  ;;  %v9797_v40 = vcombine.high %v8084_v63, %v8091_v35 }
0x1c2a   : > { %v8219_v57 = vrot.slane %v8212_v38, %v11695_v7  ;;  %v8227_v60 = vrot.slane %v9797_v40, %v11695_v7  ;;  %v8228_v41 = vcombine.low %v8100_v14, %v8107_v37  ;;  %v9798_v42 = vcombine.high %v8100_v14, %v8107_v37 }
0x1c2c   : > { %v8235_v43 = vrot.slane %v8228_v41, %v11695_v7  ;;  %v8243_v44 = vrot.slane %v9798_v42, %v11695_v7  ;;  %v8244_v45 = vcombine.low %v8219_v57, %v8227_v60  ;;  %v10617_v50 = vpop.eup %10616  ;;  %v9809_v60 = vld [vmem:[%s2444_s1] ss:$0 sm:$0xff]  ;;  %s12470_s1 = sld [smem:[#allocation66_spill]] }
0x1c2d   : > { %v8426_v53 = vsel %vm5463_vm9, %v10617_v50, 0.0  ;;  %v10619_v56 = vpop.eup %10618 }
0x1c2e   : > { %v8252_v55 = vcombine.low %v8235_v43, %v8243_v44  ;;  %8427 = vadd.xlane.f32.xlu0 %v8426_v53  ;;  %v8251_v49 = vrot.slane %v8244_v45, %v11703_v39  ;;  %v8429_v22 = vsel %vm5463_vm9, %v10619_v56, 0.0 }
0x1c30   : > { %v8259_v58 = vrot.slane %v8252_v55, %v11703_v39 }
0x1c32   : > { %v8260_v54 = vcombine.low %v8251_v49, %v8259_v58  ;;  %v8261_v61 = vcombine.high %v8251_v49, %v8259_v58  ;;  %8430 = vadd.xlane.f32.xlu0 %v8429_v22 }
0x1c34   : > { %10215 = vmatpush3.msra.mxu1 %v8260_v54  ;;  %10220 = vmatpush3.msra.mxu0 %v8261_v61 }
0x1c35   : > { %10369 = vmatprep.subr.bf16.mxu1 %v10368_v59 }
0x1c48   : > { %7898 = vrot.lane.b32.xlu0 %v7896_v11, %s10817_s20 }
0x1cbb   : > { %v8428_v0 = vpop.xlane.xlu0 %8427 }
0x1cbc   : > { %10620 = vrcp.f32 %v8428_v0  ;;  %v4784_v0 = vld [vmem:[%s11304_s22] sm:$0xff] }
0x1cbf   : > { %v8431_v3 = vpop.xlane.xlu0 %8430 }
0x1cc0   : > { %10622 = vrcp.f32 %v8431_v3  ;;  %v4785_v3 = vld [vmem:[%s11304_s22 + $0x8] sm:$0xff] }
0x1cc3   : > { %v7899_v19 = vpop.permute.xlu0 %7898 }
0x1cc4   : > { %v7901_v5 = vsel %vm5463_vm9, %v7895_v13, %v7899_v19  ;;  %v4786_v19 = vld [vmem:[%s11304_s22 + $0x10] sm:$0xff] }
0x1cc6   : > { %v10621_v46 = vpop.eup %10620 }
0x1cc7   : > { %v8433_v23 = vmul.f32 %v10621_v46, %v10617_v50  ;;  %v10372_v46 = vpack.c.bf16 %v4785_v3, %v4784_v0 }
0x1cc9   : > { %10217 = vmatmul.mubr.msk.f32.vlgmr.msra.gmra.mrb[16].mxu1 %vm5463_vm9, %v8433_v23  ;;  %10373 = vmatprep.subr.bf16.mxu0 %v10372_v46  ;;  %v4787_v23 = vld [vmem:[%s11304_s22 + $0x18] sm:$0xff] }
0x1cca   : > { %v10623_v27 = vpop.eup %10622  ;;  %10228 = vmatprep.mubr.msk.f32.mxu1 %vm6712_vm10, %v7901_v5  ;;  %10371 = vmatpush3.bf16.msra.mxu1 %v10368_v59  ;;  %v10376_v5 = vpack.c.bf16 %v4787_v23, %v4786_v19  ;;  %v4792_v59 = vld [vmem:[%s11314_s5 + $0x18] sm:$0xff] }
0x1ccb   : > { %v8435_v28 = vmul.f32 %v10623_v27, %v10619_v56  ;;  %v4789_v27 = vld [vmem:[%s11314_s5] sm:$0xff] }
0x1ccd   : > { %10222 = vmatmul.mubr.msk.f32.vlgmr.msra.gmra.mrb[26].mxu0 %vm5463_vm9, %v8435_v28  ;;  %v4790_v28 = vld [vmem:[%s11314_s5 + $0x8] sm:$0xff] }
0x1cce   : > { %10375 = vmatpush3.bf16.msra.mxu0 %v10372_v46  ;;  %v10380_v12 = vpack.c.bf16 %v4790_v28, %v4789_v27 }
0x1ccf   : > { %10377 = vmatprep.subr.bf16.mxu0 %v10376_v5 }
0x1cd0   : > { %10381 = vmatprep.subr.bf16.mxu1 %v10380_v12 }
0x1cd2   : > { %10379 = vmatpush3.bf16.msra.mxu0 %v10376_v5 }
0x1d9c   : > { %v8505_v1 = vpop.f32.mrb[16].mxu1 }
0x1d9d   : > { %v10218_v4 = vpop.f32.mrb[17].mxu1  ;;  %v8582_v17 = vcombine.high %v8505_v1, %v10812_v6  ;;  %v8589_v18 = vrot.slane %v8505_v1, %v11695_v7  ;;  %v10384_v1 = vpack.c.bf16 %v4792_v59, %v4791_v10 }
0x1d9e   : > { %v4793_v4 = vld [vmem:[%s11314_s5 + $0x20] sm:$0xff] }
0x1d9f   : > { %v8596_v13 = vrot.slane %v8582_v17, %v11695_v7  ;;  %v4794_v17 = vld [vmem:[%s11314_s5 + $0x28] sm:$0xff] }
0x1da0   : > { %v8578_v2 = vpop.f32.mrb[26].mxu0 }
0x1da1   : > { %v8597_v20 = vcombine.high %v8578_v2, %v10812_v6  ;;  %v8604_v24 = vrot.slane %v8578_v2, %v11695_v7  ;;  %v10223_v11 = vpop.f32.mrb[27].mxu0  ;;  %v10388_v2 = vpack.c.bf16 %v4794_v17, %v4793_v4 }
0x1da2   : > { %v4797_v11 = vld [vmem:[%s11314_s5 + $0x40] sm:$0xff] }
0x1da3   : > { %v8611_v16 = vrot.slane %v8597_v20, %v11695_v7  ;;  %v8612_v25 = vcombine.low %v8589_v18, %v8604_v24  ;;  %v8613_v26 = vcombine.high %v8589_v18, %v8604_v24  ;;  %v4795_v18 = vld [vmem:[%s11314_s5 + $0x30] sm:$0xff]  ;;  %v4796_v20 = vld [vmem:[%s11314_s5 + $0x38] sm:$0xff] }
0x1da4   : > { %v10392_v24 = vpack.c.bf16 %v4796_v20, %v4795_v18 }
0x1da5   : > { %v8620_v29 = vrot.slane %v8612_v25, %v11703_v39  ;;  %v8627_v30 = vrot.slane %v8613_v26, %v11703_v39  ;;  %v8628_v8 = vcombine.low %v8596_v13, %v8611_v16  ;;  %v8629_v31 = vcombine.high %v8596_v13, %v8611_v16  ;;  %v4798_v13 = vld [vmem:[%s11314_s5 + $0x48] sm:$0xff]  ;;  %v4799_v25 = vld [vmem:[%s11314_s5 + $0x50] sm:$0xff]  ;;  %v4800_v26 = vld [vmem:[%s11314_s5 + $0x58] sm:$0xff] }
0x1da6   : > { %v10396_v16 = vpack.c.bf16 %v4798_v13, %v4797_v11 }
0x1da7   : > { %v8636_v15 = vrot.slane %v8628_v8, %v11703_v39  ;;  %v8643_v9 = vrot.slane %v8629_v31, %v11703_v39  ;;  %v8648_v6 = vcombine.low %v8620_v29, %v8627_v30  ;;  %v9805_v51 = vcombine.high %v8620_v29, %v8627_v30  ;;  %v4801_v30 = vld [vmem:[%s11314_s5 + $0x60] sm:$0xff]  ;;  %v4802_v8 = vld [vmem:[%s11314_s5 + $0x68] sm:$0xff] }
0x1da8   : > { %v10400_v29 = vpack.c.bf16 %v4800_v26, %v4799_v25  ;;  %v10404_v31 = vpack.c.bf16 %v4802_v8, %v4801_v30 }
0x1da9   : > { %v8655_v52 = vrot.slane %v8648_v6, %v11695_v7  ;;  %v8663_v32 = vrot.slane %v9805_v51, %v11695_v7  ;;  %v8664_v33 = vcombine.low %v8636_v15, %v8643_v9  ;;  %v9806_v34 = vcombine.high %v8636_v15, %v8643_v9 }
0x1dab   : > { %v8671_v62 = vrot.slane %v8664_v33, %v11695_v7  ;;  %v8679_v63 = vrot.slane %v9806_v34, %v11695_v7  ;;  %v8680_v35 = vcombine.low %v8655_v52, %v8663_v32  ;;  %v9810_v34 = vld [vmem:[%s2449_s19] ss:$0 sm:$0xff] }
0x1dad   : > { %v8688_v36 = vcombine.low %v8671_v62, %v8679_v63  ;;  %v8687_v21 = vrot.slane %v8680_v35, %v11703_v39 }
0x1daf   : > { %v8695_v14 = vrot.slane %v8688_v36, %v11703_v39  ;;  %v9811_v36 = vld [vmem:[%s2454_s9] ss:$0 sm:$0xff] }
0x1db1   : > { %v8697_v37 = vcombine.high %v8687_v21, %v8695_v14  ;;  %v8696_v38 = vcombine.low %v8687_v21, %v8695_v14 }
0x1db3   : > { %8699 = vrot.lane.b32.xlu1 %v8697_v37, %s10817_s20 }
0x1e25   : > { %v8700_v40 = vpop.permute.xlu1 %8699 }
0x1e26   : > { %v8702_v57 = vsel %vm5463_vm9, %v8696_v38, %v8700_v40  ;;  %v4803_v40 = vld [vmem:[%s11314_s5 + $0x70] sm:$0xff] }
0x1e27   : > { %10229 = vmatmul.mubr.msk.f32.vlgmr.msra.gmra.mrb[18].mxu1 %vm6712_vm10, %v8702_v57  ;;  %v4804_v57 = vld [vmem:[%s11314_s5 + $0x78] sm:$0xff] }
0x1e28   : > { %10383 = vmatpush3.bf16.msra.mxu1 %v10380_v12 }
0x1e29   : > { %10385 = vmatprep.subr.bf16.mxu1 %v10384_v1 }
0x1e2c   : > { %10387 = vmatpush3.bf16.msra.mxu1 %v10384_v1 }
0x1e2d   : > { %10389 = vmatprep.subr.bf16.mxu1 %v10388_v2 }
0x1e30   : > { %10391 = vmatpush3.bf16.msra.mxu1 %v10388_v2 }
0x1e31   : > { %10393 = vmatprep.subr.bf16.mxu1 %v10392_v24 }
0x1e34   : > { %10395 = vmatpush3.bf16.msra.mxu1 %v10392_v24 }
0x1e35   : > { %10397 = vmatprep.subr.bf16.mxu1 %v10396_v16 }
0x1e38   : > { %10399 = vmatpush3.bf16.msra.mxu1 %v10396_v16 }
0x1e39   : > { %10401 = vmatprep.subr.bf16.mxu1 %v10400_v29 }
0x1e3c   : > { %10403 = vmatpush3.bf16.msra.mxu1 %v10400_v29 }
0x1e3d   : > { %10405 = vmatprep.subr.bf16.mxu1 %v10404_v31 }
0x1e40   : > { %10407 = vmatpush3.bf16.msra.mxu1 %v10404_v31 }
0x1efa   : > { %v10230_v41 = vpop.f32.mrb[18].mxu1 }
0x1efb   : > { %v8785_v7 = vadd.f32 %v10230_v41, %v11913_v47  ;;  %v8775_v42 = vpop.f32.mrb[19].mxu1  ;;  %v9812_v41 = vld [vmem:[%s2466_s8] ss:$0 sm:$0xff] }
0x1efc   : > { %v8784_v43 = vadd.f32 %v8775_v42, %v11915_v48 }
0x1efd   : > { %v12172_v44 = vadd.f32 %v9809_v60, %v8785_v7 }
0x1efe   : > { %v12174_v39 = vadd.f32 %v9809_v60, %v8784_v43  ;;  %v10408_v60 = vpack.c.bf16 %v4804_v57, %v4803_v40 }
0x1eff   : > { %v8797_v45 = vsel %vm4810_vm7, %v12172_v44, 0.0 }
0x1f00   : > { %8798 = vadd.xlane.f32.xlu0 %v8797_v45  ;;  %v8794_v50 = vsel %vm4810_vm7, %v12174_v39, 0.0  ;;  %10409 = vmatprep.subr.bf16.mxu1 %v10408_v60 }
0x1f01   : > { %8795 = vadd.xlane.f32.xlu1 %v8794_v50  ;;  %10411 = vmatpush3.bf16.msra.mxu1 %v10408_v60 }
0x1f8d   : > { %v8799_v53 = vpop.xlane.xlu0 %8798 }
0x1f8e   : > { %v8801_v47 = vmul.f32 0.03125, %v8799_v53  ;;  %v8796_v55 = vpop.xlane.xlu1 %8795 }
0x1f8f   : > { %v8800_v48 = vmul.f32 0.03125, %v8796_v55 }
0x1f90   : > { %v12181_v56 = vsub.f32 %v12172_v44, %v8801_v47  ;;  %v9815_v47 = vld [vmem:[%s12470_s1] ss:$0 sm:$0xff] }
0x1f91   : > { %v12184_v49 = vsub.f32 %v12174_v39, %v8800_v48 }
0x1f92   : > { %v8805_v58 = vmul.f32 %v12181_v56, %v12181_v56 }
0x1f93   : > { %v8804_v22 = vmul.f32 %v12184_v49, %v12184_v49 }
0x1f94   : > { %v8809_v54 = vsel %vm4810_vm7, %v8805_v58, 0.0 }
0x1f95   : > { %8810 = vadd.xlane.f32.xlu1 %v8809_v54  ;;  %v8806_v61 = vsel %vm4810_vm7, %v8804_v22, 0.0 }
0x1f96   : > { %8807 = vadd.xlane.f32.xlu0 %v8806_v61 }
0x2022   : > { %v8811_v15 = vpop.xlane.xlu1 %8810 }
0x2023   : > { %v8813_v9 = vmul.f32 0.03125, %v8811_v15  ;;  %v8808_v6 = vpop.xlane.xlu0 %8807 }
0x2024   : > { %v8812_v51 = vmul.f32 0.03125, %v8808_v6 }
0x2025   : > { %v8815_v52 = vadd.f32 1e-05, %v8813_v9 }
0x2026   : > { %v8814_v32 = vadd.f32 1e-05, %v8812_v51 }
0x2027   : > { %10624 = vrsqrt.f32 %v8815_v52 }
0x2028   : > { %10626 = vrsqrt.f32 %v8814_v32 }
0x2031   : > { %v10625_v33 = vpop.eup %10624 }
0x2032   : > { %v10627_v62 = vpop.eup %10626  ;;  %v8819_v63 = vmul.f32 %v10625_v33, %v12181_v56 }
0x2033   : > { %v8818_v35 = vmul.f32 %v10627_v62, %v12184_v49 }
0x2034   : > { %v8827_v21 = vmul.f32 %v9810_v34, %v8819_v63 }
0x2035   : > { %v8826_v14 = vmul.f32 %v9810_v34, %v8818_v35 }
0x2036   : > { %v8835_v38 = vadd.f32 %v9811_v36, %v8827_v21 }
0x2037   : > { %v8834_v37 = vadd.f32 %v9811_v36, %v8826_v14 }
0x2039   : > { %10239 = vmatprep.mubr.msk.f32.mxu0 %vm4810_vm7, %v8834_v37 }
0x203a   : > { %10240 = vmatmul.mubr.msk.f32.vlgmr.msra.gmra.mrb[28].mxu0 %vm4810_vm7, %v8835_v38 }
0x210d   : > { %v10241_v7 = vpop.f32.mrb[28].mxu0 }
0x210e   : > { %v8920_v42 = vadd.f32 %v10241_v7, %v9812_v41  ;;  %v8914_v43 = vpop.f32.mrb[29].mxu0 }
0x210f   : > { %v8915_v45 = vadd.f32 %v9812_v41, %v8914_v43 }
0x2110   : > { %v8924_v53 = vmax.f32 %v8920_v42, 0.0 }
0x2111   : > { %v8923_v50 = vmax.f32 %v8915_v45, 0.0 }
0x2113   : > { %10274 = vmatprep.mubr.f32.mxu1 %v8923_v50 }
0x2114   : > { %10275 = vmatmul.mubr.f32.vlgmr.msra.gmra.mrb[20].mxu1 %v8924_v53 }
0x21e7   : > { %v10276_v55 = vpop.f32.mrb[20].mxu1 }
0x21e8   : > { %v9001_v48 = vadd.f32 %v10276_v55, %v12172_v44  ;;  %v8991_v56 = vpop.f32.mrb[21].mxu1 }
0x21e9   : > { %v9000_v49 = vadd.f32 %v8991_v56, %v12174_v39 }
0x21ea   : > { %v9009_v58 = vadd.f32 %v9815_v47, %v9001_v48 }
0x21eb   : > { %v9008_v22 = vadd.f32 %v9815_v47, %v9000_v49 }
0x21ec   : > { %9011 = vst.msk [vmem:[#allocation3 + $0x8] sm:$0xff] %vm4810_vm7, %v9009_v58 }
0x21ed   : > { %9010 = vst.msk [vmem:[#allocation3] sm:$0xff] %vm4810_vm7, %v9008_v22 }
0x21ee PF: > { %s12471_s9 = sld [smem:[#allocation59_spill]] }
0x21f4   : > { %p9012_p0 = scmp.eq.s32.totalorder %s12471_s9, 1 }
0x21f6   : > { %p9013_p3 = pnand %p9012_p0, %p4742_p7 }
0x21f7   : > { %s12472_s24 = sld [smem:[#allocation54_spill]] (!%p9013_p3)  ;;  %vm9030_vm11 = vcmask (!%p9013_p3), 261120   ;;  %s12473_s19 = sld [smem:[#allocation56_spill]] (!%p9013_p3)  ;;  %v9017_v3 = vld [vmem:[#allocation3] sm:$0xff] (!%p9013_p3)  ;;  %v9018_v19 = vld [vmem:[#allocation3 + $0x8] sm:$0xff] (!%p9013_p3) }
0x21f8   : > { %9016 = sbr.rel (%p9013_p3) target bundleno = 8928 (0x22e0), region = 228  ;;  %10285 = vmatprep.mubr.msk.f32.mxu0 (!%p9013_p3), %vm9030_vm11, %v9017_v3  ;;  %v9816_v23 = vld [vmem:[#allocation6] ss:$0 sm:$0xff] (!%p9013_p3) }
0x21fd   : > { %v9019_v44 = vld [vmem:[%s12472_s24] sm:$0xff] (!%p9013_p3)  ;;  %v9020_v54 = vld [vmem:[%s12472_s24 + $0x8] sm:$0xff] (!%p9013_p3)  ;;  %v9021_v39 = vld [vmem:[%s12472_s24 + $0x10] sm:$0xff] (!%p9013_p3) }
0x21fe   : > { %v10412_v61 = vpack.c.bf16 (!%p9013_p3), %v9020_v54, %v9019_v44  ;;  %v9022_v0 = vld [vmem:[%s12472_s24 + $0x18] sm:$0xff] (!%p9013_p3) }
0x21ff   : > { %v10416_v46 = vpack.c.bf16 %v9022_v0, %v9021_v39 }
0x2200   : > { %10413 = vmatprep.subr.bf16.mxu0 %v10412_v61 }
0x2201   : > { %10415 = vmatpush3.bf16.msra.mxu0 %v10412_v61 }
0x2202   : > { %10417 = vmatprep.subr.bf16.mxu0 %v10416_v46 }
0x2205   : > { %10419 = vmatpush3.bf16.msra.mxu0 %v10416_v46 }
0x2208   : > { %10286 = vmatmul.mubr.msk.f32.vlgmr.msra.gmra.mrb[0].mxu0 %vm9030_vm11, %v9018_v19 }
0x22db   : > { %v10287_v5 = vpop.f32.mrb[0].mxu0 }
0x22dc   : > { %v9109_v27 = vadd.f32 %v10287_v5, %v9816_v23  ;;  %v9103_v28 = vpop.f32.mrb[1].mxu0 }
0x22dd   : > { %v9104_v10 = vadd.f32 %v9816_v23, %v9103_v28 }
0x22de   : > { %9113 = vst [vmem:[%s12473_s19 + $0x8] sm:$0xff] %v9109_v27 }
0x22df   : > { %9112 = vst [vmem:[%s12473_s19] sm:$0xff] %v9104_v10 }
0x22e0 PF: > { %s12474_s23 = sld [smem:[#allocation62_spill]]  ;;  %s12475_s15 = sld [smem:[#allocation57_spill]] }
0x22e1   : > { %s12476_s16 = sld [smem:[#allocation58_spill]]  ;;  %s12477_s18 = sld [smem:[#allocation65_spill]] }
0x22e2   : > { %s12478_s22 = sld [smem:[#allocation60_spill]]  ;;  %s12480_s26 = sld [smem:[#allocation63_spill]] }
0x22e3   : > { %s12481_s28 = sld [smem:[#allocation64_spill]] }
0x22e6   : > { %s107_s1 = sadd.s32 1, %s12474_s23   ;;  %s12479_s23 = sld [smem:[#allocation61_spill]] }
0x22e7   : > { %p104_p6 = scmp.ge.s32.totalorder %s107_s1, 6  }
0x22e9   :  { %106 = sbr.rel (!%p104_p6) target bundleno = 114 (0x72), region = 429 }
0x22f0   :  { %9125 = vsyncpa [#allocation5], 1 }
0x22f1   :  { %9127 = vsyncpa [#allocation5 + $0x1], 1 }
0x22f2   :  { %9128 = vsyncpa [#allocation7], 1 }

</bundles_post_ra>
